<compile_context>
chip_gen: v6e
topology: v6e:2x2x1
jax: 0.10.0
libtpu: 0.0.40
codegen_flags: <defaults>
</compile_context>

<pallas_src>
import functools

import jax
import jax.numpy as jnp
import numpy as np
from jax.experimental import pallas as pl
from jax.experimental.pallas import tpu as pltpu

B = 2            # batch
SEQ_LEN = 11     # seq_len (Guide_diff default)
INPUT_DIM = 2    # inputdim (use_time=False, use_id=False)
CHANNELS = 32    # args.channels  (GRU hidden size)
LAYERS = 2       # args.layers    (GRU num_layers)
OUTPUT_DIM = 2   # self.output_dim


# --------------------------------------------------------------------------
# Pallas kernel: whole GRU + output MLP forward in one invocation.
# Activations live on (rows = time-major batch*seq on sublanes,
# features on lanes).
# --------------------------------------------------------------------------
def gru_kernel(x_ref, gw_ref, w1b1_ref, w2b2_ref, out_ref,
               h0seq_ref, oflat_ref, *, batch, seq_len, hidden, in_dim):
    f32 = jnp.float32
    Bv, L, H, D = batch, seq_len, hidden, in_dim

    # ---- unpack the packed GRU weight slab (static, mostly 8-aligned rows) --
    wih1 = gw_ref[0:H, :]              # (H, 3H)   layer-1 input->hidden (T)
    whh0 = gw_ref[H:2 * H, :]          # (H, 3H)   layer-0 hidden->hidden (T)
    whh1 = gw_ref[2 * H:3 * H, :]      # (H, 3H)   layer-1 hidden->hidden (T)
    wih0 = gw_ref[3 * H:3 * H + D, :]  # (D, 3H)   layer-0 input->hidden (T)
    b0 = 3 * H + D
    b_ih0 = gw_ref[b0 + 0:b0 + 1, :]   # (1, 3H)
    b_hh0 = gw_ref[b0 + 1:b0 + 2, :]
    b_ih1 = gw_ref[b0 + 2:b0 + 3, :]
    b_hh1 = gw_ref[b0 + 3:b0 + 4, :]

    def run_layer(gi_all, whh, b_hh):
        # gi_all: (L*B, 3H) time-major precomputed x_t @ W_ih^T + b_ih.
        # PyTorch gate order along the 3H axis: [r | z | n].
        h = jnp.zeros((Bv, H), f32)
        hs = []
        for t in range(L):                                   # static unroll
            gi = gi_all[t * Bv:(t + 1) * Bv, :]              # (B, 3H)
            gh = jnp.dot(h, whh, preferred_element_type=f32) + b_hh
            r = jax.nn.sigmoid(gi[:, 0 * H:1 * H] + gh[:, 0 * H:1 * H])
            z = jax.nn.sigmoid(gi[:, 1 * H:2 * H] + gh[:, 1 * H:2 * H])
            n = jnp.tanh(gi[:, 2 * H:3 * H] + r * gh[:, 2 * H:3 * H])
            h = (1.0 - z) * n + z * h
            hs.append(h)
        return hs

    # ---- GRU layer 0: batch the input projection over all timesteps --------
    gi0 = jnp.dot(x_ref[...], wih0, preferred_element_type=f32) + b_ih0  # (L*B, 3H)
    h0s = run_layer(gi0, whh0, b_hh0)
    for t in range(L):
        h0seq_ref[t * Bv:(t + 1) * Bv, :] = h0s[t]           # time-major (L*B, H)

    # ---- GRU layer 1: one fused input projection over the layer-0 outputs --
    gi1 = jnp.dot(h0seq_ref[...], wih1, preferred_element_type=f32) + b_ih1
    h1s = run_layer(gi1, whh1, b_hh1)
    for t in range(L):
        # out_flat[b, t*H + c] = h1_t[b, c]  == torch reshape(B, L*H) of (B,L,H)
        oflat_ref[:, t * H:(t + 1) * H] = h1s[t]

    # ---- output_layer: Linear -> Dropout(eval: identity) -> Linear ---------
    w1 = w1b1_ref[0:L * H, :]            # (L*H, L*H)
    b1 = w1b1_ref[L * H:L * H + 1, :]    # (1,   L*H)
    w2 = w2b2_ref[0:L * H, :]            # (L*H, 2)
    b2 = w2b2_ref[L * H:L * H + 1, :]    # (1,   2)

    y1 = jnp.dot(oflat_ref[...], w1, preferred_element_type=f32) + b1
    # TODO(synk): nn.Dropout(0.1) is modeled in eval mode (identity); a
    # train-mode run would need pltpu.prng_seed/prng_random_bits masking.
    out_ref[...] = jnp.dot(y1, w2, preferred_element_type=f32) + b2


# --------------------------------------------------------------------------
# Parameters (deterministic, PyTorch layouts).
#   nn.GRU params:  weight_ih_l{k} (3H, in), weight_hh_l{k} (3H, H),
#                   bias_ih/hh_l{k} (3H,), all ~ U(-1/sqrt(H), 1/sqrt(H)).
#   output_layer:   Linear(C*L, C*L) and Linear(C*L, 2).
# --------------------------------------------------------------------------
def init_params(key):
    H, F = CHANNELS, CHANNELS * SEQ_LEN
    ks = jax.random.split(key, 12)

    def u(k, shape, fan):
        bound = 1.0 / np.sqrt(fan)
        return jax.random.uniform(k, shape, jnp.float32, -bound, bound)

    p = {}
    p['weight_ih_l0'] = u(ks[0], (3 * H, INPUT_DIM), H)
    p['weight_hh_l0'] = u(ks[1], (3 * H, H), H)
    p['bias_ih_l0'] = u(ks[2], (3 * H,), H)
    p['bias_hh_l0'] = u(ks[3], (3 * H,), H)
    p['weight_ih_l1'] = u(ks[4], (3 * H, H), H)
    p['weight_hh_l1'] = u(ks[5], (3 * H, H), H)
    p['bias_ih_l1'] = u(ks[6], (3 * H,), H)
    p['bias_hh_l1'] = u(ks[7], (3 * H,), H)
    p['ow1'] = u(ks[8], (F, F), F)
    p['ob1'] = u(ks[9], (F,), F)
    p['ow2'] = u(ks[10], (OUTPUT_DIM, F), F)
    p['ob2'] = u(ks[11], (OUTPUT_DIM,), F)
    return p


# One-time packing of parameters into kernel slabs (hoisted out of forward).
def pack_params(p):
    gru_w = jnp.concatenate([
        p['weight_ih_l1'].T,          # rows 0:32      (8-aligned)
        p['weight_hh_l0'].T,          # rows 32:64
        p['weight_hh_l1'].T,          # rows 64:96
        p['weight_ih_l0'].T,          # rows 96:98
        p['bias_ih_l0'][None, :],     # row 98
        p['bias_hh_l0'][None, :],     # row 99
        p['bias_ih_l1'][None, :],     # row 100
        p['bias_hh_l1'][None, :],     # row 101
    ], axis=0).astype(jnp.float32)                                  # (102, 96)
    w1b1 = jnp.concatenate([p['ow1'].T, p['ob1'][None, :]], axis=0
                           ).astype(jnp.float32)                    # (353, 352)
    w2b2 = jnp.concatenate([p['ow2'].T, p['ob2'][None, :]], axis=0
                           ).astype(jnp.float32)                    # (353, 2)
    return {'gru_w': gru_w, 'w1b1': w1b1, 'w2b2': w2b2}


# --------------------------------------------------------------------------
# Forward wrapper: only the data-dependent time-major flatten + pallas_call.
# --------------------------------------------------------------------------
@jax.jit
def gru_forward_pallas(x_bld, packed):
    L, Bv = SEQ_LEN, B
    # (B, L, D) -> time-major (L*B, D): row t*B + b.
    x_tm = jnp.transpose(x_bld, (1, 0, 2)).reshape(L * Bv, INPUT_DIM)
    x_tm = x_tm.astype(jnp.float32)

    out = pl.pallas_call(
        functools.partial(gru_kernel, batch=Bv, seq_len=L,
                          hidden=CHANNELS, in_dim=INPUT_DIM),
        out_shape=jax.ShapeDtypeStruct((Bv, OUTPUT_DIM), jnp.float32),
        in_specs=[pl.BlockSpec(memory_space=pltpu.MemorySpace.VMEM)] * 4,
        out_specs=pl.BlockSpec(memory_space=pltpu.MemorySpace.VMEM),
        scratch_shapes=[
            pltpu.VMEM((L * Bv, CHANNELS), jnp.float32),      # layer-0 outputs
            pltpu.VMEM((Bv, L * CHANNELS), jnp.float32),      # flattened layer-1 out
        ],
    )(x_tm, packed['gru_w'], packed['w1b1'], packed['w2b2'])
    return jnp.squeeze(out)       # matches x.squeeze()


# --------------------------------------------------------------------------
# Pure-JAX reference (mirrors PyTorch nn.GRU + output_layer, Dropout in eval).
# --------------------------------------------------------------------------
def gru_forward_ref(x_bld, p):
    H = CHANNELS
    layer_in = x_bld.astype(jnp.float32)             # (B, L, in)
    for layer in range(LAYERS):
        wih = p[f'weight_ih_l{layer}']
        whh = p[f'weight_hh_l{layer}']
        bih = p[f'bias_ih_l{layer}']
        bhh = p[f'bias_hh_l{layer}']
        h = jnp.zeros((x_bld.shape[0], H), jnp.float32)
        outs = []
        for t in range(SEQ_LEN):
            gi = layer_in[:, t, :] @ wih.T + bih
            gh = h @ whh.T + bhh
            r = jax.nn.sigmoid(gi[:, :H] + gh[:, :H])
            z = jax.nn.sigmoid(gi[:, H:2 * H] + gh[:, H:2 * H])
            n = jnp.tanh(gi[:, 2 * H:] + r * gh[:, 2 * H:])
            h = (1.0 - z) * n + z * h
            outs.append(h)
        layer_in = jnp.stack(outs, axis=1)           # (B, L, H)
    flat = layer_in.reshape(layer_in.shape[0], -1)   # (B, L*H)
    y1 = flat @ p['ow1'].T + p['ob1']
    y2 = y1 @ p['ow2'].T + p['ob2']                  # Dropout eval = identity
    return jnp.squeeze(y2)


if __name__ == "__main__":
    key = jax.random.PRNGKey(0)
    kx, kp = jax.random.split(key)

    # module input x: (B, seq_len, input_dim), batch_first GRU
    x = jax.random.normal(kx, (B, SEQ_LEN, INPUT_DIM), jnp.float32)
    params = init_params(kp)
    packed = pack_params(params)     # one-time prep, outside the forward call

    got = jax.block_until_ready(gru_forward_pallas(x, packed))
    assert got.shape == (B, OUTPUT_DIM)

    want = jax.block_until_ready(gru_forward_ref(x, params))
    np.testing.assert_allclose(np.asarray(got), np.asarray(want),
                               rtol=1e-3, atol=1e-3)

    print("KERNEL_OK")
</pallas_src>

<mosaic_0001>
module attributes {stable_mosaic.version = 11 : i64} {
  func.func @gru_kernel(%arg0: memref<22x2xf32, #tpu.memory_space<vmem>>, %arg1: memref<102x96xf32, #tpu.memory_space<vmem>>, %arg2: memref<353x352xf32, #tpu.memory_space<vmem>>, %arg3: memref<353x2xf32, #tpu.memory_space<vmem>>, %arg4: memref<2x2xf32, #tpu.memory_space<vmem>>, %arg5: memref<22x32xf32, #tpu.memory_space<vmem>>, %arg6: memref<2x352xf32, #tpu.memory_space<vmem>>) attributes {dimension_semantics = [], scalar_prefetch = 0 : i64, scratch_operands = 2 : i64, tpu.core_type = #tpu.core_type<tc>} {
    %c0 = arith.constant 0 : index
    %c0_0 = arith.constant 0 : index
    %0 = vector.load %arg1[%c0, %c0_0] : memref<102x96xf32, #tpu.memory_space<vmem>>, vector<32x96xf32>
    %c32 = arith.constant 32 : index
    %c0_1 = arith.constant 0 : index
    %1 = vector.load %arg1[%c32, %c0_1] : memref<102x96xf32, #tpu.memory_space<vmem>>, vector<32x96xf32>
    %c64 = arith.constant 64 : index
    %c0_2 = arith.constant 0 : index
    %2 = vector.load %arg1[%c64, %c0_2] : memref<102x96xf32, #tpu.memory_space<vmem>>, vector<32x96xf32>
    %c96 = arith.constant 96 : index
    %c0_3 = arith.constant 0 : index
    %3 = vector.load %arg1[%c96, %c0_3] : memref<102x96xf32, #tpu.memory_space<vmem>>, vector<2x96xf32>
    %c98 = arith.constant 98 : index
    %c0_4 = arith.constant 0 : index
    %4 = vector.load %arg1[%c98, %c0_4] : memref<102x96xf32, #tpu.memory_space<vmem>>, vector<1x96xf32>
    %c99 = arith.constant 99 : index
    %c0_5 = arith.constant 0 : index
    %5 = vector.load %arg1[%c99, %c0_5] : memref<102x96xf32, #tpu.memory_space<vmem>>, vector<1x96xf32>
    %c100 = arith.constant 100 : index
    %c0_6 = arith.constant 0 : index
    %6 = vector.load %arg1[%c100, %c0_6] : memref<102x96xf32, #tpu.memory_space<vmem>>, vector<1x96xf32>
    %c101 = arith.constant 101 : index
    %c0_7 = arith.constant 0 : index
    %7 = vector.load %arg1[%c101, %c0_7] : memref<102x96xf32, #tpu.memory_space<vmem>>, vector<1x96xf32>
    %c0_8 = arith.constant 0 : index
    %c0_9 = arith.constant 0 : index
    %8 = vector.load %arg0[%c0_8, %c0_9] : memref<22x2xf32, #tpu.memory_space<vmem>>, vector<22x2xf32>
    %cst = arith.constant dense<0.000000e+00> : vector<22x96xf32>
    %9 = tpu.matmul %8, %3, %cst {dimension_numbers = #tpu.dot_dimension_numbers<[1], [0], [0], [1], [0, 0, 1, 1], [], []>} : vector<22x2xf32>, vector<2x96xf32>, vector<22x96xf32> -> vector<22x96xf32>
    %10 = vector.broadcast %4 : vector<1x96xf32> to vector<22x96xf32>
    %11 = arith.addf %9, %10 : vector<22x96xf32>
    %cst_10 = arith.constant 0.000000e+00 : f32
    %12 = vector.broadcast %cst_10 : f32 to vector<2x32xf32>
    %13 = vector.extract_strided_slice %11 {offsets = [0, 0], sizes = [2, 96], strides = [1, 1]} : vector<22x96xf32> to vector<2x96xf32>
    %cst_11 = arith.constant dense<0.000000e+00> : vector<2x96xf32>
    %14 = tpu.matmul %12, %1, %cst_11 {dimension_numbers = #tpu.dot_dimension_numbers<[1], [0], [0], [1], [0, 0, 1, 1], [], []>} : vector<2x32xf32>, vector<32x96xf32>, vector<2x96xf32> -> vector<2x96xf32>
    %15 = vector.broadcast %5 : vector<1x96xf32> to vector<2x96xf32>
    %16 = arith.addf %14, %15 : vector<2x96xf32>
    %17 = vector.extract_strided_slice %13 {offsets = [0, 0], sizes = [2, 32], strides = [1, 1]} : vector<2x96xf32> to vector<2x32xf32>
    %18 = vector.extract_strided_slice %16 {offsets = [0, 0], sizes = [2, 32], strides = [1, 1]} : vector<2x96xf32> to vector<2x32xf32>
    %19 = arith.addf %17, %18 : vector<2x32xf32>
    %20 = arith.negf %19 : vector<2x32xf32>
    %21 = math.exp %20 : vector<2x32xf32>
    %cst_12 = arith.constant 1.000000e+00 : f32
    %22 = vector.broadcast %cst_12 : f32 to vector<2x32xf32>
    %23 = arith.addf %22, %21 : vector<2x32xf32>
    %24 = arith.divf %22, %23 : vector<2x32xf32>
    %25 = vector.extract_strided_slice %13 {offsets = [0, 32], sizes = [2, 32], strides = [1, 1]} : vector<2x96xf32> to vector<2x32xf32>
    %26 = vector.extract_strided_slice %16 {offsets = [0, 32], sizes = [2, 32], strides = [1, 1]} : vector<2x96xf32> to vector<2x32xf32>
    %27 = arith.addf %25, %26 : vector<2x32xf32>
    %28 = arith.negf %27 : vector<2x32xf32>
    %29 = math.exp %28 : vector<2x32xf32>
    %cst_13 = arith.constant 1.000000e+00 : f32
    %30 = vector.broadcast %cst_13 : f32 to vector<2x32xf32>
    %31 = arith.addf %30, %29 : vector<2x32xf32>
    %32 = arith.divf %30, %31 : vector<2x32xf32>
    %33 = vector.extract_strided_slice %13 {offsets = [0, 64], sizes = [2, 32], strides = [1, 1]} : vector<2x96xf32> to vector<2x32xf32>
    %34 = vector.extract_strided_slice %16 {offsets = [0, 64], sizes = [2, 32], strides = [1, 1]} : vector<2x96xf32> to vector<2x32xf32>
    %35 = arith.mulf %24, %34 : vector<2x32xf32>
    %36 = arith.addf %33, %35 : vector<2x32xf32>
    %37 = math.tanh %36 : vector<2x32xf32>
    %cst_14 = arith.constant 1.000000e+00 : f32
    %38 = vector.broadcast %cst_14 : f32 to vector<2x32xf32>
    %39 = arith.subf %38, %32 : vector<2x32xf32>
    %40 = arith.mulf %39, %37 : vector<2x32xf32>
    %41 = arith.mulf %32, %12 : vector<2x32xf32>
    %42 = arith.addf %40, %41 : vector<2x32xf32>
    %43 = vector.extract_strided_slice %11 {offsets = [2, 0], sizes = [2, 96], strides = [1, 1]} : vector<22x96xf32> to vector<2x96xf32>
    %cst_15 = arith.constant dense<0.000000e+00> : vector<2x96xf32>
    %44 = tpu.matmul %42, %1, %cst_15 {dimension_numbers = #tpu.dot_dimension_numbers<[1], [0], [0], [1], [0, 0, 1, 1], [], []>} : vector<2x32xf32>, vector<32x96xf32>, vector<2x96xf32> -> vector<2x96xf32>
    %45 = vector.broadcast %5 : vector<1x96xf32> to vector<2x96xf32>
    %46 = arith.addf %44, %45 : vector<2x96xf32>
    %47 = vector.extract_strided_slice %43 {offsets = [0, 0], sizes = [2, 32], strides = [1, 1]} : vector<2x96xf32> to vector<2x32xf32>
    %48 = vector.extract_strided_slice %46 {offsets = [0, 0], sizes = [2, 32], strides = [1, 1]} : vector<2x96xf32> to vector<2x32xf32>
    %49 = arith.addf %47, %48 : vector<2x32xf32>
    %50 = arith.negf %49 : vector<2x32xf32>
    %51 = math.exp %50 : vector<2x32xf32>
    %cst_16 = arith.constant 1.000000e+00 : f32
    %52 = vector.broadcast %cst_16 : f32 to vector<2x32xf32>
    %53 = arith.addf %52, %51 : vector<2x32xf32>
    %54 = arith.divf %52, %53 : vector<2x32xf32>
    %55 = vector.extract_strided_slice %43 {offsets = [0, 32], sizes = [2, 32], strides = [1, 1]} : vector<2x96xf32> to vector<2x32xf32>
    %56 = vector.extract_strided_slice %46 {offsets = [0, 32], sizes = [2, 32], strides = [1, 1]} : vector<2x96xf32> to vector<2x32xf32>
    %57 = arith.addf %55, %56 : vector<2x32xf32>
    %58 = arith.negf %57 : vector<2x32xf32>
    %59 = math.exp %58 : vector<2x32xf32>
    %cst_17 = arith.constant 1.000000e+00 : f32
    %60 = vector.broadcast %cst_17 : f32 to vector<2x32xf32>
    %61 = arith.addf %60, %59 : vector<2x32xf32>
    %62 = arith.divf %60, %61 : vector<2x32xf32>
    %63 = vector.extract_strided_slice %43 {offsets = [0, 64], sizes = [2, 32], strides = [1, 1]} : vector<2x96xf32> to vector<2x32xf32>
    %64 = vector.extract_strided_slice %46 {offsets = [0, 64], sizes = [2, 32], strides = [1, 1]} : vector<2x96xf32> to vector<2x32xf32>
    %65 = arith.mulf %54, %64 : vector<2x32xf32>
    %66 = arith.addf %63, %65 : vector<2x32xf32>
    %67 = math.tanh %66 : vector<2x32xf32>
    %cst_18 = arith.constant 1.000000e+00 : f32
    %68 = vector.broadcast %cst_18 : f32 to vector<2x32xf32>
    %69 = arith.subf %68, %62 : vector<2x32xf32>
    %70 = arith.mulf %69, %67 : vector<2x32xf32>
    %71 = arith.mulf %62, %42 : vector<2x32xf32>
    %72 = arith.addf %70, %71 : vector<2x32xf32>
    %73 = vector.extract_strided_slice %11 {offsets = [4, 0], sizes = [2, 96], strides = [1, 1]} : vector<22x96xf32> to vector<2x96xf32>
    %cst_19 = arith.constant dense<0.000000e+00> : vector<2x96xf32>
    %74 = tpu.matmul %72, %1, %cst_19 {dimension_numbers = #tpu.dot_dimension_numbers<[1], [0], [0], [1], [0, 0, 1, 1], [], []>} : vector<2x32xf32>, vector<32x96xf32>, vector<2x96xf32> -> vector<2x96xf32>
    %75 = vector.broadcast %5 : vector<1x96xf32> to vector<2x96xf32>
    %76 = arith.addf %74, %75 : vector<2x96xf32>
    %77 = vector.extract_strided_slice %73 {offsets = [0, 0], sizes = [2, 32], strides = [1, 1]} : vector<2x96xf32> to vector<2x32xf32>
    %78 = vector.extract_strided_slice %76 {offsets = [0, 0], sizes = [2, 32], strides = [1, 1]} : vector<2x96xf32> to vector<2x32xf32>
    %79 = arith.addf %77, %78 : vector<2x32xf32>
    %80 = arith.negf %79 : vector<2x32xf32>
    %81 = math.exp %80 : vector<2x32xf32>
    %cst_20 = arith.constant 1.000000e+00 : f32
    %82 = vector.broadcast %cst_20 : f32 to vector<2x32xf32>
    %83 = arith.addf %82, %81 : vector<2x32xf32>
    %84 = arith.divf %82, %83 : vector<2x32xf32>
    %85 = vector.extract_strided_slice %73 {offsets = [0, 32], sizes = [2, 32], strides = [1, 1]} : vector<2x96xf32> to vector<2x32xf32>
    %86 = vector.extract_strided_slice %76 {offsets = [0, 32], sizes = [2, 32], strides = [1, 1]} : vector<2x96xf32> to vector<2x32xf32>
    %87 = arith.addf %85, %86 : vector<2x32xf32>
    %88 = arith.negf %87 : vector<2x32xf32>
    %89 = math.exp %88 : vector<2x32xf32>
    %cst_21 = arith.constant 1.000000e+00 : f32
    %90 = vector.broadcast %cst_21 : f32 to vector<2x32xf32>
    %91 = arith.addf %90, %89 : vector<2x32xf32>
    %92 = arith.divf %90, %91 : vector<2x32xf32>
    %93 = vector.extract_strided_slice %73 {offsets = [0, 64], sizes = [2, 32], strides = [1, 1]} : vector<2x96xf32> to vector<2x32xf32>
    %94 = vector.extract_strided_slice %76 {offsets = [0, 64], sizes = [2, 32], strides = [1, 1]} : vector<2x96xf32> to vector<2x32xf32>
    %95 = arith.mulf %84, %94 : vector<2x32xf32>
    %96 = arith.addf %93, %95 : vector<2x32xf32>
    %97 = math.tanh %96 : vector<2x32xf32>
    %cst_22 = arith.constant 1.000000e+00 : f32
    %98 = vector.broadcast %cst_22 : f32 to vector<2x32xf32>
    %99 = arith.subf %98, %92 : vector<2x32xf32>
    %100 = arith.mulf %99, %97 : vector<2x32xf32>
    %101 = arith.mulf %92, %72 : vector<2x32xf32>
    %102 = arith.addf %100, %101 : vector<2x32xf32>
    %103 = vector.extract_strided_slice %11 {offsets = [6, 0], sizes = [2, 96], strides = [1, 1]} : vector<22x96xf32> to vector<2x96xf32>
    %cst_23 = arith.constant dense<0.000000e+00> : vector<2x96xf32>
    %104 = tpu.matmul %102, %1, %cst_23 {dimension_numbers = #tpu.dot_dimension_numbers<[1], [0], [0], [1], [0, 0, 1, 1], [], []>} : vector<2x32xf32>, vector<32x96xf32>, vector<2x96xf32> -> vector<2x96xf32>
    %105 = vector.broadcast %5 : vector<1x96xf32> to vector<2x96xf32>
    %106 = arith.addf %104, %105 : vector<2x96xf32>
    %107 = vector.extract_strided_slice %103 {offsets = [0, 0], sizes = [2, 32], strides = [1, 1]} : vector<2x96xf32> to vector<2x32xf32>
    %108 = vector.extract_strided_slice %106 {offsets = [0, 0], sizes = [2, 32], strides = [1, 1]} : vector<2x96xf32> to vector<2x32xf32>
    %109 = arith.addf %107, %108 : vector<2x32xf32>
    %110 = arith.negf %109 : vector<2x32xf32>
    %111 = math.exp %110 : vector<2x32xf32>
    %cst_24 = arith.constant 1.000000e+00 : f32
    %112 = vector.broadcast %cst_24 : f32 to vector<2x32xf32>
    %113 = arith.addf %112, %111 : vector<2x32xf32>
    %114 = arith.divf %112, %113 : vector<2x32xf32>
    %115 = vector.extract_strided_slice %103 {offsets = [0, 32], sizes = [2, 32], strides = [1, 1]} : vector<2x96xf32> to vector<2x32xf32>
    %116 = vector.extract_strided_slice %106 {offsets = [0, 32], sizes = [2, 32], strides = [1, 1]} : vector<2x96xf32> to vector<2x32xf32>
    %117 = arith.addf %115, %116 : vector<2x32xf32>
    %118 = arith.negf %117 : vector<2x32xf32>
    %119 = math.exp %118 : vector<2x32xf32>
    %cst_25 = arith.constant 1.000000e+00 : f32
    %120 = vector.broadcast %cst_25 : f32 to vector<2x32xf32>
    %121 = arith.addf %120, %119 : vector<2x32xf32>
    %122 = arith.divf %120, %121 : vector<2x32xf32>
    %123 = vector.extract_strided_slice %103 {offsets = [0, 64], sizes = [2, 32], strides = [1, 1]} : vector<2x96xf32> to vector<2x32xf32>
    %124 = vector.extract_strided_slice %106 {offsets = [0, 64], sizes = [2, 32], strides = [1, 1]} : vector<2x96xf32> to vector<2x32xf32>
    %125 = arith.mulf %114, %124 : vector<2x32xf32>
    %126 = arith.addf %123, %125 : vector<2x32xf32>
    %127 = math.tanh %126 : vector<2x32xf32>
    %cst_26 = arith.constant 1.000000e+00 : f32
    %128 = vector.broadcast %cst_26 : f32 to vector<2x32xf32>
    %129 = arith.subf %128, %122 : vector<2x32xf32>
    %130 = arith.mulf %129, %127 : vector<2x32xf32>
    %131 = arith.mulf %122, %102 : vector<2x32xf32>
    %132 = arith.addf %130, %131 : vector<2x32xf32>
    %133 = vector.extract_strided_slice %11 {offsets = [8, 0], sizes = [2, 96], strides = [1, 1]} : vector<22x96xf32> to vector<2x96xf32>
    %cst_27 = arith.constant dense<0.000000e+00> : vector<2x96xf32>
    %134 = tpu.matmul %132, %1, %cst_27 {dimension_numbers = #tpu.dot_dimension_numbers<[1], [0], [0], [1], [0, 0, 1, 1], [], []>} : vector<2x32xf32>, vector<32x96xf32>, vector<2x96xf32> -> vector<2x96xf32>
    %135 = vector.broadcast %5 : vector<1x96xf32> to vector<2x96xf32>
    %136 = arith.addf %134, %135 : vector<2x96xf32>
    %137 = vector.extract_strided_slice %133 {offsets = [0, 0], sizes = [2, 32], strides = [1, 1]} : vector<2x96xf32> to vector<2x32xf32>
    %138 = vector.extract_strided_slice %136 {offsets = [0, 0], sizes = [2, 32], strides = [1, 1]} : vector<2x96xf32> to vector<2x32xf32>
    %139 = arith.addf %137, %138 : vector<2x32xf32>
    %140 = arith.negf %139 : vector<2x32xf32>
    %141 = math.exp %140 : vector<2x32xf32>
    %cst_28 = arith.constant 1.000000e+00 : f32
    %142 = vector.broadcast %cst_28 : f32 to vector<2x32xf32>
    %143 = arith.addf %142, %141 : vector<2x32xf32>
    %144 = arith.divf %142, %143 : vector<2x32xf32>
    %145 = vector.extract_strided_slice %133 {offsets = [0, 32], sizes = [2, 32], strides = [1, 1]} : vector<2x96xf32> to vector<2x32xf32>
    %146 = vector.extract_strided_slice %136 {offsets = [0, 32], sizes = [2, 32], strides = [1, 1]} : vector<2x96xf32> to vector<2x32xf32>
    %147 = arith.addf %145, %146 : vector<2x32xf32>
    %148 = arith.negf %147 : vector<2x32xf32>
    %149 = math.exp %148 : vector<2x32xf32>
    %cst_29 = arith.constant 1.000000e+00 : f32
    %150 = vector.broadcast %cst_29 : f32 to vector<2x32xf32>
    %151 = arith.addf %150, %149 : vector<2x32xf32>
    %152 = arith.divf %150, %151 : vector<2x32xf32>
    %153 = vector.extract_strided_slice %133 {offsets = [0, 64], sizes = [2, 32], strides = [1, 1]} : vector<2x96xf32> to vector<2x32xf32>
    %154 = vector.extract_strided_slice %136 {offsets = [0, 64], sizes = [2, 32], strides = [1, 1]} : vector<2x96xf32> to vector<2x32xf32>
    %155 = arith.mulf %144, %154 : vector<2x32xf32>
    %156 = arith.addf %153, %155 : vector<2x32xf32>
    %157 = math.tanh %156 : vector<2x32xf32>
    %cst_30 = arith.constant 1.000000e+00 : f32
    %158 = vector.broadcast %cst_30 : f32 to vector<2x32xf32>
    %159 = arith.subf %158, %152 : vector<2x32xf32>
    %160 = arith.mulf %159, %157 : vector<2x32xf32>
    %161 = arith.mulf %152, %132 : vector<2x32xf32>
    %162 = arith.addf %160, %161 : vector<2x32xf32>
    %163 = vector.extract_strided_slice %11 {offsets = [10, 0], sizes = [2, 96], strides = [1, 1]} : vector<22x96xf32> to vector<2x96xf32>
    %cst_31 = arith.constant dense<0.000000e+00> : vector<2x96xf32>
    %164 = tpu.matmul %162, %1, %cst_31 {dimension_numbers = #tpu.dot_dimension_numbers<[1], [0], [0], [1], [0, 0, 1, 1], [], []>} : vector<2x32xf32>, vector<32x96xf32>, vector<2x96xf32> -> vector<2x96xf32>
    %165 = vector.broadcast %5 : vector<1x96xf32> to vector<2x96xf32>
    %166 = arith.addf %164, %165 : vector<2x96xf32>
    %167 = vector.extract_strided_slice %163 {offsets = [0, 0], sizes = [2, 32], strides = [1, 1]} : vector<2x96xf32> to vector<2x32xf32>
    %168 = vector.extract_strided_slice %166 {offsets = [0, 0], sizes = [2, 32], strides = [1, 1]} : vector<2x96xf32> to vector<2x32xf32>
    %169 = arith.addf %167, %168 : vector<2x32xf32>
    %170 = arith.negf %169 : vector<2x32xf32>
    %171 = math.exp %170 : vector<2x32xf32>
    %cst_32 = arith.constant 1.000000e+00 : f32
    %172 = vector.broadcast %cst_32 : f32 to vector<2x32xf32>
    %173 = arith.addf %172, %171 : vector<2x32xf32>
    %174 = arith.divf %172, %173 : vector<2x32xf32>
    %175 = vector.extract_strided_slice %163 {offsets = [0, 32], sizes = [2, 32], strides = [1, 1]} : vector<2x96xf32> to vector<2x32xf32>
    %176 = vector.extract_strided_slice %166 {offsets = [0, 32], sizes = [2, 32], strides = [1, 1]} : vector<2x96xf32> to vector<2x32xf32>
    %177 = arith.addf %175, %176 : vector<2x32xf32>
    %178 = arith.negf %177 : vector<2x32xf32>
    %179 = math.exp %178 : vector<2x32xf32>
    %cst_33 = arith.constant 1.000000e+00 : f32
    %180 = vector.broadcast %cst_33 : f32 to vector<2x32xf32>
    %181 = arith.addf %180, %179 : vector<2x32xf32>
    %182 = arith.divf %180, %181 : vector<2x32xf32>
    %183 = vector.extract_strided_slice %163 {offsets = [0, 64], sizes = [2, 32], strides = [1, 1]} : vector<2x96xf32> to vector<2x32xf32>
    %184 = vector.extract_strided_slice %166 {offsets = [0, 64], sizes = [2, 32], strides = [1, 1]} : vector<2x96xf32> to vector<2x32xf32>
    %185 = arith.mulf %174, %184 : vector<2x32xf32>
    %186 = arith.addf %183, %185 : vector<2x32xf32>
    %187 = math.tanh %186 : vector<2x32xf32>
    %cst_34 = arith.constant 1.000000e+00 : f32
    %188 = vector.broadcast %cst_34 : f32 to vector<2x32xf32>
    %189 = arith.subf %188, %182 : vector<2x32xf32>
    %190 = arith.mulf %189, %187 : vector<2x32xf32>
    %191 = arith.mulf %182, %162 : vector<2x32xf32>
    %192 = arith.addf %190, %191 : vector<2x32xf32>
    %193 = vector.extract_strided_slice %11 {offsets = [12, 0], sizes = [2, 96], strides = [1, 1]} : vector<22x96xf32> to vector<2x96xf32>
    %cst_35 = arith.constant dense<0.000000e+00> : vector<2x96xf32>
    %194 = tpu.matmul %192, %1, %cst_35 {dimension_numbers = #tpu.dot_dimension_numbers<[1], [0], [0], [1], [0, 0, 1, 1], [], []>} : vector<2x32xf32>, vector<32x96xf32>, vector<2x96xf32> -> vector<2x96xf32>
    %195 = vector.broadcast %5 : vector<1x96xf32> to vector<2x96xf32>
    %196 = arith.addf %194, %195 : vector<2x96xf32>
    %197 = vector.extract_strided_slice %193 {offsets = [0, 0], sizes = [2, 32], strides = [1, 1]} : vector<2x96xf32> to vector<2x32xf32>
    %198 = vector.extract_strided_slice %196 {offsets = [0, 0], sizes = [2, 32], strides = [1, 1]} : vector<2x96xf32> to vector<2x32xf32>
    %199 = arith.addf %197, %198 : vector<2x32xf32>
    %200 = arith.negf %199 : vector<2x32xf32>
    %201 = math.exp %200 : vector<2x32xf32>
    %cst_36 = arith.constant 1.000000e+00 : f32
    %202 = vector.broadcast %cst_36 : f32 to vector<2x32xf32>
    %203 = arith.addf %202, %201 : vector<2x32xf32>
    %204 = arith.divf %202, %203 : vector<2x32xf32>
    %205 = vector.extract_strided_slice %193 {offsets = [0, 32], sizes = [2, 32], strides = [1, 1]} : vector<2x96xf32> to vector<2x32xf32>
    %206 = vector.extract_strided_slice %196 {offsets = [0, 32], sizes = [2, 32], strides = [1, 1]} : vector<2x96xf32> to vector<2x32xf32>
    %207 = arith.addf %205, %206 : vector<2x32xf32>
    %208 = arith.negf %207 : vector<2x32xf32>
    %209 = math.exp %208 : vector<2x32xf32>
    %cst_37 = arith.constant 1.000000e+00 : f32
    %210 = vector.broadcast %cst_37 : f32 to vector<2x32xf32>
    %211 = arith.addf %210, %209 : vector<2x32xf32>
    %212 = arith.divf %210, %211 : vector<2x32xf32>
    %213 = vector.extract_strided_slice %193 {offsets = [0, 64], sizes = [2, 32], strides = [1, 1]} : vector<2x96xf32> to vector<2x32xf32>
    %214 = vector.extract_strided_slice %196 {offsets = [0, 64], sizes = [2, 32], strides = [1, 1]} : vector<2x96xf32> to vector<2x32xf32>
    %215 = arith.mulf %204, %214 : vector<2x32xf32>
    %216 = arith.addf %213, %215 : vector<2x32xf32>
    %217 = math.tanh %216 : vector<2x32xf32>
    %cst_38 = arith.constant 1.000000e+00 : f32
    %218 = vector.broadcast %cst_38 : f32 to vector<2x32xf32>
    %219 = arith.subf %218, %212 : vector<2x32xf32>
    %220 = arith.mulf %219, %217 : vector<2x32xf32>
    %221 = arith.mulf %212, %192 : vector<2x32xf32>
    %222 = arith.addf %220, %221 : vector<2x32xf32>
    %223 = vector.extract_strided_slice %11 {offsets = [14, 0], sizes = [2, 96], strides = [1, 1]} : vector<22x96xf32> to vector<2x96xf32>
    %cst_39 = arith.constant dense<0.000000e+00> : vector<2x96xf32>
    %224 = tpu.matmul %222, %1, %cst_39 {dimension_numbers = #tpu.dot_dimension_numbers<[1], [0], [0], [1], [0, 0, 1, 1], [], []>} : vector<2x32xf32>, vector<32x96xf32>, vector<2x96xf32> -> vector<2x96xf32>
    %225 = vector.broadcast %5 : vector<1x96xf32> to vector<2x96xf32>
    %226 = arith.addf %224, %225 : vector<2x96xf32>
    %227 = vector.extract_strided_slice %223 {offsets = [0, 0], sizes = [2, 32], strides = [1, 1]} : vector<2x96xf32> to vector<2x32xf32>
    %228 = vector.extract_strided_slice %226 {offsets = [0, 0], sizes = [2, 32], strides = [1, 1]} : vector<2x96xf32> to vector<2x32xf32>
    %229 = arith.addf %227, %228 : vector<2x32xf32>
    %230 = arith.negf %229 : vector<2x32xf32>
    %231 = math.exp %230 : vector<2x32xf32>
    %cst_40 = arith.constant 1.000000e+00 : f32
    %232 = vector.broadcast %cst_40 : f32 to vector<2x32xf32>
    %233 = arith.addf %232, %231 : vector<2x32xf32>
    %234 = arith.divf %232, %233 : vector<2x32xf32>
    %235 = vector.extract_strided_slice %223 {offsets = [0, 32], sizes = [2, 32], strides = [1, 1]} : vector<2x96xf32> to vector<2x32xf32>
    %236 = vector.extract_strided_slice %226 {offsets = [0, 32], sizes = [2, 32], strides = [1, 1]} : vector<2x96xf32> to vector<2x32xf32>
    %237 = arith.addf %235, %236 : vector<2x32xf32>
    %238 = arith.negf %237 : vector<2x32xf32>
    %239 = math.exp %238 : vector<2x32xf32>
    %cst_41 = arith.constant 1.000000e+00 : f32
    %240 = vector.broadcast %cst_41 : f32 to vector<2x32xf32>
    %241 = arith.addf %240, %239 : vector<2x32xf32>
    %242 = arith.divf %240, %241 : vector<2x32xf32>
    %243 = vector.extract_strided_slice %223 {offsets = [0, 64], sizes = [2, 32], strides = [1, 1]} : vector<2x96xf32> to vector<2x32xf32>
    %244 = vector.extract_strided_slice %226 {offsets = [0, 64], sizes = [2, 32], strides = [1, 1]} : vector<2x96xf32> to vector<2x32xf32>
    %245 = arith.mulf %234, %244 : vector<2x32xf32>
    %246 = arith.addf %243, %245 : vector<2x32xf32>
    %247 = math.tanh %246 : vector<2x32xf32>
    %cst_42 = arith.constant 1.000000e+00 : f32
    %248 = vector.broadcast %cst_42 : f32 to vector<2x32xf32>
    %249 = arith.subf %248, %242 : vector<2x32xf32>
    %250 = arith.mulf %249, %247 : vector<2x32xf32>
    %251 = arith.mulf %242, %222 : vector<2x32xf32>
    %252 = arith.addf %250, %251 : vector<2x32xf32>
    %253 = vector.extract_strided_slice %11 {offsets = [16, 0], sizes = [2, 96], strides = [1, 1]} : vector<22x96xf32> to vector<2x96xf32>
    %cst_43 = arith.constant dense<0.000000e+00> : vector<2x96xf32>
    %254 = tpu.matmul %252, %1, %cst_43 {dimension_numbers = #tpu.dot_dimension_numbers<[1], [0], [0], [1], [0, 0, 1, 1], [], []>} : vector<2x32xf32>, vector<32x96xf32>, vector<2x96xf32> -> vector<2x96xf32>
    %255 = vector.broadcast %5 : vector<1x96xf32> to vector<2x96xf32>
    %256 = arith.addf %254, %255 : vector<2x96xf32>
    %257 = vector.extract_strided_slice %253 {offsets = [0, 0], sizes = [2, 32], strides = [1, 1]} : vector<2x96xf32> to vector<2x32xf32>
    %258 = vector.extract_strided_slice %256 {offsets = [0, 0], sizes = [2, 32], strides = [1, 1]} : vector<2x96xf32> to vector<2x32xf32>
    %259 = arith.addf %257, %258 : vector<2x32xf32>
    %260 = arith.negf %259 : vector<2x32xf32>
    %261 = math.exp %260 : vector<2x32xf32>
    %cst_44 = arith.constant 1.000000e+00 : f32
    %262 = vector.broadcast %cst_44 : f32 to vector<2x32xf32>
    %263 = arith.addf %262, %261 : vector<2x32xf32>
    %264 = arith.divf %262, %263 : vector<2x32xf32>
    %265 = vector.extract_strided_slice %253 {offsets = [0, 32], sizes = [2, 32], strides = [1, 1]} : vector<2x96xf32> to vector<2x32xf32>
    %266 = vector.extract_strided_slice %256 {offsets = [0, 32], sizes = [2, 32], strides = [1, 1]} : vector<2x96xf32> to vector<2x32xf32>
    %267 = arith.addf %265, %266 : vector<2x32xf32>
    %268 = arith.negf %267 : vector<2x32xf32>
    %269 = math.exp %268 : vector<2x32xf32>
    %cst_45 = arith.constant 1.000000e+00 : f32
    %270 = vector.broadcast %cst_45 : f32 to vector<2x32xf32>
    %271 = arith.addf %270, %269 : vector<2x32xf32>
    %272 = arith.divf %270, %271 : vector<2x32xf32>
    %273 = vector.extract_strided_slice %253 {offsets = [0, 64], sizes = [2, 32], strides = [1, 1]} : vector<2x96xf32> to vector<2x32xf32>
    %274 = vector.extract_strided_slice %256 {offsets = [0, 64], sizes = [2, 32], strides = [1, 1]} : vector<2x96xf32> to vector<2x32xf32>
    %275 = arith.mulf %264, %274 : vector<2x32xf32>
    %276 = arith.addf %273, %275 : vector<2x32xf32>
    %277 = math.tanh %276 : vector<2x32xf32>
    %cst_46 = arith.constant 1.000000e+00 : f32
    %278 = vector.broadcast %cst_46 : f32 to vector<2x32xf32>
    %279 = arith.subf %278, %272 : vector<2x32xf32>
    %280 = arith.mulf %279, %277 : vector<2x32xf32>
    %281 = arith.mulf %272, %252 : vector<2x32xf32>
    %282 = arith.addf %280, %281 : vector<2x32xf32>
    %283 = vector.extract_strided_slice %11 {offsets = [18, 0], sizes = [2, 96], strides = [1, 1]} : vector<22x96xf32> to vector<2x96xf32>
    %cst_47 = arith.constant dense<0.000000e+00> : vector<2x96xf32>
    %284 = tpu.matmul %282, %1, %cst_47 {dimension_numbers = #tpu.dot_dimension_numbers<[1], [0], [0], [1], [0, 0, 1, 1], [], []>} : vector<2x32xf32>, vector<32x96xf32>, vector<2x96xf32> -> vector<2x96xf32>
    %285 = vector.broadcast %5 : vector<1x96xf32> to vector<2x96xf32>
    %286 = arith.addf %284, %285 : vector<2x96xf32>
    %287 = vector.extract_strided_slice %283 {offsets = [0, 0], sizes = [2, 32], strides = [1, 1]} : vector<2x96xf32> to vector<2x32xf32>
    %288 = vector.extract_strided_slice %286 {offsets = [0, 0], sizes = [2, 32], strides = [1, 1]} : vector<2x96xf32> to vector<2x32xf32>
    %289 = arith.addf %287, %288 : vector<2x32xf32>
    %290 = arith.negf %289 : vector<2x32xf32>
    %291 = math.exp %290 : vector<2x32xf32>
    %cst_48 = arith.constant 1.000000e+00 : f32
    %292 = vector.broadcast %cst_48 : f32 to vector<2x32xf32>
    %293 = arith.addf %292, %291 : vector<2x32xf32>
    %294 = arith.divf %292, %293 : vector<2x32xf32>
    %295 = vector.extract_strided_slice %283 {offsets = [0, 32], sizes = [2, 32], strides = [1, 1]} : vector<2x96xf32> to vector<2x32xf32>
    %296 = vector.extract_strided_slice %286 {offsets = [0, 32], sizes = [2, 32], strides = [1, 1]} : vector<2x96xf32> to vector<2x32xf32>
    %297 = arith.addf %295, %296 : vector<2x32xf32>
    %298 = arith.negf %297 : vector<2x32xf32>
    %299 = math.exp %298 : vector<2x32xf32>
    %cst_49 = arith.constant 1.000000e+00 : f32
    %300 = vector.broadcast %cst_49 : f32 to vector<2x32xf32>
    %301 = arith.addf %300, %299 : vector<2x32xf32>
    %302 = arith.divf %300, %301 : vector<2x32xf32>
    %303 = vector.extract_strided_slice %283 {offsets = [0, 64], sizes = [2, 32], strides = [1, 1]} : vector<2x96xf32> to vector<2x32xf32>
    %304 = vector.extract_strided_slice %286 {offsets = [0, 64], sizes = [2, 32], strides = [1, 1]} : vector<2x96xf32> to vector<2x32xf32>
    %305 = arith.mulf %294, %304 : vector<2x32xf32>
    %306 = arith.addf %303, %305 : vector<2x32xf32>
    %307 = math.tanh %306 : vector<2x32xf32>
    %cst_50 = arith.constant 1.000000e+00 : f32
    %308 = vector.broadcast %cst_50 : f32 to vector<2x32xf32>
    %309 = arith.subf %308, %302 : vector<2x32xf32>
    %310 = arith.mulf %309, %307 : vector<2x32xf32>
    %311 = arith.mulf %302, %282 : vector<2x32xf32>
    %312 = arith.addf %310, %311 : vector<2x32xf32>
    %313 = vector.extract_strided_slice %11 {offsets = [20, 0], sizes = [2, 96], strides = [1, 1]} : vector<22x96xf32> to vector<2x96xf32>
    %cst_51 = arith.constant dense<0.000000e+00> : vector<2x96xf32>
    %314 = tpu.matmul %312, %1, %cst_51 {dimension_numbers = #tpu.dot_dimension_numbers<[1], [0], [0], [1], [0, 0, 1, 1], [], []>} : vector<2x32xf32>, vector<32x96xf32>, vector<2x96xf32> -> vector<2x96xf32>
    %315 = vector.broadcast %5 : vector<1x96xf32> to vector<2x96xf32>
    %316 = arith.addf %314, %315 : vector<2x96xf32>
    %317 = vector.extract_strided_slice %313 {offsets = [0, 0], sizes = [2, 32], strides = [1, 1]} : vector<2x96xf32> to vector<2x32xf32>
    %318 = vector.extract_strided_slice %316 {offsets = [0, 0], sizes = [2, 32], strides = [1, 1]} : vector<2x96xf32> to vector<2x32xf32>
    %319 = arith.addf %317, %318 : vector<2x32xf32>
    %320 = arith.negf %319 : vector<2x32xf32>
    %321 = math.exp %320 : vector<2x32xf32>
    %cst_52 = arith.constant 1.000000e+00 : f32
    %322 = vector.broadcast %cst_52 : f32 to vector<2x32xf32>
    %323 = arith.addf %322, %321 : vector<2x32xf32>
    %324 = arith.divf %322, %323 : vector<2x32xf32>
    %325 = vector.extract_strided_slice %313 {offsets = [0, 32], sizes = [2, 32], strides = [1, 1]} : vector<2x96xf32> to vector<2x32xf32>
    %326 = vector.extract_strided_slice %316 {offsets = [0, 32], sizes = [2, 32], strides = [1, 1]} : vector<2x96xf32> to vector<2x32xf32>
    %327 = arith.addf %325, %326 : vector<2x32xf32>
    %328 = arith.negf %327 : vector<2x32xf32>
    %329 = math.exp %328 : vector<2x32xf32>
    %cst_53 = arith.constant 1.000000e+00 : f32
    %330 = vector.broadcast %cst_53 : f32 to vector<2x32xf32>
    %331 = arith.addf %330, %329 : vector<2x32xf32>
    %332 = arith.divf %330, %331 : vector<2x32xf32>
    %333 = vector.extract_strided_slice %313 {offsets = [0, 64], sizes = [2, 32], strides = [1, 1]} : vector<2x96xf32> to vector<2x32xf32>
    %334 = vector.extract_strided_slice %316 {offsets = [0, 64], sizes = [2, 32], strides = [1, 1]} : vector<2x96xf32> to vector<2x32xf32>
    %335 = arith.mulf %324, %334 : vector<2x32xf32>
    %336 = arith.addf %333, %335 : vector<2x32xf32>
    %337 = math.tanh %336 : vector<2x32xf32>
    %cst_54 = arith.constant 1.000000e+00 : f32
    %338 = vector.broadcast %cst_54 : f32 to vector<2x32xf32>
    %339 = arith.subf %338, %332 : vector<2x32xf32>
    %340 = arith.mulf %339, %337 : vector<2x32xf32>
    %341 = arith.mulf %332, %312 : vector<2x32xf32>
    %342 = arith.addf %340, %341 : vector<2x32xf32>
    %c0_55 = arith.constant 0 : index
    %c0_56 = arith.constant 0 : index
    %343 = vector.load %arg5[%c0_55, %c0_56] : memref<22x32xf32, #tpu.memory_space<vmem>>, vector<2x32xf32>
    tpu.vector_store %arg5[%c0_55, %c0_56], %42 {strides = array<i32>} : memref<22x32xf32, #tpu.memory_space<vmem>>, vector<2x32xf32>,
    %c2 = arith.constant 2 : index
    %c0_57 = arith.constant 0 : index
    %344 = vector.load %arg5[%c2, %c0_57] : memref<22x32xf32, #tpu.memory_space<vmem>>, vector<2x32xf32>
    tpu.vector_store %arg5[%c2, %c0_57], %72 {strides = array<i32>} : memref<22x32xf32, #tpu.memory_space<vmem>>, vector<2x32xf32>,
    %c4 = arith.constant 4 : index
    %c0_58 = arith.constant 0 : index
    %345 = vector.load %arg5[%c4, %c0_58] : memref<22x32xf32, #tpu.memory_space<vmem>>, vector<2x32xf32>
    tpu.vector_store %arg5[%c4, %c0_58], %102 {strides = array<i32>} : memref<22x32xf32, #tpu.memory_space<vmem>>, vector<2x32xf32>,
    %c6 = arith.constant 6 : index
    %c0_59 = arith.constant 0 : index
    %346 = vector.load %arg5[%c6, %c0_59] : memref<22x32xf32, #tpu.memory_space<vmem>>, vector<2x32xf32>
    tpu.vector_store %arg5[%c6, %c0_59], %132 {strides = array<i32>} : memref<22x32xf32, #tpu.memory_space<vmem>>, vector<2x32xf32>,
    %c8 = arith.constant 8 : index
    %c0_60 = arith.constant 0 : index
    %347 = vector.load %arg5[%c8, %c0_60] : memref<22x32xf32, #tpu.memory_space<vmem>>, vector<2x32xf32>
    tpu.vector_store %arg5[%c8, %c0_60], %162 {strides = array<i32>} : memref<22x32xf32, #tpu.memory_space<vmem>>, vector<2x32xf32>,
    %c10 = arith.constant 10 : index
    %c0_61 = arith.constant 0 : index
    %348 = vector.load %arg5[%c10, %c0_61] : memref<22x32xf32, #tpu.memory_space<vmem>>, vector<2x32xf32>
    tpu.vector_store %arg5[%c10, %c0_61], %192 {strides = array<i32>} : memref<22x32xf32, #tpu.memory_space<vmem>>, vector<2x32xf32>,
    %c12 = arith.constant 12 : index
    %c0_62 = arith.constant 0 : index
    %349 = vector.load %arg5[%c12, %c0_62] : memref<22x32xf32, #tpu.memory_space<vmem>>, vector<2x32xf32>
    tpu.vector_store %arg5[%c12, %c0_62], %222 {strides = array<i32>} : memref<22x32xf32, #tpu.memory_space<vmem>>, vector<2x32xf32>,
    %c14 = arith.constant 14 : index
    %c0_63 = arith.constant 0 : index
    %350 = vector.load %arg5[%c14, %c0_63] : memref<22x32xf32, #tpu.memory_space<vmem>>, vector<2x32xf32>
    tpu.vector_store %arg5[%c14, %c0_63], %252 {strides = array<i32>} : memref<22x32xf32, #tpu.memory_space<vmem>>, vector<2x32xf32>,
    %c16 = arith.constant 16 : index
    %c0_64 = arith.constant 0 : index
    %351 = vector.load %arg5[%c16, %c0_64] : memref<22x32xf32, #tpu.memory_space<vmem>>, vector<2x32xf32>
    tpu.vector_store %arg5[%c16, %c0_64], %282 {strides = array<i32>} : memref<22x32xf32, #tpu.memory_space<vmem>>, vector<2x32xf32>,
    %c18 = arith.constant 18 : index
    %c0_65 = arith.constant 0 : index
    %352 = vector.load %arg5[%c18, %c0_65] : memref<22x32xf32, #tpu.memory_space<vmem>>, vector<2x32xf32>
    tpu.vector_store %arg5[%c18, %c0_65], %312 {strides = array<i32>} : memref<22x32xf32, #tpu.memory_space<vmem>>, vector<2x32xf32>,
    %c20 = arith.constant 20 : index
    %c0_66 = arith.constant 0 : index
    %353 = vector.load %arg5[%c20, %c0_66] : memref<22x32xf32, #tpu.memory_space<vmem>>, vector<2x32xf32>
    tpu.vector_store %arg5[%c20, %c0_66], %342 {strides = array<i32>} : memref<22x32xf32, #tpu.memory_space<vmem>>, vector<2x32xf32>,
    %c0_67 = arith.constant 0 : index
    %c0_68 = arith.constant 0 : index
    %354 = vector.load %arg5[%c0_67, %c0_68] : memref<22x32xf32, #tpu.memory_space<vmem>>, vector<22x32xf32>
    %cst_69 = arith.constant dense<0.000000e+00> : vector<22x96xf32>
    %355 = tpu.matmul %354, %0, %cst_69 {dimension_numbers = #tpu.dot_dimension_numbers<[1], [0], [0], [1], [0, 0, 1, 1], [], []>} : vector<22x32xf32>, vector<32x96xf32>, vector<22x96xf32> -> vector<22x96xf32>
    %356 = vector.broadcast %6 : vector<1x96xf32> to vector<22x96xf32>
    %357 = arith.addf %355, %356 : vector<22x96xf32>
    %cst_70 = arith.constant 0.000000e+00 : f32
    %358 = vector.broadcast %cst_70 : f32 to vector<2x32xf32>
    %359 = vector.extract_strided_slice %357 {offsets = [0, 0], sizes = [2, 96], strides = [1, 1]} : vector<22x96xf32> to vector<2x96xf32>
    %cst_71 = arith.constant dense<0.000000e+00> : vector<2x96xf32>
    %360 = tpu.matmul %358, %2, %cst_71 {dimension_numbers = #tpu.dot_dimension_numbers<[1], [0], [0], [1], [0, 0, 1, 1], [], []>} : vector<2x32xf32>, vector<32x96xf32>, vector<2x96xf32> -> vector<2x96xf32>
    %361 = vector.broadcast %7 : vector<1x96xf32> to vector<2x96xf32>
    %362 = arith.addf %360, %361 : vector<2x96xf32>
    %363 = vector.extract_strided_slice %359 {offsets = [0, 0], sizes = [2, 32], strides = [1, 1]} : vector<2x96xf32> to vector<2x32xf32>
    %364 = vector.extract_strided_slice %362 {offsets = [0, 0], sizes = [2, 32], strides = [1, 1]} : vector<2x96xf32> to vector<2x32xf32>
    %365 = arith.addf %363, %364 : vector<2x32xf32>
    %366 = arith.negf %365 : vector<2x32xf32>
    %367 = math.exp %366 : vector<2x32xf32>
    %cst_72 = arith.constant 1.000000e+00 : f32
    %368 = vector.broadcast %cst_72 : f32 to vector<2x32xf32>
    %369 = arith.addf %368, %367 : vector<2x32xf32>
    %370 = arith.divf %368, %369 : vector<2x32xf32>
    %371 = vector.extract_strided_slice %359 {offsets = [0, 32], sizes = [2, 32], strides = [1, 1]} : vector<2x96xf32> to vector<2x32xf32>
    %372 = vector.extract_strided_slice %362 {offsets = [0, 32], sizes = [2, 32], strides = [1, 1]} : vector<2x96xf32> to vector<2x32xf32>
    %373 = arith.addf %371, %372 : vector<2x32xf32>
    %374 = arith.negf %373 : vector<2x32xf32>
    %375 = math.exp %374 : vector<2x32xf32>
    %cst_73 = arith.constant 1.000000e+00 : f32
    %376 = vector.broadcast %cst_73 : f32 to vector<2x32xf32>
    %377 = arith.addf %376, %375 : vector<2x32xf32>
    %378 = arith.divf %376, %377 : vector<2x32xf32>
    %379 = vector.extract_strided_slice %359 {offsets = [0, 64], sizes = [2, 32], strides = [1, 1]} : vector<2x96xf32> to vector<2x32xf32>
    %380 = vector.extract_strided_slice %362 {offsets = [0, 64], sizes = [2, 32], strides = [1, 1]} : vector<2x96xf32> to vector<2x32xf32>
    %381 = arith.mulf %370, %380 : vector<2x32xf32>
    %382 = arith.addf %379, %381 : vector<2x32xf32>
    %383 = math.tanh %382 : vector<2x32xf32>
    %cst_74 = arith.constant 1.000000e+00 : f32
    %384 = vector.broadcast %cst_74 : f32 to vector<2x32xf32>
    %385 = arith.subf %384, %378 : vector<2x32xf32>
    %386 = arith.mulf %385, %383 : vector<2x32xf32>
    %387 = arith.mulf %378, %358 : vector<2x32xf32>
    %388 = arith.addf %386, %387 : vector<2x32xf32>
    %389 = vector.extract_strided_slice %357 {offsets = [2, 0], sizes = [2, 96], strides = [1, 1]} : vector<22x96xf32> to vector<2x96xf32>
    %cst_75 = arith.constant dense<0.000000e+00> : vector<2x96xf32>
    %390 = tpu.matmul %388, %2, %cst_75 {dimension_numbers = #tpu.dot_dimension_numbers<[1], [0], [0], [1], [0, 0, 1, 1], [], []>} : vector<2x32xf32>, vector<32x96xf32>, vector<2x96xf32> -> vector<2x96xf32>
    %391 = vector.broadcast %7 : vector<1x96xf32> to vector<2x96xf32>
    %392 = arith.addf %390, %391 : vector<2x96xf32>
    %393 = vector.extract_strided_slice %389 {offsets = [0, 0], sizes = [2, 32], strides = [1, 1]} : vector<2x96xf32> to vector<2x32xf32>
    %394 = vector.extract_strided_slice %392 {offsets = [0, 0], sizes = [2, 32], strides = [1, 1]} : vector<2x96xf32> to vector<2x32xf32>
    %395 = arith.addf %393, %394 : vector<2x32xf32>
    %396 = arith.negf %395 : vector<2x32xf32>
    %397 = math.exp %396 : vector<2x32xf32>
    %cst_76 = arith.constant 1.000000e+00 : f32
    %398 = vector.broadcast %cst_76 : f32 to vector<2x32xf32>
    %399 = arith.addf %398, %397 : vector<2x32xf32>
    %400 = arith.divf %398, %399 : vector<2x32xf32>
    %401 = vector.extract_strided_slice %389 {offsets = [0, 32], sizes = [2, 32], strides = [1, 1]} : vector<2x96xf32> to vector<2x32xf32>
    %402 = vector.extract_strided_slice %392 {offsets = [0, 32], sizes = [2, 32], strides = [1, 1]} : vector<2x96xf32> to vector<2x32xf32>
    %403 = arith.addf %401, %402 : vector<2x32xf32>
    %404 = arith.negf %403 : vector<2x32xf32>
    %405 = math.exp %404 : vector<2x32xf32>
    %cst_77 = arith.constant 1.000000e+00 : f32
    %406 = vector.broadcast %cst_77 : f32 to vector<2x32xf32>
    %407 = arith.addf %406, %405 : vector<2x32xf32>
    %408 = arith.divf %406, %407 : vector<2x32xf32>
    %409 = vector.extract_strided_slice %389 {offsets = [0, 64], sizes = [2, 32], strides = [1, 1]} : vector<2x96xf32> to vector<2x32xf32>
    %410 = vector.extract_strided_slice %392 {offsets = [0, 64], sizes = [2, 32], strides = [1, 1]} : vector<2x96xf32> to vector<2x32xf32>
    %411 = arith.mulf %400, %410 : vector<2x32xf32>
    %412 = arith.addf %409, %411 : vector<2x32xf32>
    %413 = math.tanh %412 : vector<2x32xf32>
    %cst_78 = arith.constant 1.000000e+00 : f32
    %414 = vector.broadcast %cst_78 : f32 to vector<2x32xf32>
    %415 = arith.subf %414, %408 : vector<2x32xf32>
    %416 = arith.mulf %415, %413 : vector<2x32xf32>
    %417 = arith.mulf %408, %388 : vector<2x32xf32>
    %418 = arith.addf %416, %417 : vector<2x32xf32>
    %419 = vector.extract_strided_slice %357 {offsets = [4, 0], sizes = [2, 96], strides = [1, 1]} : vector<22x96xf32> to vector<2x96xf32>
    %cst_79 = arith.constant dense<0.000000e+00> : vector<2x96xf32>
    %420 = tpu.matmul %418, %2, %cst_79 {dimension_numbers = #tpu.dot_dimension_numbers<[1], [0], [0], [1], [0, 0, 1, 1], [], []>} : vector<2x32xf32>, vector<32x96xf32>, vector<2x96xf32> -> vector<2x96xf32>
    %421 = vector.broadcast %7 : vector<1x96xf32> to vector<2x96xf32>
    %422 = arith.addf %420, %421 : vector<2x96xf32>
    %423 = vector.extract_strided_slice %419 {offsets = [0, 0], sizes = [2, 32], strides = [1, 1]} : vector<2x96xf32> to vector<2x32xf32>
    %424 = vector.extract_strided_slice %422 {offsets = [0, 0], sizes = [2, 32], strides = [1, 1]} : vector<2x96xf32> to vector<2x32xf32>
    %425 = arith.addf %423, %424 : vector<2x32xf32>
    %426 = arith.negf %425 : vector<2x32xf32>
    %427 = math.exp %426 : vector<2x32xf32>
    %cst_80 = arith.constant 1.000000e+00 : f32
    %428 = vector.broadcast %cst_80 : f32 to vector<2x32xf32>
    %429 = arith.addf %428, %427 : vector<2x32xf32>
    %430 = arith.divf %428, %429 : vector<2x32xf32>
    %431 = vector.extract_strided_slice %419 {offsets = [0, 32], sizes = [2, 32], strides = [1, 1]} : vector<2x96xf32> to vector<2x32xf32>
    %432 = vector.extract_strided_slice %422 {offsets = [0, 32], sizes = [2, 32], strides = [1, 1]} : vector<2x96xf32> to vector<2x32xf32>
    %433 = arith.addf %431, %432 : vector<2x32xf32>
    %434 = arith.negf %433 : vector<2x32xf32>
    %435 = math.exp %434 : vector<2x32xf32>
    %cst_81 = arith.constant 1.000000e+00 : f32
    %436 = vector.broadcast %cst_81 : f32 to vector<2x32xf32>
    %437 = arith.addf %436, %435 : vector<2x32xf32>
    %438 = arith.divf %436, %437 : vector<2x32xf32>
    %439 = vector.extract_strided_slice %419 {offsets = [0, 64], sizes = [2, 32], strides = [1, 1]} : vector<2x96xf32> to vector<2x32xf32>
    %440 = vector.extract_strided_slice %422 {offsets = [0, 64], sizes = [2, 32], strides = [1, 1]} : vector<2x96xf32> to vector<2x32xf32>
    %441 = arith.mulf %430, %440 : vector<2x32xf32>
    %442 = arith.addf %439, %441 : vector<2x32xf32>
    %443 = math.tanh %442 : vector<2x32xf32>
    %cst_82 = arith.constant 1.000000e+00 : f32
    %444 = vector.broadcast %cst_82 : f32 to vector<2x32xf32>
    %445 = arith.subf %444, %438 : vector<2x32xf32>
    %446 = arith.mulf %445, %443 : vector<2x32xf32>
    %447 = arith.mulf %438, %418 : vector<2x32xf32>
    %448 = arith.addf %446, %447 : vector<2x32xf32>
    %449 = vector.extract_strided_slice %357 {offsets = [6, 0], sizes = [2, 96], strides = [1, 1]} : vector<22x96xf32> to vector<2x96xf32>
    %cst_83 = arith.constant dense<0.000000e+00> : vector<2x96xf32>
    %450 = tpu.matmul %448, %2, %cst_83 {dimension_numbers = #tpu.dot_dimension_numbers<[1], [0], [0], [1], [0, 0, 1, 1], [], []>} : vector<2x32xf32>, vector<32x96xf32>, vector<2x96xf32> -> vector<2x96xf32>
    %451 = vector.broadcast %7 : vector<1x96xf32> to vector<2x96xf32>
    %452 = arith.addf %450, %451 : vector<2x96xf32>
    %453 = vector.extract_strided_slice %449 {offsets = [0, 0], sizes = [2, 32], strides = [1, 1]} : vector<2x96xf32> to vector<2x32xf32>
    %454 = vector.extract_strided_slice %452 {offsets = [0, 0], sizes = [2, 32], strides = [1, 1]} : vector<2x96xf32> to vector<2x32xf32>
    %455 = arith.addf %453, %454 : vector<2x32xf32>
    %456 = arith.negf %455 : vector<2x32xf32>
    %457 = math.exp %456 : vector<2x32xf32>
    %cst_84 = arith.constant 1.000000e+00 : f32
    %458 = vector.broadcast %cst_84 : f32 to vector<2x32xf32>
    %459 = arith.addf %458, %457 : vector<2x32xf32>
    %460 = arith.divf %458, %459 : vector<2x32xf32>
    %461 = vector.extract_strided_slice %449 {offsets = [0, 32], sizes = [2, 32], strides = [1, 1]} : vector<2x96xf32> to vector<2x32xf32>
    %462 = vector.extract_strided_slice %452 {offsets = [0, 32], sizes = [2, 32], strides = [1, 1]} : vector<2x96xf32> to vector<2x32xf32>
    %463 = arith.addf %461, %462 : vector<2x32xf32>
    %464 = arith.negf %463 : vector<2x32xf32>
    %465 = math.exp %464 : vector<2x32xf32>
    %cst_85 = arith.constant 1.000000e+00 : f32
    %466 = vector.broadcast %cst_85 : f32 to vector<2x32xf32>
    %467 = arith.addf %466, %465 : vector<2x32xf32>
    %468 = arith.divf %466, %467 : vector<2x32xf32>
    %469 = vector.extract_strided_slice %449 {offsets = [0, 64], sizes = [2, 32], strides = [1, 1]} : vector<2x96xf32> to vector<2x32xf32>
    %470 = vector.extract_strided_slice %452 {offsets = [0, 64], sizes = [2, 32], strides = [1, 1]} : vector<2x96xf32> to vector<2x32xf32>
    %471 = arith.mulf %460, %470 : vector<2x32xf32>
    %472 = arith.addf %469, %471 : vector<2x32xf32>
    %473 = math.tanh %472 : vector<2x32xf32>
    %cst_86 = arith.constant 1.000000e+00 : f32
    %474 = vector.broadcast %cst_86 : f32 to vector<2x32xf32>
    %475 = arith.subf %474, %468 : vector<2x32xf32>
    %476 = arith.mulf %475, %473 : vector<2x32xf32>
    %477 = arith.mulf %468, %448 : vector<2x32xf32>
    %478 = arith.addf %476, %477 : vector<2x32xf32>
    %479 = vector.extract_strided_slice %357 {offsets = [8, 0], sizes = [2, 96], strides = [1, 1]} : vector<22x96xf32> to vector<2x96xf32>
    %cst_87 = arith.constant dense<0.000000e+00> : vector<2x96xf32>
    %480 = tpu.matmul %478, %2, %cst_87 {dimension_numbers = #tpu.dot_dimension_numbers<[1], [0], [0], [1], [0, 0, 1, 1], [], []>} : vector<2x32xf32>, vector<32x96xf32>, vector<2x96xf32> -> vector<2x96xf32>
    %481 = vector.broadcast %7 : vector<1x96xf32> to vector<2x96xf32>
    %482 = arith.addf %480, %481 : vector<2x96xf32>
    %483 = vector.extract_strided_slice %479 {offsets = [0, 0], sizes = [2, 32], strides = [1, 1]} : vector<2x96xf32> to vector<2x32xf32>
    %484 = vector.extract_strided_slice %482 {offsets = [0, 0], sizes = [2, 32], strides = [1, 1]} : vector<2x96xf32> to vector<2x32xf32>
    %485 = arith.addf %483, %484 : vector<2x32xf32>
    %486 = arith.negf %485 : vector<2x32xf32>
    %487 = math.exp %486 : vector<2x32xf32>
    %cst_88 = arith.constant 1.000000e+00 : f32
    %488 = vector.broadcast %cst_88 : f32 to vector<2x32xf32>
    %489 = arith.addf %488, %487 : vector<2x32xf32>
    %490 = arith.divf %488, %489 : vector<2x32xf32>
    %491 = vector.extract_strided_slice %479 {offsets = [0, 32], sizes = [2, 32], strides = [1, 1]} : vector<2x96xf32> to vector<2x32xf32>
    %492 = vector.extract_strided_slice %482 {offsets = [0, 32], sizes = [2, 32], strides = [1, 1]} : vector<2x96xf32> to vector<2x32xf32>
    %493 = arith.addf %491, %492 : vector<2x32xf32>
    %494 = arith.negf %493 : vector<2x32xf32>
    %495 = math.exp %494 : vector<2x32xf32>
    %cst_89 = arith.constant 1.000000e+00 : f32
    %496 = vector.broadcast %cst_89 : f32 to vector<2x32xf32>
    %497 = arith.addf %496, %495 : vector<2x32xf32>
    %498 = arith.divf %496, %497 : vector<2x32xf32>
    %499 = vector.extract_strided_slice %479 {offsets = [0, 64], sizes = [2, 32], strides = [1, 1]} : vector<2x96xf32> to vector<2x32xf32>
    %500 = vector.extract_strided_slice %482 {offsets = [0, 64], sizes = [2, 32], strides = [1, 1]} : vector<2x96xf32> to vector<2x32xf32>
    %501 = arith.mulf %490, %500 : vector<2x32xf32>
    %502 = arith.addf %499, %501 : vector<2x32xf32>
    %503 = math.tanh %502 : vector<2x32xf32>
    %cst_90 = arith.constant 1.000000e+00 : f32
    %504 = vector.broadcast %cst_90 : f32 to vector<2x32xf32>
    %505 = arith.subf %504, %498 : vector<2x32xf32>
    %506 = arith.mulf %505, %503 : vector<2x32xf32>
    %507 = arith.mulf %498, %478 : vector<2x32xf32>
    %508 = arith.addf %506, %507 : vector<2x32xf32>
    %509 = vector.extract_strided_slice %357 {offsets = [10, 0], sizes = [2, 96], strides = [1, 1]} : vector<22x96xf32> to vector<2x96xf32>
    %cst_91 = arith.constant dense<0.000000e+00> : vector<2x96xf32>
    %510 = tpu.matmul %508, %2, %cst_91 {dimension_numbers = #tpu.dot_dimension_numbers<[1], [0], [0], [1], [0, 0, 1, 1], [], []>} : vector<2x32xf32>, vector<32x96xf32>, vector<2x96xf32> -> vector<2x96xf32>
    %511 = vector.broadcast %7 : vector<1x96xf32> to vector<2x96xf32>
    %512 = arith.addf %510, %511 : vector<2x96xf32>
    %513 = vector.extract_strided_slice %509 {offsets = [0, 0], sizes = [2, 32], strides = [1, 1]} : vector<2x96xf32> to vector<2x32xf32>
    %514 = vector.extract_strided_slice %512 {offsets = [0, 0], sizes = [2, 32], strides = [1, 1]} : vector<2x96xf32> to vector<2x32xf32>
    %515 = arith.addf %513, %514 : vector<2x32xf32>
    %516 = arith.negf %515 : vector<2x32xf32>
    %517 = math.exp %516 : vector<2x32xf32>
    %cst_92 = arith.constant 1.000000e+00 : f32
    %518 = vector.broadcast %cst_92 : f32 to vector<2x32xf32>
    %519 = arith.addf %518, %517 : vector<2x32xf32>
    %520 = arith.divf %518, %519 : vector<2x32xf32>
    %521 = vector.extract_strided_slice %509 {offsets = [0, 32], sizes = [2, 32], strides = [1, 1]} : vector<2x96xf32> to vector<2x32xf32>
    %522 = vector.extract_strided_slice %512 {offsets = [0, 32], sizes = [2, 32], strides = [1, 1]} : vector<2x96xf32> to vector<2x32xf32>
    %523 = arith.addf %521, %522 : vector<2x32xf32>
    %524 = arith.negf %523 : vector<2x32xf32>
    %525 = math.exp %524 : vector<2x32xf32>
    %cst_93 = arith.constant 1.000000e+00 : f32
    %526 = vector.broadcast %cst_93 : f32 to vector<2x32xf32>
    %527 = arith.addf %526, %525 : vector<2x32xf32>
    %528 = arith.divf %526, %527 : vector<2x32xf32>
    %529 = vector.extract_strided_slice %509 {offsets = [0, 64], sizes = [2, 32], strides = [1, 1]} : vector<2x96xf32> to vector<2x32xf32>
    %530 = vector.extract_strided_slice %512 {offsets = [0, 64], sizes = [2, 32], strides = [1, 1]} : vector<2x96xf32> to vector<2x32xf32>
    %531 = arith.mulf %520, %530 : vector<2x32xf32>
    %532 = arith.addf %529, %531 : vector<2x32xf32>
    %533 = math.tanh %532 : vector<2x32xf32>
    %cst_94 = arith.constant 1.000000e+00 : f32
    %534 = vector.broadcast %cst_94 : f32 to vector<2x32xf32>
    %535 = arith.subf %534, %528 : vector<2x32xf32>
    %536 = arith.mulf %535, %533 : vector<2x32xf32>
    %537 = arith.mulf %528, %508 : vector<2x32xf32>
    %538 = arith.addf %536, %537 : vector<2x32xf32>
    %539 = vector.extract_strided_slice %357 {offsets = [12, 0], sizes = [2, 96], strides = [1, 1]} : vector<22x96xf32> to vector<2x96xf32>
    %cst_95 = arith.constant dense<0.000000e+00> : vector<2x96xf32>
    %540 = tpu.matmul %538, %2, %cst_95 {dimension_numbers = #tpu.dot_dimension_numbers<[1], [0], [0], [1], [0, 0, 1, 1], [], []>} : vector<2x32xf32>, vector<32x96xf32>, vector<2x96xf32> -> vector<2x96xf32>
    %541 = vector.broadcast %7 : vector<1x96xf32> to vector<2x96xf32>
    %542 = arith.addf %540, %541 : vector<2x96xf32>
    %543 = vector.extract_strided_slice %539 {offsets = [0, 0], sizes = [2, 32], strides = [1, 1]} : vector<2x96xf32> to vector<2x32xf32>
    %544 = vector.extract_strided_slice %542 {offsets = [0, 0], sizes = [2, 32], strides = [1, 1]} : vector<2x96xf32> to vector<2x32xf32>
    %545 = arith.addf %543, %544 : vector<2x32xf32>
    %546 = arith.negf %545 : vector<2x32xf32>
    %547 = math.exp %546 : vector<2x32xf32>
    %cst_96 = arith.constant 1.000000e+00 : f32
    %548 = vector.broadcast %cst_96 : f32 to vector<2x32xf32>
    %549 = arith.addf %548, %547 : vector<2x32xf32>
    %550 = arith.divf %548, %549 : vector<2x32xf32>
    %551 = vector.extract_strided_slice %539 {offsets = [0, 32], sizes = [2, 32], strides = [1, 1]} : vector<2x96xf32> to vector<2x32xf32>
    %552 = vector.extract_strided_slice %542 {offsets = [0, 32], sizes = [2, 32], strides = [1, 1]} : vector<2x96xf32> to vector<2x32xf32>
    %553 = arith.addf %551, %552 : vector<2x32xf32>
    %554 = arith.negf %553 : vector<2x32xf32>
    %555 = math.exp %554 : vector<2x32xf32>
    %cst_97 = arith.constant 1.000000e+00 : f32
    %556 = vector.broadcast %cst_97 : f32 to vector<2x32xf32>
    %557 = arith.addf %556, %555 : vector<2x32xf32>
    %558 = arith.divf %556, %557 : vector<2x32xf32>
    %559 = vector.extract_strided_slice %539 {offsets = [0, 64], sizes = [2, 32], strides = [1, 1]} : vector<2x96xf32> to vector<2x32xf32>
    %560 = vector.extract_strided_slice %542 {offsets = [0, 64], sizes = [2, 32], strides = [1, 1]} : vector<2x96xf32> to vector<2x32xf32>
    %561 = arith.mulf %550, %560 : vector<2x32xf32>
    %562 = arith.addf %559, %561 : vector<2x32xf32>
    %563 = math.tanh %562 : vector<2x32xf32>
    %cst_98 = arith.constant 1.000000e+00 : f32
    %564 = vector.broadcast %cst_98 : f32 to vector<2x32xf32>
    %565 = arith.subf %564, %558 : vector<2x32xf32>
    %566 = arith.mulf %565, %563 : vector<2x32xf32>
    %567 = arith.mulf %558, %538 : vector<2x32xf32>
    %568 = arith.addf %566, %567 : vector<2x32xf32>
    %569 = vector.extract_strided_slice %357 {offsets = [14, 0], sizes = [2, 96], strides = [1, 1]} : vector<22x96xf32> to vector<2x96xf32>
    %cst_99 = arith.constant dense<0.000000e+00> : vector<2x96xf32>
    %570 = tpu.matmul %568, %2, %cst_99 {dimension_numbers = #tpu.dot_dimension_numbers<[1], [0], [0], [1], [0, 0, 1, 1], [], []>} : vector<2x32xf32>, vector<32x96xf32>, vector<2x96xf32> -> vector<2x96xf32>
    %571 = vector.broadcast %7 : vector<1x96xf32> to vector<2x96xf32>
    %572 = arith.addf %570, %571 : vector<2x96xf32>
    %573 = vector.extract_strided_slice %569 {offsets = [0, 0], sizes = [2, 32], strides = [1, 1]} : vector<2x96xf32> to vector<2x32xf32>
    %574 = vector.extract_strided_slice %572 {offsets = [0, 0], sizes = [2, 32], strides = [1, 1]} : vector<2x96xf32> to vector<2x32xf32>
    %575 = arith.addf %573, %574 : vector<2x32xf32>
    %576 = arith.negf %575 : vector<2x32xf32>
    %577 = math.exp %576 : vector<2x32xf32>
    %cst_100 = arith.constant 1.000000e+00 : f32
    %578 = vector.broadcast %cst_100 : f32 to vector<2x32xf32>
    %579 = arith.addf %578, %577 : vector<2x32xf32>
    %580 = arith.divf %578, %579 : vector<2x32xf32>
    %581 = vector.extract_strided_slice %569 {offsets = [0, 32], sizes = [2, 32], strides = [1, 1]} : vector<2x96xf32> to vector<2x32xf32>
    %582 = vector.extract_strided_slice %572 {offsets = [0, 32], sizes = [2, 32], strides = [1, 1]} : vector<2x96xf32> to vector<2x32xf32>
    %583 = arith.addf %581, %582 : vector<2x32xf32>
    %584 = arith.negf %583 : vector<2x32xf32>
    %585 = math.exp %584 : vector<2x32xf32>
    %cst_101 = arith.constant 1.000000e+00 : f32
    %586 = vector.broadcast %cst_101 : f32 to vector<2x32xf32>
    %587 = arith.addf %586, %585 : vector<2x32xf32>
    %588 = arith.divf %586, %587 : vector<2x32xf32>
    %589 = vector.extract_strided_slice %569 {offsets = [0, 64], sizes = [2, 32], strides = [1, 1]} : vector<2x96xf32> to vector<2x32xf32>
    %590 = vector.extract_strided_slice %572 {offsets = [0, 64], sizes = [2, 32], strides = [1, 1]} : vector<2x96xf32> to vector<2x32xf32>
    %591 = arith.mulf %580, %590 : vector<2x32xf32>
    %592 = arith.addf %589, %591 : vector<2x32xf32>
    %593 = math.tanh %592 : vector<2x32xf32>
    %cst_102 = arith.constant 1.000000e+00 : f32
    %594 = vector.broadcast %cst_102 : f32 to vector<2x32xf32>
    %595 = arith.subf %594, %588 : vector<2x32xf32>
    %596 = arith.mulf %595, %593 : vector<2x32xf32>
    %597 = arith.mulf %588, %568 : vector<2x32xf32>
    %598 = arith.addf %596, %597 : vector<2x32xf32>
    %599 = vector.extract_strided_slice %357 {offsets = [16, 0], sizes = [2, 96], strides = [1, 1]} : vector<22x96xf32> to vector<2x96xf32>
    %cst_103 = arith.constant dense<0.000000e+00> : vector<2x96xf32>
    %600 = tpu.matmul %598, %2, %cst_103 {dimension_numbers = #tpu.dot_dimension_numbers<[1], [0], [0], [1], [0, 0, 1, 1], [], []>} : vector<2x32xf32>, vector<32x96xf32>, vector<2x96xf32> -> vector<2x96xf32>
    %601 = vector.broadcast %7 : vector<1x96xf32> to vector<2x96xf32>
    %602 = arith.addf %600, %601 : vector<2x96xf32>
    %603 = vector.extract_strided_slice %599 {offsets = [0, 0], sizes = [2, 32], strides = [1, 1]} : vector<2x96xf32> to vector<2x32xf32>
    %604 = vector.extract_strided_slice %602 {offsets = [0, 0], sizes = [2, 32], strides = [1, 1]} : vector<2x96xf32> to vector<2x32xf32>
    %605 = arith.addf %603, %604 : vector<2x32xf32>
    %606 = arith.negf %605 : vector<2x32xf32>
    %607 = math.exp %606 : vector<2x32xf32>
    %cst_104 = arith.constant 1.000000e+00 : f32
    %608 = vector.broadcast %cst_104 : f32 to vector<2x32xf32>
    %609 = arith.addf %608, %607 : vector<2x32xf32>
    %610 = arith.divf %608, %609 : vector<2x32xf32>
    %611 = vector.extract_strided_slice %599 {offsets = [0, 32], sizes = [2, 32], strides = [1, 1]} : vector<2x96xf32> to vector<2x32xf32>
    %612 = vector.extract_strided_slice %602 {offsets = [0, 32], sizes = [2, 32], strides = [1, 1]} : vector<2x96xf32> to vector<2x32xf32>
    %613 = arith.addf %611, %612 : vector<2x32xf32>
    %614 = arith.negf %613 : vector<2x32xf32>
    %615 = math.exp %614 : vector<2x32xf32>
    %cst_105 = arith.constant 1.000000e+00 : f32
    %616 = vector.broadcast %cst_105 : f32 to vector<2x32xf32>
    %617 = arith.addf %616, %615 : vector<2x32xf32>
    %618 = arith.divf %616, %617 : vector<2x32xf32>
    %619 = vector.extract_strided_slice %599 {offsets = [0, 64], sizes = [2, 32], strides = [1, 1]} : vector<2x96xf32> to vector<2x32xf32>
    %620 = vector.extract_strided_slice %602 {offsets = [0, 64], sizes = [2, 32], strides = [1, 1]} : vector<2x96xf32> to vector<2x32xf32>
    %621 = arith.mulf %610, %620 : vector<2x32xf32>
    %622 = arith.addf %619, %621 : vector<2x32xf32>
    %623 = math.tanh %622 : vector<2x32xf32>
    %cst_106 = arith.constant 1.000000e+00 : f32
    %624 = vector.broadcast %cst_106 : f32 to vector<2x32xf32>
    %625 = arith.subf %624, %618 : vector<2x32xf32>
    %626 = arith.mulf %625, %623 : vector<2x32xf32>
    %627 = arith.mulf %618, %598 : vector<2x32xf32>
    %628 = arith.addf %626, %627 : vector<2x32xf32>
    %629 = vector.extract_strided_slice %357 {offsets = [18, 0], sizes = [2, 96], strides = [1, 1]} : vector<22x96xf32> to vector<2x96xf32>
    %cst_107 = arith.constant dense<0.000000e+00> : vector<2x96xf32>
    %630 = tpu.matmul %628, %2, %cst_107 {dimension_numbers = #tpu.dot_dimension_numbers<[1], [0], [0], [1], [0, 0, 1, 1], [], []>} : vector<2x32xf32>, vector<32x96xf32>, vector<2x96xf32> -> vector<2x96xf32>
    %631 = vector.broadcast %7 : vector<1x96xf32> to vector<2x96xf32>
    %632 = arith.addf %630, %631 : vector<2x96xf32>
    %633 = vector.extract_strided_slice %629 {offsets = [0, 0], sizes = [2, 32], strides = [1, 1]} : vector<2x96xf32> to vector<2x32xf32>
    %634 = vector.extract_strided_slice %632 {offsets = [0, 0], sizes = [2, 32], strides = [1, 1]} : vector<2x96xf32> to vector<2x32xf32>
    %635 = arith.addf %633, %634 : vector<2x32xf32>
    %636 = arith.negf %635 : vector<2x32xf32>
    %637 = math.exp %636 : vector<2x32xf32>
    %cst_108 = arith.constant 1.000000e+00 : f32
    %638 = vector.broadcast %cst_108 : f32 to vector<2x32xf32>
    %639 = arith.addf %638, %637 : vector<2x32xf32>
    %640 = arith.divf %638, %639 : vector<2x32xf32>
    %641 = vector.extract_strided_slice %629 {offsets = [0, 32], sizes = [2, 32], strides = [1, 1]} : vector<2x96xf32> to vector<2x32xf32>
    %642 = vector.extract_strided_slice %632 {offsets = [0, 32], sizes = [2, 32], strides = [1, 1]} : vector<2x96xf32> to vector<2x32xf32>
    %643 = arith.addf %641, %642 : vector<2x32xf32>
    %644 = arith.negf %643 : vector<2x32xf32>
    %645 = math.exp %644 : vector<2x32xf32>
    %cst_109 = arith.constant 1.000000e+00 : f32
    %646 = vector.broadcast %cst_109 : f32 to vector<2x32xf32>
    %647 = arith.addf %646, %645 : vector<2x32xf32>
    %648 = arith.divf %646, %647 : vector<2x32xf32>
    %649 = vector.extract_strided_slice %629 {offsets = [0, 64], sizes = [2, 32], strides = [1, 1]} : vector<2x96xf32> to vector<2x32xf32>
    %650 = vector.extract_strided_slice %632 {offsets = [0, 64], sizes = [2, 32], strides = [1, 1]} : vector<2x96xf32> to vector<2x32xf32>
    %651 = arith.mulf %640, %650 : vector<2x32xf32>
    %652 = arith.addf %649, %651 : vector<2x32xf32>
    %653 = math.tanh %652 : vector<2x32xf32>
    %cst_110 = arith.constant 1.000000e+00 : f32
    %654 = vector.broadcast %cst_110 : f32 to vector<2x32xf32>
    %655 = arith.subf %654, %648 : vector<2x32xf32>
    %656 = arith.mulf %655, %653 : vector<2x32xf32>
    %657 = arith.mulf %648, %628 : vector<2x32xf32>
    %658 = arith.addf %656, %657 : vector<2x32xf32>
    %659 = vector.extract_strided_slice %357 {offsets = [20, 0], sizes = [2, 96], strides = [1, 1]} : vector<22x96xf32> to vector<2x96xf32>
    %cst_111 = arith.constant dense<0.000000e+00> : vector<2x96xf32>
    %660 = tpu.matmul %658, %2, %cst_111 {dimension_numbers = #tpu.dot_dimension_numbers<[1], [0], [0], [1], [0, 0, 1, 1], [], []>} : vector<2x32xf32>, vector<32x96xf32>, vector<2x96xf32> -> vector<2x96xf32>
    %661 = vector.broadcast %7 : vector<1x96xf32> to vector<2x96xf32>
    %662 = arith.addf %660, %661 : vector<2x96xf32>
    %663 = vector.extract_strided_slice %659 {offsets = [0, 0], sizes = [2, 32], strides = [1, 1]} : vector<2x96xf32> to vector<2x32xf32>
    %664 = vector.extract_strided_slice %662 {offsets = [0, 0], sizes = [2, 32], strides = [1, 1]} : vector<2x96xf32> to vector<2x32xf32>
    %665 = arith.addf %663, %664 : vector<2x32xf32>
    %666 = arith.negf %665 : vector<2x32xf32>
    %667 = math.exp %666 : vector<2x32xf32>
    %cst_112 = arith.constant 1.000000e+00 : f32
    %668 = vector.broadcast %cst_112 : f32 to vector<2x32xf32>
    %669 = arith.addf %668, %667 : vector<2x32xf32>
    %670 = arith.divf %668, %669 : vector<2x32xf32>
    %671 = vector.extract_strided_slice %659 {offsets = [0, 32], sizes = [2, 32], strides = [1, 1]} : vector<2x96xf32> to vector<2x32xf32>
    %672 = vector.extract_strided_slice %662 {offsets = [0, 32], sizes = [2, 32], strides = [1, 1]} : vector<2x96xf32> to vector<2x32xf32>
    %673 = arith.addf %671, %672 : vector<2x32xf32>
    %674 = arith.negf %673 : vector<2x32xf32>
    %675 = math.exp %674 : vector<2x32xf32>
    %cst_113 = arith.constant 1.000000e+00 : f32
    %676 = vector.broadcast %cst_113 : f32 to vector<2x32xf32>
    %677 = arith.addf %676, %675 : vector<2x32xf32>
    %678 = arith.divf %676, %677 : vector<2x32xf32>
    %679 = vector.extract_strided_slice %659 {offsets = [0, 64], sizes = [2, 32], strides = [1, 1]} : vector<2x96xf32> to vector<2x32xf32>
    %680 = vector.extract_strided_slice %662 {offsets = [0, 64], sizes = [2, 32], strides = [1, 1]} : vector<2x96xf32> to vector<2x32xf32>
    %681 = arith.mulf %670, %680 : vector<2x32xf32>
    %682 = arith.addf %679, %681 : vector<2x32xf32>
    %683 = math.tanh %682 : vector<2x32xf32>
    %cst_114 = arith.constant 1.000000e+00 : f32
    %684 = vector.broadcast %cst_114 : f32 to vector<2x32xf32>
    %685 = arith.subf %684, %678 : vector<2x32xf32>
    %686 = arith.mulf %685, %683 : vector<2x32xf32>
    %687 = arith.mulf %678, %658 : vector<2x32xf32>
    %688 = arith.addf %686, %687 : vector<2x32xf32>
    %c0_115 = arith.constant 0 : index
    %c0_116 = arith.constant 0 : index
    %689 = vector.load %arg6[%c0_115, %c0_116] : memref<2x352xf32, #tpu.memory_space<vmem>>, vector<2x32xf32>
    tpu.vector_store %arg6[%c0_115, %c0_116], %388 {strides = array<i32>} : memref<2x352xf32, #tpu.memory_space<vmem>>, vector<2x32xf32>,
    %c0_117 = arith.constant 0 : index
    %c32_118 = arith.constant 32 : index
    %690 = vector.load %arg6[%c0_117, %c32_118] : memref<2x352xf32, #tpu.memory_space<vmem>>, vector<2x32xf32>
    tpu.vector_store %arg6[%c0_117, %c32_118], %418 {strides = array<i32>} : memref<2x352xf32, #tpu.memory_space<vmem>>, vector<2x32xf32>,
    %c0_119 = arith.constant 0 : index
    %c64_120 = arith.constant 64 : index
    %691 = vector.load %arg6[%c0_119, %c64_120] : memref<2x352xf32, #tpu.memory_space<vmem>>, vector<2x32xf32>
    tpu.vector_store %arg6[%c0_119, %c64_120], %448 {strides = array<i32>} : memref<2x352xf32, #tpu.memory_space<vmem>>, vector<2x32xf32>,
    %c0_121 = arith.constant 0 : index
    %c96_122 = arith.constant 96 : index
    %692 = vector.load %arg6[%c0_121, %c96_122] : memref<2x352xf32, #tpu.memory_space<vmem>>, vector<2x32xf32>
    tpu.vector_store %arg6[%c0_121, %c96_122], %478 {strides = array<i32>} : memref<2x352xf32, #tpu.memory_space<vmem>>, vector<2x32xf32>,
    %c0_123 = arith.constant 0 : index
    %c128 = arith.constant 128 : index
    %693 = vector.load %arg6[%c0_123, %c128] : memref<2x352xf32, #tpu.memory_space<vmem>>, vector<2x32xf32>
    tpu.vector_store %arg6[%c0_123, %c128], %508 {strides = array<i32>} : memref<2x352xf32, #tpu.memory_space<vmem>>, vector<2x32xf32>,
    %c0_124 = arith.constant 0 : index
    %c160 = arith.constant 160 : index
    %694 = vector.load %arg6[%c0_124, %c160] : memref<2x352xf32, #tpu.memory_space<vmem>>, vector<2x32xf32>
    tpu.vector_store %arg6[%c0_124, %c160], %538 {strides = array<i32>} : memref<2x352xf32, #tpu.memory_space<vmem>>, vector<2x32xf32>,
    %c0_125 = arith.constant 0 : index
    %c192 = arith.constant 192 : index
    %695 = vector.load %arg6[%c0_125, %c192] : memref<2x352xf32, #tpu.memory_space<vmem>>, vector<2x32xf32>
    tpu.vector_store %arg6[%c0_125, %c192], %568 {strides = array<i32>} : memref<2x352xf32, #tpu.memory_space<vmem>>, vector<2x32xf32>,
    %c0_126 = arith.constant 0 : index
    %c224 = arith.constant 224 : index
    %696 = vector.load %arg6[%c0_126, %c224] : memref<2x352xf32, #tpu.memory_space<vmem>>, vector<2x32xf32>
    tpu.vector_store %arg6[%c0_126, %c224], %598 {strides = array<i32>} : memref<2x352xf32, #tpu.memory_space<vmem>>, vector<2x32xf32>,
    %c0_127 = arith.constant 0 : index
    %c256 = arith.constant 256 : index
    %697 = vector.load %arg6[%c0_127, %c256] : memref<2x352xf32, #tpu.memory_space<vmem>>, vector<2x32xf32>
    tpu.vector_store %arg6[%c0_127, %c256], %628 {strides = array<i32>} : memref<2x352xf32, #tpu.memory_space<vmem>>, vector<2x32xf32>,
    %c0_128 = arith.constant 0 : index
    %c288 = arith.constant 288 : index
    %698 = vector.load %arg6[%c0_128, %c288] : memref<2x352xf32, #tpu.memory_space<vmem>>, vector<2x32xf32>
    tpu.vector_store %arg6[%c0_128, %c288], %658 {strides = array<i32>} : memref<2x352xf32, #tpu.memory_space<vmem>>, vector<2x32xf32>,
    %c0_129 = arith.constant 0 : index
    %c320 = arith.constant 320 : index
    %699 = vector.load %arg6[%c0_129, %c320] : memref<2x352xf32, #tpu.memory_space<vmem>>, vector<2x32xf32>
    tpu.vector_store %arg6[%c0_129, %c320], %688 {strides = array<i32>} : memref<2x352xf32, #tpu.memory_space<vmem>>, vector<2x32xf32>,
    %c0_130 = arith.constant 0 : index
    %c0_131 = arith.constant 0 : index
    %700 = vector.load %arg2[%c0_130, %c0_131] : memref<353x352xf32, #tpu.memory_space<vmem>>, vector<352x352xf32>
    %c352 = arith.constant 352 : index
    %c0_132 = arith.constant 0 : index
    %701 = vector.load %arg2[%c352, %c0_132] : memref<353x352xf32, #tpu.memory_space<vmem>>, vector<1x352xf32>
    %c0_133 = arith.constant 0 : index
    %c0_134 = arith.constant 0 : index
    %702 = vector.load %arg3[%c0_133, %c0_134] : memref<353x2xf32, #tpu.memory_space<vmem>>, vector<352x2xf32>
    %c352_135 = arith.constant 352 : index
    %c0_136 = arith.constant 0 : index
    %703 = vector.load %arg3[%c352_135, %c0_136] : memref<353x2xf32, #tpu.memory_space<vmem>>, vector<1x2xf32>
    %c0_137 = arith.constant 0 : index
    %c0_138 = arith.constant 0 : index
    %704 = vector.load %arg6[%c0_137, %c0_138] : memref<2x352xf32, #tpu.memory_space<vmem>>, vector<2x352xf32>
    %cst_139 = arith.constant dense<0.000000e+00> : vector<2x352xf32>
    %705 = tpu.matmul %704, %700, %cst_139 {dimension_numbers = #tpu.dot_dimension_numbers<[1], [0], [0], [1], [0, 0, 1, 1], [], []>} : vector<2x352xf32>, vector<352x352xf32>, vector<2x352xf32> -> vector<2x352xf32>
    %706 = vector.broadcast %701 : vector<1x352xf32> to vector<2x352xf32>
    %707 = arith.addf %705, %706 : vector<2x352xf32>
    %cst_140 = arith.constant dense<0.000000e+00> : vector<2x2xf32>
    %708 = tpu.matmul %707, %702, %cst_140 {dimension_numbers = #tpu.dot_dimension_numbers<[1], [0], [0], [1], [0, 0, 1, 1], [], []>} : vector<2x352xf32>, vector<352x2xf32>, vector<2x2xf32> -> vector<2x2xf32>
    %709 = vector.broadcast %703 : vector<1x2xf32> to vector<2x2xf32>
    %710 = arith.addf %708, %709 : vector<2x2xf32>
    %c0_141 = arith.constant 0 : index
    %c0_142 = arith.constant 0 : index
    %711 = vector.load %arg4[%c0_141, %c0_142] : memref<2x2xf32, #tpu.memory_space<vmem>>, vector<2x2xf32>
    tpu.vector_store %arg4[%c0_141, %c0_142], %710 {strides = array<i32>} : memref<2x2xf32, #tpu.memory_space<vmem>>, vector<2x2xf32>,
    return
  }
}

</mosaic_0001>

<bundles_post_ra>
// kernel: gru_forward_pallas.1
= control target key start
LH: loop header
LB: loop body
LE: loop exit
PB: predicated region body
PF: predicated region fallthrough
CT: control target
= control target key end

     0   :  { %vm52_vm0 = vcmask 1041408   ;;  %v4134_v2 = vmov 0.0   ;;  %vm4135_vm1 = vmmov 0   ;;  %vm42_vm2 = vcmask 15360   ;;  %s5409_s0 = inlined_call_operand.vmem [shape: f32[22,2], index: 0, kind: input, shape index: {}]   ;;  %s5410_s1 = inlined_call_operand.vmem [shape: f32[102,96], index: 1, kind: input, shape index: {}]   ;;  %s5411_s2 = inlined_call_operand.vmem [shape: f32[353,352], index: 2, kind: input, shape index: {}]   ;;  %s5412_s3 = inlined_call_operand.vmem [shape: f32[353,2], index: 3, kind: input, shape index: {}]   ;;  %s5413_s4 = inlined_call_operand.hbm [shape: f32[2,2], index: 4, kind: output, shape index: {}]  }
   0x1   :  { %v30_v0 = vld [vmem:[%s5410_s1 + $0x60] sm:$0x3]  ;;  %3648 = vmatprep.subr.mxu1 %v4134_v2  ;;  %3650 = vmatprep.mubr.msk.f32.mxu1 %vm4135_vm1, %v4134_v2  ;;  %v4178_v3 = vld [vmem:[%s5410_s1 + $0x38] sm:$0xff]  ;;  %v4186_v4 = vld [vmem:[%s5410_s1 + $0x30] sm:$0xff] }
   0x2   :  { %v35_v1 = vld [vmem:[%s5409_s0] sm:$0xff]  ;;  %3649 = vmatpush3.msk.msra.mxu1 %vm52_vm0, %v30_v0  ;;  %3670 = vmatprep.subr.mxu0 %v4134_v2 }
   0x3   :  { %3651 = vmatmul.mubr.msk.f32.vlgmr.msra.gmra.mxu1 %vm42_vm2, %v35_v1  ;;  %3659 = vmatprep.subr.mxu1 %v4134_v2 }
   0x4   :  { %9 = vsyncpa [#allocation5], 0  ;;  %3660 = vmatpush3.msra.mxu1 %v4178_v3  ;;  %3653 = vmatprep.mubr.msk.f32.mxu1 %vm4135_vm1, %v4134_v2  ;;  %v36_v5 = vld [vmem:[%s5409_s0 + $0x8] sm:$0xff]  ;;  %v4208_v7 = vld [vmem:[%s5410_s1 + $0x20] sm:$0xff]  ;;  %s4136_s8 = smov 64   ;;  %s4137_s9 = smov 96  }
   0x5   :  { %3661 = vmatprep.subr.mxu1 %v4134_v2  ;;  %v4198_v6 = vld [vmem:[%s5410_s1 + $0x28] sm:$0xff]  ;;  %3671 = vmatpush3.msra.mxu0 %v4178_v3  ;;  %v37_v8 = vld [vmem:[%s5409_s0 + $0x10] sm:$0x3f]  ;;  %v3373_v11 = vld [vmem:[%s5410_s1 + $0x62] ss:$0 sm:$0xff]  ;;  %vm1292_vm3 = vcmask 254976  }
   0x6   :  { %3662 = vmatpush3.msra.mxu1 %v4186_v4  ;;  %3672 = vmatprep.subr.mxu0 %v4134_v2  ;;  %v4251_v18 = vld [vmem:[%s5410_s1 + $0x63] ss:$0 sm:$0xff]  ;;  %vm140_vm4 = vcmask 261120   ;;  %vm1297_vm5 = vcmask 257026   ;;  %vm1307_vm6 = vcmask 261126   ;;  %vm1302_vm7 = vcmask 259076  }
   0x7   :  { %3654 = vmatmul.mubr.msk.f32.gmra.mxu1 %vm42_vm2, %v36_v5  ;;  %3663 = vmatprep.subr.mxu1 %v4134_v2  ;;  %vm2601_vm8 = vcmask 517376   ;;  %vm2614_vm9 = vcmask 779776   ;;  %vm2628_vm10 = vcmask 1042176   ;;  %vm2925_vm11 = vcmask 785408   ;;  %s4140_s28 = smov [#allocation4]  }
   0x8   :  { %3656 = vmatprep.mubr.msk.f32.mxu1 %vm4135_vm1, %v4134_v2  ;;  %3664 = vmatpush3.msra.mxu1 %v4198_v6  ;;  %s3365_s29 = sshll.u32 %s4140_s28, 4  ;;  %vm3357_vm12 = vcmask 9216   ;;  %s3366_s29 = int_to_ptr.vmem [resolvable:$true] %s3365_s29 }
   0x9   :  { %3665 = vmatprep.subr.mxu1 %v4134_v2  ;;  %3673 = vmatpush3.msra.mxu0 %v4186_v4  ;;  %s4112_s30 = scalar_lea.vmem %s3366_s29, 32  ;;  %p4117_p1 = scmp.lt.s32.totalorder %s3366_s29, %s3366_s29 }
   0xa   :  { %3666 = vmatpush3.msra.mxu1 %v4208_v7  ;;  %3674 = vmatprep.subr.mxu0 %v4134_v2  ;;  %p4113_p0 = scmp.ne.s32.totalorder %s3366_s29, %s4112_s30  ;;  %p4118_p2 = scmp.lt.s32.totalorder %s4112_s30, %s4112_s30 }
   0xb   :  { %3657 = vmatmul.mubr.msk.f32.gmra.mxu1 %vm42_vm2, %v37_v8  ;;  %3675 = vmatpush3.msra.mxu0 %v4198_v6 }
   0xc   :  { %3667 = vmatprep.mubr.msk.f32.mxu1 %vm4135_vm1, %v4134_v2  ;;  %3676 = vmatprep.subr.mxu0 %v4134_v2  ;;  %p4119_p3 = por %p4118_p2, %p4117_p1 }
   0xd   :  { %3677 = vmatpush3.msra.mxu0 %v4208_v7  ;;  %3678 = vmatprep.mubr.msk.f32.mxu0 %vm4135_vm1, %v4134_v2 }
   0xe   :  { %3681 = vmatprep.subr.mxu1 %v4134_v2  ;;  %3692 = vmatprep.subr.mxu0 %v4134_v2  ;;  %p4120_p4 = pnand %p4119_p3, %p4113_p0 }
   0xf   :  { %3668 = vmatmul.mubr.f32.vlgmr.msra.gmra.mxu1 %v4134_v2 }
  0x10   :  { %3682 = vmatpush3.msra.mxu1 %v4178_v3  ;;  %3689 = vmatprep.mubr.msk.f32.mxu1 %vm4135_vm1, %v4134_v2 }
  0x11   :  { %3683 = vmatprep.subr.mxu1 %v4134_v2 }
  0x12   :  { %3684 = vmatpush3.msra.mxu1 %v4186_v4 }
  0x13   :  { %3685 = vmatprep.subr.mxu1 %v4134_v2 }
  0x14   :  { %3686 = vmatpush3.msra.mxu1 %v4198_v6 }
  0x15   :  { %3687 = vmatprep.subr.mxu1 %v4134_v2 }
  0x16   :  { %3688 = vmatpush3.msra.mxu1 %v4208_v7 }
  0x17   :  { %3703 = vmatprep.subr.mxu1 %v4134_v2 }
  0xc3   :  { %v122_v9 = vpop.f32.mrf.mxu1 }
  0xc4   :  { %v4255_v22 = vadd.f32 %v3373_v11, %v122_v9 }
  0xc5   :  { %v3652_v10 = vpop.f32.mrf.mxu1 }
  0xc7   :  { %v127_v12 = vpop.f32.mrf.mxu1 }
  0xc8   :  { %v4244_v13 = vadd.f32 %v3373_v11, %v127_v12 }
  0xc9   :  { %v3655_v14 = vpop.f32.mrf.mxu1 }
  0xcb   :  { %v132_v15 = vpop.f32.mrf.mxu1 }
  0xcc   :  { %v4246_v16 = vadd.f32 %v3373_v11, %v132_v15 }
  0xcd   :  { %v3658_v17 = vpop.f32.mrf.mxu1 }
  0xcf   :  { %v210_v19 = vpop.f32.mrf.mxu1 }
  0xd0   :  { %v211_v20 = vadd.f32 %v4251_v18, %v210_v19 }
  0xd1   :  { %v3669_v21 = vpop.f32.mrf.mxu1 }
  0xd2   :  { %222 = vrot.lane.b32.xlu0 %v211_v20, %s4136_s8  ;;  %v214_v23 = vadd.f32 %v211_v20, %v4255_v22 }
  0xd4   :  { %v3379_v24 = vmul.f32 -1.442695, %v214_v23 }
  0xd6   :  { %3980 = vpow2.f32 %v3379_v24 }
  0xe3   :  { %v3981_v25 = vpop.eup %3980 }
  0xe4   :  { %v218_v26 = vadd.f32 1.0, %v3981_v25 }
  0xe6   :  { %3982 = vrcp.f32 %v218_v26 }
  0xf3   :  { %v3983_v27 = vpop.eup %3982 }
  0xf4   :  { %v232_v33 = vsub.f32 1.0, %v3983_v27  ;;  %v238_v35 = vmul.f32 0.0, %v3983_v27 }
 0x144   :  { %v223_v28 = vpop.permute.xlu0 %222 }
 0x145   :  { %v225_v29 = vmul.f32 %v3983_v27, %v223_v28 }
 0x147   :  { %227 = vrot.lane.b32.xlu0 %v225_v29, %s4136_s8 }
 0x1b9   :  { %v228_v30 = vpop.permute.xlu0 %227 }
 0x1ba   :  { %v230_v31 = vadd.f32 %v228_v30, %v4255_v22 }
 0x1bc   :  { %3984 = vtanh.f32 %v230_v31 }
 0x1c9   :  { %v3985_v32 = vpop.eup %3984 }
 0x1ca   :  { %234 = vrot.lane.b32.xlu1 %v3985_v32, %s4137_s9 }
 0x23c   :  { %v235_v34 = vpop.permute.xlu1 %234 }
 0x23d   :  { %v237_v36 = vmul.f32 %v235_v34, %v232_v33 }
 0x23f   :  { %v239_v37 = vadd.f32 %v238_v35, %v237_v36 }
 0x241   :  { %241 = vrot.lane.b32.xlu1 %v239_v37, %s4137_s9  ;;  %v341_v53 = vrot.slane %v239_v37, 6 }
 0x2b3   :  { %v242_v38 = vpop.permute.xlu1 %241 }
 0x2b4   :  { %1293 = vst.msk [vmem:[#allocation2] sm:$0x3] %vm1292_vm3, %v242_v38  ;;  %3679 = vmatmul.mubr.msk.f32.vlgmr.msra.gmra.mxu0 %vm140_vm4, %v242_v38 }
 0x2b5   :  { %3693 = vmatpush3.msra.mxu0 %v4178_v3  ;;  %3700 = vmatprep.mubr.msk.f32.mxu0 %vm4135_vm1, %v4134_v2 }
 0x2b6   :  { %3694 = vmatprep.subr.mxu0 %v4134_v2 }
 0x2b7   :  { %3695 = vmatpush3.msra.mxu0 %v4186_v4 }
 0x2b8   :  { %3696 = vmatprep.subr.mxu0 %v4134_v2 }
 0x2b9   :  { %3697 = vmatpush3.msra.mxu0 %v4198_v6 }
 0x2ba   :  { %3698 = vmatprep.subr.mxu0 %v4134_v2 }
 0x2bb   :  { %3699 = vmatpush3.msra.mxu0 %v4208_v7 }
 0x2bc   :  { %3714 = vmatprep.subr.mxu0 %v4134_v2 }
 0x374   :  { %v311_v39 = vpop.f32.mrf.mxu0 }
 0x375   :  { %v312_v40 = vadd.f32 %v4251_v18, %v311_v39 }
 0x376   :  { %v3680_v41 = vpop.f32.mrf.mxu0 }
 0x377   :  { %v316_v42 = vrot.slane %v312_v40, 6 }
 0x379   :  { %325 = vrot.lane.b32.xlu0 %v316_v42, %s4136_s8  ;;  %v318_v43 = vadd.f32 %v316_v42, %v4255_v22 }
 0x37b   :  { %v3381_v44 = vmul.f32 -1.442695, %v318_v43 }
 0x37d   :  { %3986 = vpow2.f32 %v3381_v44 }
 0x38a   :  { %v3987_v45 = vpop.eup %3986 }
 0x38b   :  { %v322_v46 = vadd.f32 1.0, %v3987_v45 }
 0x38d   :  { %3988 = vrcp.f32 %v322_v46 }
 0x39a   :  { %v3989_v47 = vpop.eup %3988 }
 0x39b   :  { %v335_v54 = vsub.f32 1.0, %v3989_v47  ;;  %v343_v57 = vmul.f32 %v3989_v47, %v341_v53 }
 0x3eb   :  { %v326_v48 = vpop.permute.xlu0 %325 }
 0x3ec   :  { %v328_v49 = vmul.f32 %v3989_v47, %v326_v48 }
 0x3ee   :  { %330 = vrot.lane.b32.xlu1 %v328_v49, %s4136_s8 }
 0x460   :  { %v331_v50 = vpop.permute.xlu1 %330 }
 0x461   :  { %v333_v51 = vadd.f32 %v331_v50, %v4255_v22 }
 0x463   :  { %3990 = vtanh.f32 %v333_v51 }
 0x470   :  { %v3991_v52 = vpop.eup %3990 }
 0x471   :  { %337 = vrot.lane.b32.xlu0 %v3991_v52, %s4137_s9 }
 0x4e3   :  { %v338_v55 = vpop.permute.xlu0 %337 }
 0x4e4   :  { %v340_v56 = vmul.f32 %v338_v55, %v335_v54 }
 0x4e6   :  { %v4280_v58 = vadd.f32 %v343_v57, %v340_v56 }
 0x4e8   :  { %v346_v59 = vrot.slane %v4280_v58, 2  ;;  %v447_v20 = vrot.slane %v4280_v58, 6 }
 0x4ea   :  { %347 = vrot.lane.b32.xlu1 %v346_v59, %s4137_s9 }
 0x55c   :  { %v348_v60 = vpop.permute.xlu1 %347 }
 0x55d   :  { %3690 = vmatmul.mubr.msk.f32.vlgmr.msra.gmra.mxu1 %vm140_vm4, %v348_v60 }
 0x55e   :  { %3704 = vmatpush3.msra.mxu1 %v4178_v3  ;;  %3711 = vmatprep.mubr.msk.f32.mxu1 %vm4135_vm1, %v4134_v2 }
 0x55f   :  { %3705 = vmatprep.subr.mxu1 %v4134_v2 }
 0x560   :  { %3706 = vmatpush3.msra.mxu1 %v4186_v4 }
 0x561   :  { %3707 = vmatprep.subr.mxu1 %v4134_v2 }
 0x562   :  { %3708 = vmatpush3.msra.mxu1 %v4198_v6 }
 0x563   :  { %3709 = vmatprep.subr.mxu1 %v4134_v2 }
 0x564   :  { %3710 = vmatpush3.msra.mxu1 %v4208_v7 }
 0x565   :  { %3725 = vmatprep.subr.mxu1 %v4134_v2 }
 0x61d   :  { %v417_v61 = vpop.f32.mrf.mxu1 }
 0x61e   :  { %v418_v62 = vadd.f32 %v4251_v18, %v417_v61 }
 0x61f   :  { %v3691_v63 = vpop.f32.mrf.mxu1 }
 0x620   :  { %v422_v0 = vrot.slane %v418_v62, 4 }
 0x622   :  { %431 = vrot.lane.b32.xlu0 %v422_v0, %s4136_s8  ;;  %v424_v1 = vadd.f32 %v422_v0, %v4255_v22 }
 0x624   :  { %v3383_v5 = vmul.f32 -1.442695, %v424_v1 }
 0x626   :  { %3992 = vpow2.f32 %v3383_v5 }
 0x633   :  { %v3993_v8 = vpop.eup %3992 }
 0x634   :  { %v428_v9 = vadd.f32 1.0, %v3993_v8 }
 0x636   :  { %3994 = vrcp.f32 %v428_v9 }
 0x643   :  { %v3995_v10 = vpop.eup %3994 }
 0x644   :  { %v441_v19 = vsub.f32 1.0, %v3995_v10  ;;  %v449_v23 = vmul.f32 %v3995_v10, %v447_v20 }
 0x694   :  { %v432_v11 = vpop.permute.xlu0 %431 }
 0x695   :  { %v434_v12 = vmul.f32 %v3995_v10, %v432_v11 }
 0x697   :  { %436 = vrot.lane.b32.xlu1 %v434_v12, %s4136_s8 }
 0x709   :  { %v437_v14 = vpop.permute.xlu1 %436 }
 0x70a   :  { %v439_v15 = vadd.f32 %v437_v14, %v4255_v22 }
 0x70c   :  { %3996 = vtanh.f32 %v439_v15 }
 0x719   :  { %v3997_v17 = vpop.eup %3996 }
 0x71a   :  { %443 = vrot.lane.b32.xlu0 %v3997_v17, %s4137_s9 }
 0x78c   :  { %v444_v21 = vpop.permute.xlu0 %443 }
 0x78d   :  { %v446_v24 = vmul.f32 %v444_v21, %v441_v19 }
 0x78f   :  { %v4302_v25 = vadd.f32 %v449_v23, %v446_v24 }
 0x791   :  { %v452_v26 = vrot.slane %v4302_v25, 4  ;;  %v553_v43 = vrot.slane %v4302_v25, 6 }
 0x793   :  { %453 = vrot.lane.b32.xlu1 %v452_v26, %s4137_s9 }
 0x805   :  { %v454_v27 = vpop.permute.xlu1 %453 }
 0x806   :  { %3701 = vmatmul.mubr.msk.f32.vlgmr.msra.gmra.mxu0 %vm140_vm4, %v454_v27 }
 0x807   :  { %3715 = vmatpush3.msra.mxu0 %v4178_v3  ;;  %3722 = vmatprep.mubr.msk.f32.mxu0 %vm4135_vm1, %v4134_v2 }
 0x808   :  { %3716 = vmatprep.subr.mxu0 %v4134_v2 }
 0x809   :  { %3717 = vmatpush3.msra.mxu0 %v4186_v4 }
 0x80a   :  { %3718 = vmatprep.subr.mxu0 %v4134_v2 }
 0x80b   :  { %3719 = vmatpush3.msra.mxu0 %v4198_v6 }
 0x80c   :  { %3720 = vmatprep.subr.mxu0 %v4134_v2 }
 0x80d   :  { %3721 = vmatpush3.msra.mxu0 %v4208_v7 }
 0x80e   :  { %3736 = vmatprep.subr.mxu0 %v4134_v2 }
 0x8c6   :  { %v523_v28 = vpop.f32.mrf.mxu0 }
 0x8c7   :  { %v524_v29 = vadd.f32 %v4251_v18, %v523_v28 }
 0x8c8   :  { %v3702_v30 = vpop.f32.mrf.mxu0 }
 0x8c9   :  { %v528_v31 = vrot.slane %v524_v29, 2 }
 0x8cb   :  { %537 = vrot.lane.b32.xlu0 %v528_v31, %s4136_s8  ;;  %v530_v32 = vadd.f32 %v528_v31, %v4255_v22 }
 0x8cd   :  { %v3385_v33 = vmul.f32 -1.442695, %v530_v32 }
 0x8cf   :  { %3998 = vpow2.f32 %v3385_v33 }
 0x8dc   :  { %v3999_v34 = vpop.eup %3998 }
 0x8dd   :  { %v534_v35 = vadd.f32 1.0, %v3999_v34 }
 0x8df   :  { %4000 = vrcp.f32 %v534_v35 }
 0x8ec   :  { %v4001_v36 = vpop.eup %4000 }
 0x8ed   :  { %v547_v42 = vsub.f32 1.0, %v4001_v36  ;;  %v555_v45 = vmul.f32 %v4001_v36, %v553_v43 }
 0x93d   :  { %v538_v37 = vpop.permute.xlu0 %537 }
 0x93e   :  { %v540_v38 = vmul.f32 %v4001_v36, %v538_v37 }
 0x940   :  { %542 = vrot.lane.b32.xlu1 %v540_v38, %s4136_s8 }
 0x9b2   :  { %v543_v39 = vpop.permute.xlu1 %542 }
 0x9b3   :  { %v545_v40 = vadd.f32 %v543_v39, %v4255_v22 }
 0x9b5   :  { %4002 = vtanh.f32 %v545_v40 }
 0x9c2   :  { %v4003_v41 = vpop.eup %4002 }
 0x9c3   :  { %549 = vrot.lane.b32.xlu0 %v4003_v41, %s4137_s9 }
 0xa35   :  { %v550_v44 = vpop.permute.xlu0 %549 }
 0xa36   :  { %v552_v46 = vmul.f32 %v550_v44, %v547_v42 }
 0xa38   :  { %v4324_v47 = vadd.f32 %v555_v45, %v552_v46 }
 0xa3a   :  { %v558_v48 = vrot.slane %v4324_v47, 6 }
 0xa3c   :  { %559 = vrot.lane.b32.xlu1 %v558_v48, %s4137_s9 }
 0xaae   :  { %v560_v49 = vpop.permute.xlu1 %559 }
 0xaaf   :  { %3712 = vmatmul.mubr.msk.f32.vlgmr.msra.gmra.mxu1 %vm140_vm4, %v560_v49 }
 0xab0   :  { %3726 = vmatpush3.msra.mxu1 %v4178_v3  ;;  %3733 = vmatprep.mubr.msk.f32.mxu1 %vm4135_vm1, %v4134_v2 }
 0xab1   :  { %3727 = vmatprep.subr.mxu1 %v4134_v2 }
 0xab2   :  { %3728 = vmatpush3.msra.mxu1 %v4186_v4 }
 0xab3   :  { %3729 = vmatprep.subr.mxu1 %v4134_v2 }
 0xab4   :  { %3730 = vmatpush3.msra.mxu1 %v4198_v6 }
 0xab5   :  { %3731 = vmatprep.subr.mxu1 %v4134_v2 }
 0xab6   :  { %3732 = vmatpush3.msra.mxu1 %v4208_v7 }
 0xab7   :  { %3747 = vmatprep.subr.mxu1 %v4134_v2 }
 0xb6f   :  { %v629_v22 = vpop.f32.mrf.mxu1 }
 0xb70   :  { %v630_v50 = vadd.f32 %v4251_v18, %v629_v22 }
 0xb71   :  { %v3713_v51 = vpop.f32.mrf.mxu1 }
 0xb72   :  { %641 = vrot.lane.b32.xlu0 %v630_v50, %s4136_s8  ;;  %v633_v52 = vadd.f32 %v630_v50, %v4244_v13 }
 0xb74   :  { %v3387_v53 = vmul.f32 -1.442695, %v633_v52 }
 0xb76   :  { %4004 = vpow2.f32 %v3387_v53 }
 0xb83   :  { %v4005_v54 = vpop.eup %4004 }
 0xb84   :  { %v637_v55 = vadd.f32 1.0, %v4005_v54 }
 0xb86   :  { %4006 = vrcp.f32 %v637_v55 }
 0xb93   :  { %v4007_v56 = vpop.eup %4006 }
 0xb94   :  { %v651_v63 = vsub.f32 1.0, %v4007_v56  ;;  %v658_v1 = vmul.f32 %v4007_v56, %v558_v48 }
 0xbe4   :  { %v642_v57 = vpop.permute.xlu0 %641 }
 0xbe5   :  { %v644_v59 = vmul.f32 %v4007_v56, %v642_v57 }
 0xbe7   :  { %646 = vrot.lane.b32.xlu1 %v644_v59, %s4136_s8 }
 0xc59   :  { %v647_v60 = vpop.permute.xlu1 %646 }
 0xc5a   :  { %v649_v61 = vadd.f32 %v647_v60, %v4244_v13 }
 0xc5c   :  { %4008 = vtanh.f32 %v649_v61 }
 0xc69   :  { %v4009_v62 = vpop.eup %4008 }
 0xc6a   :  { %653 = vrot.lane.b32.xlu0 %v4009_v62, %s4137_s9 }
 0xcdc   :  { %v654_v0 = vpop.permute.xlu0 %653 }
 0xcdd   :  { %v656_v5 = vmul.f32 %v654_v0, %v651_v63 }
 0xcdf   :  { %v659_v8 = vadd.f32 %v658_v1, %v656_v5 }
 0xce1   :  { %661 = vrot.lane.b32.xlu1 %v659_v8, %s4137_s9  ;;  %v761_v29 = vrot.slane %v659_v8, 6 }
 0xd53   :  { %v662_v9 = vpop.permute.xlu1 %661 }
 0xd54   :  { %1310 = vst.msk [vmem:[#allocation2 + $0x8] sm:$0x3] %vm1292_vm3, %v662_v9  ;;  %3723 = vmatmul.mubr.msk.f32.vlgmr.msra.gmra.mxu0 %vm140_vm4, %v662_v9 }
 0xd55   :  { %3737 = vmatpush3.msra.mxu0 %v4178_v3  ;;  %3744 = vmatprep.mubr.msk.f32.mxu0 %vm4135_vm1, %v4134_v2 }
 0xd56   :  { %3738 = vmatprep.subr.mxu0 %v4134_v2 }
 0xd57   :  { %3739 = vmatpush3.msra.mxu0 %v4186_v4 }
 0xd58   :  { %3740 = vmatprep.subr.mxu0 %v4134_v2 }
 0xd59   :  { %3741 = vmatpush3.msra.mxu0 %v4198_v6 }
 0xd5a   :  { %3742 = vmatprep.subr.mxu0 %v4134_v2 }
 0xd5b   :  { %3743 = vmatpush3.msra.mxu0 %v4208_v7 }
 0xd5c   :  { %3758 = vmatprep.subr.mxu0 %v4134_v2 }
 0xe14   :  { %v731_v10 = vpop.f32.mrf.mxu0 }
 0xe15   :  { %v732_v11 = vadd.f32 %v4251_v18, %v731_v10 }
 0xe16   :  { %v3724_v12 = vpop.f32.mrf.mxu0 }
 0xe17   :  { %v736_v14 = vrot.slane %v732_v11, 6 }
 0xe19   :  { %745 = vrot.lane.b32.xlu0 %v736_v14, %s4136_s8  ;;  %v738_v15 = vadd.f32 %v736_v14, %v4244_v13 }
 0xe1b   :  { %v3389_v17 = vmul.f32 -1.442695, %v738_v15 }
 0xe1d   :  { %4010 = vpow2.f32 %v3389_v17 }
 0xe2a   :  { %v4011_v19 = vpop.eup %4010 }
 0xe2b   :  { %v742_v20 = vadd.f32 1.0, %v4011_v19 }
 0xe2d   :  { %4012 = vrcp.f32 %v742_v20 }
 0xe3a   :  { %v4013_v21 = vpop.eup %4012 }
 0xe3b   :  { %v755_v30 = vsub.f32 1.0, %v4013_v21  ;;  %v763_v33 = vmul.f32 %v4013_v21, %v761_v29 }
 0xe8b   :  { %v746_v23 = vpop.permute.xlu0 %745 }
 0xe8c   :  { %v748_v24 = vmul.f32 %v4013_v21, %v746_v23 }
 0xe8e   :  { %750 = vrot.lane.b32.xlu1 %v748_v24, %s4136_s8 }
 0xf00   :  { %v751_v26 = vpop.permute.xlu1 %750 }
 0xf01   :  { %v753_v27 = vadd.f32 %v751_v26, %v4244_v13 }
 0xf03   :  { %4014 = vtanh.f32 %v753_v27 }
 0xf10   :  { %v4015_v28 = vpop.eup %4014 }
 0xf11   :  { %757 = vrot.lane.b32.xlu0 %v4015_v28, %s4137_s9 }
 0xf83   :  { %v758_v31 = vpop.permute.xlu0 %757 }
 0xf84   :  { %v760_v32 = vmul.f32 %v758_v31, %v755_v30 }
 0xf86   :  { %v4364_v34 = vadd.f32 %v763_v33, %v760_v32 }
 0xf88   :  { %v766_v35 = vrot.slane %v4364_v34, 2  ;;  %v867_v52 = vrot.slane %v4364_v34, 6 }
 0xf8a   :  { %767 = vrot.lane.b32.xlu1 %v766_v35, %s4137_s9 }
 0xffc   :  { %v768_v36 = vpop.permute.xlu1 %767 }
 0xffd   :  { %3734 = vmatmul.mubr.msk.f32.vlgmr.msra.gmra.mxu1 %vm140_vm4, %v768_v36 }
 0xffe   :  { %3748 = vmatpush3.msra.mxu1 %v4178_v3  ;;  %3755 = vmatprep.mubr.msk.f32.mxu1 %vm4135_vm1, %v4134_v2 }
 0xfff   :  { %3749 = vmatprep.subr.mxu1 %v4134_v2 }
0x1000   :  { %3750 = vmatpush3.msra.mxu1 %v4186_v4 }
0x1001   :  { %3751 = vmatprep.subr.mxu1 %v4134_v2 }
0x1002   :  { %3752 = vmatpush3.msra.mxu1 %v4198_v6 }
0x1003   :  { %3753 = vmatprep.subr.mxu1 %v4134_v2 }
0x1004   :  { %3754 = vmatpush3.msra.mxu1 %v4208_v7 }
0x1005   :  { %3769 = vmatprep.subr.mxu1 %v4134_v2 }
0x10bd   :  { %v837_v37 = vpop.f32.mrf.mxu1 }
0x10be   :  { %v838_v38 = vadd.f32 %v4251_v18, %v837_v37 }
0x10bf   :  { %v3735_v39 = vpop.f32.mrf.mxu1 }
0x10c0   :  { %v842_v40 = vrot.slane %v838_v38, 4 }
0x10c2   :  { %851 = vrot.lane.b32.xlu0 %v842_v40, %s4136_s8  ;;  %v844_v41 = vadd.f32 %v842_v40, %v4244_v13 }
0x10c4   :  { %v3391_v42 = vmul.f32 -1.442695, %v844_v41 }
0x10c6   :  { %4016 = vpow2.f32 %v3391_v42 }
0x10d3   :  { %v4017_v43 = vpop.eup %4016 }
0x10d4   :  { %v848_v44 = vadd.f32 1.0, %v4017_v43 }
0x10d6   :  { %4018 = vrcp.f32 %v848_v44 }
0x10e3   :  { %v4019_v45 = vpop.eup %4018 }
0x10e4   :  { %v861_v51 = vsub.f32 1.0, %v4019_v45  ;;  %v869_v54 = vmul.f32 %v4019_v45, %v867_v52 }
0x1134   :  { %v852_v46 = vpop.permute.xlu0 %851 }
0x1135   :  { %v854_v48 = vmul.f32 %v4019_v45, %v852_v46 }
0x1137   :  { %856 = vrot.lane.b32.xlu1 %v854_v48, %s4136_s8 }
0x11a9   :  { %v857_v49 = vpop.permute.xlu1 %856 }
0x11aa   :  { %v859_v22 = vadd.f32 %v857_v49, %v4244_v13 }
0x11ac   :  { %4020 = vtanh.f32 %v859_v22 }
0x11b9   :  { %v4021_v50 = vpop.eup %4020 }
0x11ba   :  { %863 = vrot.lane.b32.xlu0 %v4021_v50, %s4137_s9 }
0x122c   :  { %v864_v53 = vpop.permute.xlu0 %863 }
0x122d   :  { %v866_v55 = vmul.f32 %v864_v53, %v861_v51 }
0x122f   :  { %v4386_v56 = vadd.f32 %v869_v54, %v866_v55 }
0x1231   :  { %v872_v57 = vrot.slane %v4386_v56, 4  ;;  %v973_v19 = vrot.slane %v4386_v56, 6 }
0x1233   :  { %873 = vrot.lane.b32.xlu1 %v872_v57, %s4137_s9 }
0x12a5   :  { %v874_v59 = vpop.permute.xlu1 %873 }
0x12a6   :  { %3745 = vmatmul.mubr.msk.f32.vlgmr.msra.gmra.mxu0 %vm140_vm4, %v874_v59 }
0x12a7   :  { %3759 = vmatpush3.msra.mxu0 %v4178_v3  ;;  %3766 = vmatprep.mubr.msk.f32.mxu0 %vm4135_vm1, %v4134_v2 }
0x12a8   :  { %3760 = vmatprep.subr.mxu0 %v4134_v2 }
0x12a9   :  { %3761 = vmatpush3.msra.mxu0 %v4186_v4 }
0x12aa   :  { %3762 = vmatprep.subr.mxu0 %v4134_v2 }
0x12ab   :  { %3763 = vmatpush3.msra.mxu0 %v4198_v6 }
0x12ac   :  { %3764 = vmatprep.subr.mxu0 %v4134_v2 }
0x12ad   :  { %3765 = vmatpush3.msra.mxu0 %v4208_v7 }
0x12ae   :  { %3780 = vmatprep.subr.mxu0 %v4134_v2 }
0x1366   :  { %v943_v60 = vpop.f32.mrf.mxu0 }
0x1367   :  { %v944_v61 = vadd.f32 %v4251_v18, %v943_v60 }
0x1368   :  { %v3746_v62 = vpop.f32.mrf.mxu0 }
0x1369   :  { %v948_v63 = vrot.slane %v944_v61, 2  ;;  %v21_v61 = vld [vmem:[%s5410_s1 + $0x18] sm:$0xff] }
0x136b   :  { %957 = vrot.lane.b32.xlu0 %v948_v63, %s4136_s8  ;;  %v950_v0 = vadd.f32 %v948_v63, %v4244_v13 }
0x136d   :  { %v3393_v1 = vmul.f32 -1.442695, %v950_v0 }
0x136f   :  { %4022 = vpow2.f32 %v3393_v1  ;;  %v20_v1 = vld [vmem:[%s5410_s1 + $0x10] sm:$0xff] }
0x137c   :  { %v4023_v5 = vpop.eup %4022 }
0x137d   :  { %v954_v8 = vadd.f32 1.0, %v4023_v5  ;;  %v18_v5 = vld [vmem:[%s5410_s1] sm:$0xff] }
0x137f   :  { %4024 = vrcp.f32 %v954_v8 }
0x138c   :  { %v4025_v9 = vpop.eup %4024 }
0x138d   :  { %v967_v17 = vsub.f32 1.0, %v4025_v9  ;;  %v975_v21 = vmul.f32 %v4025_v9, %v973_v19 }
0x13dd   :  { %v958_v10 = vpop.permute.xlu0 %957 }
0x13de   :  { %v960_v11 = vmul.f32 %v4025_v9, %v958_v10 }
0x13e0   :  { %962 = vrot.lane.b32.xlu1 %v960_v11, %s4136_s8  ;;  %v4471_v11 = vld [vmem:[%s5410_s1 + $0x58] sm:$0xff] }
0x1452   :  { %v963_v12 = vpop.permute.xlu1 %962 }
0x1453   :  { %v965_v14 = vadd.f32 %v963_v12, %v4244_v13 }
0x1455   :  { %4026 = vtanh.f32 %v965_v14  ;;  %v4477_v14 = vld [vmem:[%s5410_s1 + $0x50] sm:$0xff] }
0x1462   :  { %v4027_v15 = vpop.eup %4026 }
0x1463   :  { %969 = vrot.lane.b32.xlu0 %v4027_v15, %s4137_s9 }
0x14d5   :  { %v970_v20 = vpop.permute.xlu0 %969 }
0x14d6   :  { %v972_v23 = vmul.f32 %v970_v20, %v967_v17  ;;  %v4494_v17 = vld [vmem:[%s5410_s1 + $0x40] sm:$0xff] }
0x14d8   :  { %v4408_v24 = vadd.f32 %v975_v21, %v972_v23  ;;  %v4525_v23 = vld [vmem:[%s5410_s1 + $0x65] ss:$0 sm:$0xff] }
0x14da   :  { %v978_v26 = vrot.slane %v4408_v24, 6 }
0x14dc   :  { %979 = vrot.lane.b32.xlu1 %v978_v26, %s4137_s9 }
0x154e   :  { %v980_v27 = vpop.permute.xlu1 %979 }
0x154f   :  { %3756 = vmatmul.mubr.msk.f32.vlgmr.msra.gmra.mxu1 %vm140_vm4, %v980_v27 }
0x1550   :  { %3770 = vmatpush3.msra.mxu1 %v4178_v3  ;;  %3777 = vmatprep.mubr.msk.f32.mxu1 %vm4135_vm1, %v4134_v2 }
0x1551   :  { %3771 = vmatprep.subr.mxu1 %v4134_v2 }
0x1552   :  { %3772 = vmatpush3.msra.mxu1 %v4186_v4 }
0x1553   :  { %3773 = vmatprep.subr.mxu1 %v4134_v2 }
0x1554   :  { %3774 = vmatpush3.msra.mxu1 %v4198_v6 }
0x1555   :  { %3775 = vmatprep.subr.mxu1 %v4134_v2 }
0x1556   :  { %3776 = vmatpush3.msra.mxu1 %v4208_v7 }
0x1557   :  { %3797 = vmatprep.subr.mxu1 %v4134_v2 }
0x160f   :  { %v1049_v13 = vpop.f32.mrf.mxu1 }
0x1610   :  { %v1050_v3 = vadd.f32 %v4251_v18, %v1049_v13 }
0x1611   :  { %v3757_v28 = vpop.f32.mrf.mxu1 }
0x1612   :  { %1061 = vrot.lane.b32.xlu0 %v1050_v3, %s4136_s8  ;;  %v1053_v29 = vadd.f32 %v1050_v3, %v4246_v16 }
0x1614   :  { %v3395_v30 = vmul.f32 -1.442695, %v1053_v29  ;;  %v4532_v29 = vld [vmem:[%s5410_s1 + $0x64] ss:$0 sm:$0xff] }
0x1616   :  { %4028 = vpow2.f32 %v3395_v30 }
0x1623   :  { %v4029_v4 = vpop.eup %4028 }
0x1624   :  { %v1057_v31 = vadd.f32 1.0, %v4029_v4 }
0x1626   :  { %4030 = vrcp.f32 %v1057_v31 }
0x1633   :  { %v4031_v6 = vpop.eup %4030 }
0x1634   :  { %v1071_v37 = vsub.f32 1.0, %v4031_v6  ;;  %v1078_v39 = vmul.f32 %v4031_v6, %v978_v26 }
0x1684   :  { %v1062_v32 = vpop.permute.xlu0 %1061 }
0x1685   :  { %v1064_v33 = vmul.f32 %v4031_v6, %v1062_v32 }
0x1687   :  { %1066 = vrot.lane.b32.xlu1 %v1064_v33, %s4136_s8 }
0x16f9   :  { %v1067_v7 = vpop.permute.xlu1 %1066 }
0x16fa   :  { %v1069_v35 = vadd.f32 %v1067_v7, %v4246_v16 }
0x16fc   :  { %4032 = vtanh.f32 %v1069_v35 }
0x1709   :  { %v4033_v36 = vpop.eup %4032 }
0x170a   :  { %1073 = vrot.lane.b32.xlu0 %v4033_v36, %s4137_s9 }
0x177c   :  { %v1074_v38 = vpop.permute.xlu0 %1073 }
0x177d   :  { %v1076_v40 = vmul.f32 %v1074_v38, %v1071_v37 }
0x177f   :  { %v1079_v41 = vadd.f32 %v1078_v39, %v1076_v40 }
0x1781   :  { %1081 = vrot.lane.b32.xlu1 %v1079_v41, %s4137_s9  ;;  %v1181_v59 = vrot.slane %v1079_v41, 6 }
0x17f3   :  { %v1082_v42 = vpop.permute.xlu1 %1081 }
0x17f4   :  { %1324 = vst.msk [vmem:[#allocation2 + $0x10] sm:$0x3] %vm1292_vm3, %v1082_v42  ;;  %3767 = vmatmul.mubr.msk.f32.vlgmr.msra.gmra.mxu0 %vm140_vm4, %v1082_v42 }
0x17f5   :  { %3788 = vmatprep.mubr.msk.f32.mxu0 %vm4135_vm1, %v4134_v2  ;;  %3781 = vmatpush3.msra.mxu0 %v21_v61 }
0x17f6   :  { %3782 = vmatprep.subr.mxu0 %v4134_v2 }
0x17f7   :  { %3783 = vmatpush3.msra.mxu0 %v20_v1 }
0x17f8   :  { %3784 = vmatprep.subr.mxu0 %v4134_v2 }
0x18b4   :  { %v1151_v43 = vpop.f32.mrf.mxu0 }
0x18b5   :  { %v1152_v44 = vadd.f32 %v4251_v18, %v1151_v43 }
0x18b6   :  { %v3768_v45 = vpop.f32.mrf.mxu0 }
0x18b7   :  { %v1156_v46 = vrot.slane %v1152_v44, 6 }
0x18b9   :  { %1165 = vrot.lane.b32.xlu0 %v1156_v46, %s4136_s8  ;;  %v1158_v48 = vadd.f32 %v1156_v46, %v4246_v16 }
0x18bb   :  { %v3397_v49 = vmul.f32 -1.442695, %v1158_v48 }
0x18bd   :  { %4034 = vpow2.f32 %v3397_v49 }
0x18ca   :  { %v4035_v22 = vpop.eup %4034 }
0x18cb   :  { %v1162_v50 = vadd.f32 1.0, %v4035_v22 }
0x18cd   :  { %4036 = vrcp.f32 %v1162_v50 }
0x18da   :  { %v4037_v51 = vpop.eup %4036 }
0x18db   :  { %v1175_v60 = vsub.f32 1.0, %v4037_v51  ;;  %v1183_v0 = vmul.f32 %v4037_v51, %v1181_v59 }
0x192b   :  { %v1166_v52 = vpop.permute.xlu0 %1165 }
0x192c   :  { %v1168_v53 = vmul.f32 %v4037_v51, %v1166_v52 }
0x192e   :  { %1170 = vrot.lane.b32.xlu1 %v1168_v53, %s4136_s8 }
0x19a0   :  { %v1171_v54 = vpop.permute.xlu1 %1170 }
0x19a1   :  { %v1173_v55 = vadd.f32 %v1171_v54, %v4246_v16 }
0x19a3   :  { %4038 = vtanh.f32 %v1173_v55 }
0x19b0   :  { %v4039_v57 = vpop.eup %4038 }
0x19b1   :  { %1177 = vrot.lane.b32.xlu0 %v4039_v57, %s4137_s9 }
0x19b5   :  { %1294 = vrot.lane.b32.xlu0 %v4280_v58, %s4137_s9  ;;  %v19_v58 = vld [vmem:[%s5410_s1 + $0x8] sm:$0xff] }
0x19b6   :  { %3785 = vmatpush3.msra.mxu0 %v19_v58 }
0x19b7   :  { %3786 = vmatprep.subr.mxu0 %v4134_v2 }
0x19b8   :  { %3787 = vmatpush3.msra.mxu0 %v18_v5 }
0x19b9   :  { %1304 = vrot.lane.b32.xlu0 %v4324_v47, %s4137_s9  ;;  %3819 = vmatprep.subr.mxu0 %v4134_v2 }
0x1a23   :  { %v1178_v62 = vpop.permute.xlu0 %1177 }
0x1a24   :  { %v1180_v63 = vmul.f32 %v1178_v62, %v1175_v60 }
0x1a26   :  { %v4454_v47 = vadd.f32 %v1183_v0, %v1180_v63 }
0x1a27   :  { %v1295_v8 = vpop.permute.xlu0 %1294 }
0x1a28   :  { %1298 = vst.msk [vmem:[#allocation2] sm:$0xc] %vm1297_vm5, %v1295_v8  ;;  %v1186_v9 = vrot.slane %v4454_v47, 2  ;;  %v1287_v57 = vrot.slane %v4454_v47, 6 }
0x1a2a   :  { %1187 = vrot.lane.b32.xlu1 %v1186_v9, %s4137_s9 }
0x1a2b   :  { %v1305_v10 = vpop.permute.xlu0 %1304 }
0x1a2c   :  { %1308 = vst.msk [vmem:[#allocation2] sm:$0xc0] %vm1307_vm6, %v1305_v10 }
0x1a2e   :  { %1299 = vrot.lane.b32.xlu1 %v4302_v25, %s4137_s9  ;;  %v4486_v25 = vld [vmem:[%s5410_s1 + $0x48] sm:$0xff]  ;;  %s4139_s1 = smov 32  }
0x1a9c   :  { %v1188_v12 = vpop.permute.xlu1 %1187 }
0x1a9d   :  { %3778 = vmatmul.mubr.msk.f32.vlgmr.msra.gmra.mxu1 %vm140_vm4, %v1188_v12 }
0x1a9e   :  { %3798 = vmatpush3.msra.mxu1 %v4471_v11  ;;  %3805 = vmatprep.mubr.msk.f32.mxu1 %vm4135_vm1, %v4134_v2 }
0x1a9f   :  { %3799 = vmatprep.subr.mxu1 %v4134_v2 }
0x1aa0   :  { %3800 = vmatpush3.msra.mxu1 %v4477_v14  ;;  %v1300_v15 = vpop.permute.xlu1 %1299 }
0x1aa1   :  { %3801 = vmatprep.subr.mxu1 %v4134_v2  ;;  %1303 = vst.msk [vmem:[#allocation2] sm:$0x30] %vm1302_vm7, %v1300_v15 }
0x1aa2   :  { %3802 = vmatpush3.msra.mxu1 %v4486_v25 }
0x1aa3   :  { %3803 = vmatprep.subr.mxu1 %v4134_v2 }
0x1aa4   :  { %3804 = vmatpush3.msra.mxu1 %v4494_v17 }
0x1aa5   :  { %3806 = vmatmul.mubr.f32.vlgmr.msra.gmra.mxu1 %v4134_v2  ;;  %3808 = vmatprep.subr.mxu1 %v4134_v2 }
0x1aa6   :  { %3809 = vmatpush3.msra.mxu1 %v4471_v11  ;;  %3816 = vmatprep.mubr.msk.f32.mxu1 %vm4135_vm1, %v4134_v2 }
0x1aa7   :  { %3810 = vmatprep.subr.mxu1 %v4134_v2 }
0x1aa8   :  { %v1334_v19 = vld [vmem:[#allocation2] sm:$0xff]  ;;  %3811 = vmatpush3.msra.mxu1 %v4477_v14 }
0x1aa9   :  { %3789 = vmatmul.mubr.msk.f32.vlgmr.msra.gmra.mxu0 %vm140_vm4, %v1334_v19  ;;  %3812 = vmatprep.subr.mxu1 %v4134_v2 }
0x1aaa   :  { %3813 = vmatpush3.msra.mxu1 %v4486_v25  ;;  %3791 = vmatprep.mubr.msk.f32.mxu0 %vm4135_vm1, %v4134_v2 }
0x1aab   :  { %3814 = vmatprep.subr.mxu1 %v4134_v2  ;;  %3820 = vmatpush3.msra.mxu0 %v4471_v11 }
0x1aac   :  { %3815 = vmatpush3.msra.mxu1 %v4494_v17  ;;  %3821 = vmatprep.subr.mxu0 %v4134_v2 }
0x1aad   :  { %3822 = vmatpush3.msra.mxu0 %v4477_v14  ;;  %3830 = vmatprep.subr.mxu1 %v4134_v2 }
0x1aae   :  { %3823 = vmatprep.subr.mxu0 %v4134_v2 }
0x1aaf   :  { %3824 = vmatpush3.msra.mxu0 %v4486_v25 }
0x1ab0   :  { %3825 = vmatprep.subr.mxu0 %v4134_v2 }
0x1ab1   :  { %3826 = vmatpush3.msra.mxu0 %v4494_v17 }
0x1ab2   :  { %3841 = vmatprep.subr.mxu0 %v4134_v2 }
0x1b5d   :  { %v1257_v20 = vpop.f32.mrf.mxu1 }
0x1b5e   :  { %v1258_v38 = vadd.f32 %v4251_v18, %v1257_v20 }
0x1b5f   :  { %v3779_v21 = vpop.f32.mrf.mxu1 }
0x1b60   :  { %v1262_v40 = vrot.slane %v1258_v38, 4 }
0x1b62   :  { %v1264_v41 = vadd.f32 %v1262_v40, %v4246_v16 }
0x1b64   :  { %v3399_v42 = vmul.f32 -1.442695, %v1264_v41 }
0x1b65   :  { %v1500_v26 = vpop.f32.mrf.mxu1 }
0x1b66   :  { %v1501_v27 = vadd.f32 %v4525_v23, %v1500_v26 }
0x1b67   :  { %v3807_v13 = vpop.f32.mrf.mxu1 }
0x1b68   :  { %1512 = vrot.lane.b32.xlu1 %v1501_v27, %s4136_s8 }
0x1b69   :  { %v1416_v3 = vpop.f32.mrf.mxu0 }
0x1b6a   :  { %v4535_v30 = vadd.f32 %v4532_v29, %v1416_v3 }
0x1b6b   :  { %v3790_v28 = vpop.f32.mrf.mxu0 }
0x1b6c   :  { %v1504_v4 = vadd.f32 %v1501_v27, %v4535_v30 }
0x1b6e   :  { %v3405_v31 = vmul.f32 -1.442695, %v1504_v4 }
0x1b70   :  { %4040 = vpow2.f32 %v3405_v31 }
0x1b7d   :  { %v4041_v6 = vpop.eup %4040 }
0x1b7e   :  { %v1508_v32 = vadd.f32 1.0, %v4041_v6 }
0x1b80   :  { %4042 = vrcp.f32 %v1508_v32 }
0x1b8d   :  { %v4043_v33 = vpop.eup %4042 }
0x1b8e   :  { %v1522_v45 = vsub.f32 1.0, %v4043_v33  ;;  %v1528_v48 = vmul.f32 0.0, %v4043_v33 }
0x1bda   :  { %v1513_v7 = vpop.permute.xlu1 %1512 }
0x1bdb   :  { %v1515_v35 = vmul.f32 %v4043_v33, %v1513_v7 }
0x1bdd   :  { %1517 = vrot.lane.b32.xlu0 %v1515_v35, %s4136_s8 }
0x1c4f   :  { %v1518_v36 = vpop.permute.xlu0 %1517 }
0x1c50   :  { %v1520_v37 = vadd.f32 %v1518_v36, %v4535_v30 }
0x1c52   :  { %4044 = vtanh.f32 %v1520_v37 }
0x1c53   :  { %4046 = vpow2.f32 %v3399_v42 }
0x1c5f   :  { %v4045_v39 = vpop.eup %4044 }
0x1c60   :  { %1524 = vrot.lane.b32.xlu1 %v4045_v39, %s4137_s9  ;;  %v4047_v43 = vpop.eup %4046 }
0x1c61   :  { %v1268_v44 = vadd.f32 1.0, %v4047_v43 }
0x1c63   :  { %4048 = vrcp.f32 %v1268_v44 }
0x1c64   :  { %1271 = vrot.lane.b32.xlu1 %v1262_v40, %s4136_s8 }
0x1c70   :  { %v4049_v18 = vpop.eup %4048 }
0x1c71   :  { %v1289_v60 = vmul.f32 %v4049_v18, %v1287_v57 }
0x1cd2   :  { %v1525_v46 = vpop.permute.xlu1 %1524 }
0x1cd3   :  { %v1527_v49 = vmul.f32 %v1525_v46, %v1522_v45 }
0x1cd5   :  { %v4544_v22 = vadd.f32 %v1528_v48, %v1527_v49 }
0x1cd6   :  { %v1272_v50 = vpop.permute.xlu1 %1271 }
0x1cd7   :  { %v1274_v51 = vmul.f32 %v4049_v18, %v1272_v50  ;;  %1531 = vrot.lane.b32.xlu0 %v4544_v22, %s4137_s9  ;;  %v1631_v3 = vrot.slane %v4544_v22, 6 }
0x1cd9   :  { %1276 = vrot.lane.b32.xlu1 %v1274_v51, %s4136_s8 }
0x1d49   :  { %v1532_v52 = vpop.permute.xlu0 %1531 }
0x1d4a   :  { %3817 = vmatmul.mubr.msk.f32.vlgmr.msra.gmra.mxu1 %vm140_vm4, %v1532_v52 }
0x1d4b   :  { %v1277_v53 = vpop.permute.xlu1 %1276  ;;  %3831 = vmatpush3.msra.mxu1 %v4471_v11  ;;  %3838 = vmatprep.mubr.msk.f32.mxu1 %vm4135_vm1, %v4134_v2 }
0x1d4c   :  { %v1279_v54 = vadd.f32 %v1277_v53, %v4246_v16  ;;  %3832 = vmatprep.subr.mxu1 %v4134_v2  ;;  %v1281_v16 = vsub.f32 1.0, %v4049_v18 }
0x1d4d   :  { %3833 = vmatpush3.msra.mxu1 %v4477_v14 }
0x1d4e   :  { %4050 = vtanh.f32 %v1279_v54  ;;  %3834 = vmatprep.subr.mxu1 %v4134_v2 }
0x1d4f   :  { %3835 = vmatpush3.msra.mxu1 %v4486_v25 }
0x1d50   :  { %3836 = vmatprep.subr.mxu1 %v4134_v2 }
0x1d51   :  { %3837 = vmatpush3.msra.mxu1 %v4494_v17 }
0x1d52   :  { %3852 = vmatprep.subr.mxu1 %v4134_v2 }
0x1d5b   :  { %v4051_v55 = vpop.eup %4050 }
0x1d5c   :  { %1283 = vrot.lane.b32.xlu1 %v4051_v55, %s4137_s9 }
0x1d60   :  { %1311 = vrot.lane.b32.xlu1 %v4364_v34, %s4137_s9 }
0x1d64   :  { %1319 = vrot.lane.b32.xlu1 %v4408_v24, %s4137_s9 }
0x1dce   :  { %v1284_v59 = vpop.permute.xlu1 %1283 }
0x1dcf   :  { %v1286_v61 = vmul.f32 %v1284_v59, %v1281_v16 }
0x1dd1   :  { %v1290_v62 = vadd.f32 %v1289_v60, %v1286_v61 }
0x1dd2   :  { %v1312_v63 = vpop.permute.xlu1 %1311 }
0x1dd3   :  { %1314 = vst.msk [vmem:[#allocation2 + $0x8] sm:$0xc] %vm1297_vm5, %v1312_v63  ;;  %1330 = vrot.lane.b32.xlu1 %v1290_v62, %s4137_s9 }
0x1dd6   :  { %v1320_v0 = vpop.permute.xlu1 %1319 }
0x1dd7   :  { %1322 = vst.msk [vmem:[#allocation2 + $0x8] sm:$0xc0] %vm1307_vm6, %v1320_v0 }
0x1e0a   :  { %v1601_v1 = vpop.f32.mrf.mxu1 }
0x1e0b   :  { %v1602_v34 = vadd.f32 %v4525_v23, %v1601_v1 }
0x1e0c   :  { %v3818_v58 = vpop.f32.mrf.mxu1 }
0x1e0d   :  { %v1606_v24 = vrot.slane %v1602_v34, 6 }
0x1e0f   :  { %1615 = vrot.lane.b32.xlu0 %v1606_v24, %s4136_s8  ;;  %v1608_v8 = vadd.f32 %v1606_v24, %v4535_v30 }
0x1e11   :  { %v3407_v9 = vmul.f32 -1.442695, %v1608_v8 }
0x1e13   :  { %4052 = vpow2.f32 %v3407_v9 }
0x1e20   :  { %v4053_v10 = vpop.eup %4052 }
0x1e21   :  { %v1612_v12 = vadd.f32 1.0, %v4053_v10 }
0x1e23   :  { %4054 = vrcp.f32 %v1612_v12 }
0x1e30   :  { %v4055_v15 = vpop.eup %4054 }
0x1e31   :  { %v1625_v13 = vsub.f32 1.0, %v4055_v15  ;;  %v1633_v31 = vmul.f32 %v4055_v15, %v1631_v3 }
0x1e45   :  { %v1331_v5 = vpop.permute.xlu1 %1330 }
0x1e46   :  { %1333 = vst.msk [vmem:[#allocation2 + $0x10] sm:$0x30] %vm1302_vm7, %v1331_v5 }
0x1e81   :  { %v1616_v19 = vpop.permute.xlu0 %1615 }
0x1e82   :  { %v1618_v20 = vmul.f32 %v4055_v15, %v1616_v19 }
0x1e84   :  { %1620 = vrot.lane.b32.xlu0 %v1618_v20, %s4136_s8 }
0x1ef6   :  { %v1621_v21 = vpop.permute.xlu0 %1620 }
0x1ef7   :  { %v1623_v26 = vadd.f32 %v1621_v21, %v4535_v30 }
0x1ef9   :  { %4056 = vtanh.f32 %v1623_v26 }
0x1f06   :  { %v4057_v27 = vpop.eup %4056 }
0x1f07   :  { %1627 = vrot.lane.b32.xlu0 %v4057_v27, %s4137_s9 }
0x1f0b   :  { %1315 = vrot.lane.b32.xlu0 %v4386_v56, %s4137_s9 }
0x1f0f   :  { %1325 = vrot.lane.b32.xlu0 %v4454_v47, %s4137_s9 }
0x1f79   :  { %v1628_v28 = vpop.permute.xlu0 %1627 }
0x1f7a   :  { %v1630_v4 = vmul.f32 %v1628_v28, %v1625_v13 }
0x1f7c   :  { %v4582_v6 = vadd.f32 %v1633_v31, %v1630_v4 }
0x1f7d   :  { %v1316_v32 = vpop.permute.xlu0 %1315 }
0x1f7e   :  { %1318 = vst.msk [vmem:[#allocation2 + $0x8] sm:$0x30] %vm1302_vm7, %v1316_v32  ;;  %v1636_v33 = vrot.slane %v4582_v6, 2  ;;  %v1737_v55 = vrot.slane %v4582_v6, 6 }
0x1f80   :  { %1637 = vrot.lane.b32.xlu0 %v1636_v33, %s4137_s9 }
0x1f81   :  { %v1326_v7 = vpop.permute.xlu0 %1325 }
0x1f82   :  { %1328 = vst.msk [vmem:[#allocation2 + $0x10] sm:$0xc] %vm1297_vm5, %v1326_v7 }
0x1f85   :  { %v1335_v56 = vld [vmem:[#allocation2 + $0x8] sm:$0xff] }
0x1f86   :  { %3792 = vmatmul.mubr.msk.f32.gmra.mxu0 %vm140_vm4, %v1335_v56 }
0x1f87   :  { %3794 = vmatprep.mubr.msk.f32.mxu0 %vm4135_vm1, %v4134_v2 }
0x1f89   :  { %v1336_v47 = vld [vmem:[#allocation2 + $0x10] sm:$0x3f] }
0x1f8a   :  { %3795 = vmatmul.mubr.msk.f32.gmra.mxu0 %vm140_vm4, %v1336_v47 }
0x1f8b   :  { %3827 = vmatprep.mubr.msk.f32.mxu0 %vm4135_vm1, %v4134_v2 }
0x1ff2   :  { %v1638_v35 = vpop.permute.xlu0 %1637 }
0x1ff3   :  { %3828 = vmatmul.mubr.msk.f32.vlgmr.msra.gmra.mxu0 %vm140_vm4, %v1638_v35 }
0x1ff4   :  { %3842 = vmatpush3.msra.mxu0 %v4471_v11  ;;  %3849 = vmatprep.mubr.msk.f32.mxu0 %vm4135_vm1, %v4134_v2 }
0x1ff5   :  { %3843 = vmatprep.subr.mxu0 %v4134_v2 }
0x1ff6   :  { %3844 = vmatpush3.msra.mxu0 %v4477_v14 }
0x1ff7   :  { %3845 = vmatprep.subr.mxu0 %v4134_v2 }
0x1ff8   :  { %3846 = vmatpush3.msra.mxu0 %v4486_v25 }
0x1ff9   :  { %3847 = vmatprep.subr.mxu0 %v4134_v2 }
0x1ffa   :  { %3848 = vmatpush3.msra.mxu0 %v4494_v17 }
0x1ffb   :  { %3863 = vmatprep.subr.mxu0 %v4134_v2 }
0x2046   :  { %v4605_v36 = vpop.f32.mrf.mxu0 }
0x2047   :  { %v4657_v7 = vadd.f32 %v4532_v29, %v4605_v36 }
0x2048   :  { %v3793_v37 = vpop.f32.mrf.mxu0 }
0x204a   :  { %v4607_v38 = vpop.f32.mrf.mxu0 }
0x204c   :  { %v3796_v39 = vpop.f32.mrf.mxu0 }
0x20b3   :  { %v1707_v40 = vpop.f32.mrf.mxu0 }
0x20b4   :  { %v1708_v41 = vadd.f32 %v4525_v23, %v1707_v40 }
0x20b5   :  { %v3829_v42 = vpop.f32.mrf.mxu0 }
0x20b6   :  { %v1712_v43 = vrot.slane %v1708_v41, 4 }
0x20b8   :  { %1721 = vrot.lane.b32.xlu1 %v1712_v43, %s4136_s8  ;;  %v1714_v44 = vadd.f32 %v1712_v43, %v4535_v30 }
0x20ba   :  { %v3409_v45 = vmul.f32 -1.442695, %v1714_v44 }
0x20bc   :  { %4058 = vpow2.f32 %v3409_v45 }
0x20c9   :  { %v4059_v46 = vpop.eup %4058 }
0x20ca   :  { %v1718_v48 = vadd.f32 1.0, %v4059_v46 }
0x20cc   :  { %4060 = vrcp.f32 %v1718_v48 }
0x20d9   :  { %v4061_v49 = vpop.eup %4060 }
0x20da   :  { %v1731_v54 = vsub.f32 1.0, %v4061_v49  ;;  %v1739_v57 = vmul.f32 %v4061_v49, %v1737_v55 }
0x212a   :  { %v1722_v18 = vpop.permute.xlu1 %1721 }
0x212b   :  { %v1724_v50 = vmul.f32 %v4061_v49, %v1722_v18 }
0x212d   :  { %1726 = vrot.lane.b32.xlu0 %v1724_v50, %s4136_s8 }
0x219f   :  { %v1727_v51 = vpop.permute.xlu0 %1726 }
0x21a0   :  { %v1729_v52 = vadd.f32 %v1727_v51, %v4535_v30 }
0x21a2   :  { %4062 = vtanh.f32 %v1729_v52 }
0x21af   :  { %v4063_v53 = vpop.eup %4062 }
0x21b0   :  { %1733 = vrot.lane.b32.xlu1 %v4063_v53, %s4137_s9 }
0x2222   :  { %v1734_v16 = vpop.permute.xlu1 %1733 }
0x2223   :  { %v1736_v59 = vmul.f32 %v1734_v16, %v1731_v54 }
0x2225   :  { %v4616_v60 = vadd.f32 %v1739_v57, %v1736_v59 }
0x2227   :  { %v1742_v61 = vrot.slane %v4616_v60, 4  ;;  %v1843_v26 = vrot.slane %v4616_v60, 6 }
0x2229   :  { %1743 = vrot.lane.b32.xlu0 %v1742_v61, %s4137_s9 }
0x229b   :  { %v1744_v62 = vpop.permute.xlu0 %1743 }
0x229c   :  { %3839 = vmatmul.mubr.msk.f32.vlgmr.msra.gmra.mxu1 %vm140_vm4, %v1744_v62 }
0x229d   :  { %3853 = vmatpush3.msra.mxu1 %v4471_v11  ;;  %3860 = vmatprep.mubr.msk.f32.mxu1 %vm4135_vm1, %v4134_v2 }
0x229e   :  { %3854 = vmatprep.subr.mxu1 %v4134_v2 }
0x229f   :  { %3855 = vmatpush3.msra.mxu1 %v4477_v14 }
0x22a0   :  { %3856 = vmatprep.subr.mxu1 %v4134_v2 }
0x22a1   :  { %3857 = vmatpush3.msra.mxu1 %v4486_v25 }
0x22a2   :  { %3858 = vmatprep.subr.mxu1 %v4134_v2 }
0x22a3   :  { %3859 = vmatpush3.msra.mxu1 %v4494_v17 }
0x22a4   :  { %3874 = vmatprep.subr.mxu1 %v4134_v2 }
0x235c   :  { %v1813_v63 = vpop.f32.mrf.mxu1 }
0x235d   :  { %v1814_v0 = vadd.f32 %v4525_v23, %v1813_v63 }
0x235e   :  { %v3840_v1 = vpop.f32.mrf.mxu1 }
0x235f   :  { %v1818_v34 = vrot.slane %v1814_v0, 2 }
0x2361   :  { %1827 = vrot.lane.b32.xlu1 %v1818_v34, %s4136_s8  ;;  %v1820_v58 = vadd.f32 %v1818_v34, %v4535_v30 }
0x2363   :  { %v3411_v24 = vmul.f32 -1.442695, %v1820_v58 }
0x2365   :  { %4064 = vpow2.f32 %v3411_v24 }
0x2372   :  { %v4065_v5 = vpop.eup %4064 }
0x2373   :  { %v1824_v8 = vadd.f32 1.0, %v4065_v5 }
0x2375   :  { %4066 = vrcp.f32 %v1824_v8 }
0x2382   :  { %v4067_v9 = vpop.eup %4066 }
0x2383   :  { %v1837_v21 = vsub.f32 1.0, %v4067_v9  ;;  %v1845_v13 = vmul.f32 %v4067_v9, %v1843_v26 }
0x23d3   :  { %v1828_v10 = vpop.permute.xlu1 %1827 }
0x23d4   :  { %v1830_v12 = vmul.f32 %v4067_v9, %v1828_v10 }
0x23d6   :  { %1832 = vrot.lane.b32.xlu0 %v1830_v12, %s4136_s8 }
0x2448   :  { %v1833_v15 = vpop.permute.xlu0 %1832 }
0x2449   :  { %v1835_v19 = vadd.f32 %v1833_v15, %v4535_v30 }
0x244b   :  { %4068 = vtanh.f32 %v1835_v19 }
0x2458   :  { %v4069_v20 = vpop.eup %4068 }
0x2459   :  { %1839 = vrot.lane.b32.xlu1 %v4069_v20, %s4137_s9 }
0x24cb   :  { %v1840_v27 = vpop.permute.xlu1 %1839 }
0x24cc   :  { %v1842_v3 = vmul.f32 %v1840_v27, %v1837_v21 }
0x24ce   :  { %v4638_v28 = vadd.f32 %v1845_v13, %v1842_v3 }
0x24d0   :  { %v1848_v4 = vrot.slane %v4638_v28, 6 }
0x24d2   :  { %1849 = vrot.lane.b32.xlu0 %v1848_v4, %s4137_s9 }
0x2544   :  { %v1850_v31 = vpop.permute.xlu0 %1849 }
0x2545   :  { %3850 = vmatmul.mubr.msk.f32.vlgmr.msra.gmra.mxu0 %vm140_vm4, %v1850_v31 }
0x2546   :  { %3864 = vmatpush3.msra.mxu0 %v4471_v11  ;;  %3871 = vmatprep.mubr.msk.f32.mxu0 %vm4135_vm1, %v4134_v2 }
0x2547   :  { %3865 = vmatprep.subr.mxu0 %v4134_v2 }
0x2548   :  { %3866 = vmatpush3.msra.mxu0 %v4477_v14 }
0x2549   :  { %3867 = vmatprep.subr.mxu0 %v4134_v2 }
0x254a   :  { %3868 = vmatpush3.msra.mxu0 %v4486_v25 }
0x254b   :  { %3869 = vmatprep.subr.mxu0 %v4134_v2 }
0x254c   :  { %3870 = vmatpush3.msra.mxu0 %v4494_v17 }
0x254d   :  { %3885 = vmatprep.subr.mxu0 %v4134_v2 }
0x2605   :  { %v1919_v30 = vpop.f32.mrf.mxu0 }
0x2606   :  { %v1920_v32 = vadd.f32 %v4525_v23, %v1919_v30 }
0x2607   :  { %v3851_v33 = vpop.f32.mrf.mxu0 }
0x2608   :  { %1931 = vrot.lane.b32.xlu1 %v1920_v32, %s4136_s8  ;;  %v1923_v56 = vadd.f32 %v1920_v32, %v4657_v7 }
0x260a   :  { %v3413_v47 = vmul.f32 -1.442695, %v1923_v56 }
0x260c   :  { %4070 = vpow2.f32 %v3413_v47 }
0x2619   :  { %v4071_v35 = vpop.eup %4070 }
0x261a   :  { %v1927_v37 = vadd.f32 1.0, %v4071_v35 }
0x261c   :  { %4072 = vrcp.f32 %v1927_v37 }
0x2629   :  { %v4073_v39 = vpop.eup %4072 }
0x262a   :  { %v1941_v36 = vsub.f32 1.0, %v4073_v39  ;;  %v1948_v46 = vmul.f32 %v4073_v39, %v1848_v4 }
0x267a   :  { %v1932_v40 = vpop.permute.xlu1 %1931 }
0x267b   :  { %v1934_v41 = vmul.f32 %v4073_v39, %v1932_v40 }
0x267d   :  { %1936 = vrot.lane.b32.xlu0 %v1934_v41, %s4136_s8 }
0x26ef   :  { %v1937_v42 = vpop.permute.xlu0 %1936 }
0x26f0   :  { %v1939_v43 = vadd.f32 %v1937_v42, %v4657_v7 }
0x26f2   :  { %4074 = vtanh.f32 %v1939_v43 }
0x26ff   :  { %v4075_v44 = vpop.eup %4074 }
0x2700   :  { %1943 = vrot.lane.b32.xlu1 %v4075_v44, %s4137_s9 }
0x2772   :  { %v1944_v45 = vpop.permute.xlu1 %1943 }
0x2773   :  { %v1946_v48 = vmul.f32 %v1944_v45, %v1941_v36 }
0x2775   :  { %v4663_v49 = vadd.f32 %v1948_v46, %v1946_v48 }
0x2777   :  { %1951 = vrot.lane.b32.xlu0 %v4663_v49, %s4137_s9  ;;  %v2051_v58 = vrot.slane %v4663_v49, 6 }
0x27e9   :  { %v1952_v18 = vpop.permute.xlu0 %1951 }
0x27ea   :  { %3861 = vmatmul.mubr.msk.f32.vlgmr.msra.gmra.mxu1 %vm140_vm4, %v1952_v18 }
0x27eb   :  { %3875 = vmatpush3.msra.mxu1 %v4471_v11  ;;  %3882 = vmatprep.mubr.msk.f32.mxu1 %vm4135_vm1, %v4134_v2 }
0x27ec   :  { %3876 = vmatprep.subr.mxu1 %v4134_v2 }
0x27ed   :  { %3877 = vmatpush3.msra.mxu1 %v4477_v14 }
0x27ee   :  { %3878 = vmatprep.subr.mxu1 %v4134_v2 }
0x27ef   :  { %3879 = vmatpush3.msra.mxu1 %v4486_v25 }
0x27f0   :  { %3880 = vmatprep.subr.mxu1 %v4134_v2 }
0x27f1   :  { %3881 = vmatpush3.msra.mxu1 %v4494_v17 }
0x27f2   :  { %3896 = vmatprep.subr.mxu1 %v4134_v2 }
0x28aa   :  { %v2021_v50 = vpop.f32.mrf.mxu1 }
0x28ab   :  { %v2022_v51 = vadd.f32 %v4525_v23, %v2021_v50 }
0x28ac   :  { %v3862_v52 = vpop.f32.mrf.mxu1 }
0x28ad   :  { %v2026_v53 = vrot.slane %v2022_v51, 6 }
0x28af   :  { %2035 = vrot.lane.b32.xlu1 %v2026_v53, %s4136_s8  ;;  %v2028_v54 = vadd.f32 %v2026_v53, %v4657_v7 }
0x28b1   :  { %v3415_v55 = vmul.f32 -1.442695, %v2028_v54 }
0x28b3   :  { %4076 = vpow2.f32 %v3415_v55 }
0x28c0   :  { %v4077_v16 = vpop.eup %4076 }
0x28c1   :  { %v2032_v57 = vadd.f32 1.0, %v4077_v16 }
0x28c3   :  { %4078 = vrcp.f32 %v2032_v57 }
0x28d0   :  { %v4079_v59 = vpop.eup %4078 }
0x28d1   :  { %v2045_v34 = vsub.f32 1.0, %v4079_v59  ;;  %v2053_v8 = vmul.f32 %v4079_v59, %v2051_v58 }
0x2921   :  { %v2036_v61 = vpop.permute.xlu1 %2035 }
0x2922   :  { %v2038_v62 = vmul.f32 %v4079_v59, %v2036_v61 }
0x2924   :  { %2040 = vrot.lane.b32.xlu0 %v2038_v62, %s4136_s8 }
0x2996   :  { %v2041_v63 = vpop.permute.xlu0 %2040 }
0x2997   :  { %v2043_v0 = vadd.f32 %v2041_v63, %v4657_v7 }
0x2999   :  { %4080 = vtanh.f32 %v2043_v0 }
0x29a6   :  { %v4081_v1 = vpop.eup %4080 }
0x29a7   :  { %2047 = vrot.lane.b32.xlu1 %v4081_v1, %s4137_s9 }
0x2a19   :  { %v2048_v24 = vpop.permute.xlu1 %2047 }
0x2a1a   :  { %v2050_v5 = vmul.f32 %v2048_v24, %v2045_v34 }
0x2a1c   :  { %v4685_v9 = vadd.f32 %v2053_v8, %v2050_v5 }
0x2a1e   :  { %v2056_v10 = vrot.slane %v4685_v9, 2  ;;  %v2157_v35 = vrot.slane %v4685_v9, 6 }
0x2a20   :  { %2057 = vrot.lane.b32.xlu0 %v2056_v10, %s4137_s9 }
0x2a92   :  { %v2058_v12 = vpop.permute.xlu0 %2057 }
0x2a93   :  { %3872 = vmatmul.mubr.msk.f32.vlgmr.msra.gmra.mxu0 %vm140_vm4, %v2058_v12 }
0x2a94   :  { %3886 = vmatpush3.msra.mxu0 %v4471_v11  ;;  %3893 = vmatprep.mubr.msk.f32.mxu0 %vm4135_vm1, %v4134_v2 }
0x2a95   :  { %3887 = vmatprep.subr.mxu0 %v4134_v2 }
0x2a96   :  { %3888 = vmatpush3.msra.mxu0 %v4477_v14 }
0x2a97   :  { %3889 = vmatprep.subr.mxu0 %v4134_v2 }
0x2a98   :  { %3890 = vmatpush3.msra.mxu0 %v4486_v25 }
0x2a99   :  { %3891 = vmatprep.subr.mxu0 %v4134_v2 }
0x2a9a   :  { %3892 = vmatpush3.msra.mxu0 %v4494_v17 }
0x2a9b   :  { %3907 = vmatprep.subr.mxu0 %v4134_v2 }
0x2b53   :  { %v2127_v15 = vpop.f32.mrf.mxu0 }
0x2b54   :  { %v2128_v19 = vadd.f32 %v4525_v23, %v2127_v15 }
0x2b55   :  { %v3873_v20 = vpop.f32.mrf.mxu0 }
0x2b56   :  { %v2132_v21 = vrot.slane %v2128_v19, 4 }
0x2b58   :  { %2141 = vrot.lane.b32.xlu1 %v2132_v21, %s4136_s8  ;;  %v2134_v26 = vadd.f32 %v2132_v21, %v4657_v7 }
0x2b5a   :  { %v3417_v27 = vmul.f32 -1.442695, %v2134_v26 }
0x2b5c   :  { %4082 = vpow2.f32 %v3417_v27 }
0x2b69   :  { %v4083_v13 = vpop.eup %4082 }
0x2b6a   :  { %v2138_v3 = vadd.f32 1.0, %v4083_v13 }
0x2b6c   :  { %4084 = vrcp.f32 %v2138_v3 }
0x2b79   :  { %v4085_v4 = vpop.eup %4084 }
0x2b7a   :  { %v2151_v47 = vsub.f32 1.0, %v4085_v4  ;;  %v2159_v39 = vmul.f32 %v4085_v4, %v2157_v35 }
0x2bca   :  { %v2142_v31 = vpop.permute.xlu1 %2141 }
0x2bcb   :  { %v2144_v30 = vmul.f32 %v4085_v4, %v2142_v31 }
0x2bcd   :  { %2146 = vrot.lane.b32.xlu0 %v2144_v30, %s4136_s8 }
0x2c3f   :  { %v2147_v32 = vpop.permute.xlu0 %2146 }
0x2c40   :  { %v2149_v33 = vadd.f32 %v2147_v32, %v4657_v7 }
0x2c42   :  { %4086 = vtanh.f32 %v2149_v33 }
0x2c4f   :  { %v4087_v56 = vpop.eup %4086 }
0x2c50   :  { %2153 = vrot.lane.b32.xlu1 %v4087_v56, %s4137_s9 }
0x2cc2   :  { %v2154_v37 = vpop.permute.xlu1 %2153 }
0x2cc3   :  { %v2156_v40 = vmul.f32 %v2154_v37, %v2151_v47 }
0x2cc5   :  { %v4707_v41 = vadd.f32 %v2159_v39, %v2156_v40 }
0x2cc7   :  { %v2162_v42 = vrot.slane %v4707_v41, 4  ;;  %v2263_v61 = vrot.slane %v4707_v41, 6 }
0x2cc9   :  { %2163 = vrot.lane.b32.xlu0 %v2162_v42, %s4137_s9 }
0x2d3b   :  { %v2164_v43 = vpop.permute.xlu0 %2163 }
0x2d3c   :  { %3883 = vmatmul.mubr.msk.f32.vlgmr.msra.gmra.mxu1 %vm140_vm4, %v2164_v43 }
0x2d3d   :  { %3897 = vmatpush3.msra.mxu1 %v4471_v11  ;;  %3904 = vmatprep.mubr.msk.f32.mxu1 %vm4135_vm1, %v4134_v2 }
0x2d3e   :  { %3898 = vmatprep.subr.mxu1 %v4134_v2 }
0x2d3f   :  { %3899 = vmatpush3.msra.mxu1 %v4477_v14 }
0x2d40   :  { %3900 = vmatprep.subr.mxu1 %v4134_v2 }
0x2d41   :  { %3901 = vmatpush3.msra.mxu1 %v4486_v25 }
0x2d42   :  { %3902 = vmatprep.subr.mxu1 %v4134_v2 }
0x2d43   :  { %3903 = vmatpush3.msra.mxu1 %v4494_v17 }
0x2dfc   :  { %v2233_v44 = vpop.f32.mrf.mxu1 }
0x2dfd   :  { %v2234_v36 = vadd.f32 %v4525_v23, %v2233_v44 }
0x2dfe   :  { %v3884_v45 = vpop.f32.mrf.mxu1 }
0x2dff   :  { %v2238_v46 = vrot.slane %v2234_v36, 2 }
0x2e01   :  { %2247 = vrot.lane.b32.xlu1 %v2238_v46, %s4136_s8  ;;  %v2240_v48 = vadd.f32 %v2238_v46, %v4657_v7 }
0x2e03   :  { %v3419_v18 = vmul.f32 -1.442695, %v2240_v48 }
0x2e05   :  { %4088 = vpow2.f32 %v3419_v18 }
0x2e12   :  { %v4089_v50 = vpop.eup %4088 }
0x2e13   :  { %v2244_v51 = vadd.f32 1.0, %v4089_v50 }
0x2e15   :  { %4090 = vrcp.f32 %v2244_v51 }
0x2e22   :  { %v4091_v52 = vpop.eup %4090 }
0x2e23   :  { %v2257_v59 = vsub.f32 1.0, %v4091_v52  ;;  %v2265_v63 = vmul.f32 %v4091_v52, %v2263_v61 }
0x2e73   :  { %v2248_v53 = vpop.permute.xlu1 %2247 }
0x2e74   :  { %v2250_v54 = vmul.f32 %v4091_v52, %v2248_v53 }
0x2e76   :  { %2252 = vrot.lane.b32.xlu0 %v2250_v54, %s4136_s8 }
0x2ee8   :  { %v2253_v55 = vpop.permute.xlu0 %2252 }
0x2ee9   :  { %v2255_v16 = vadd.f32 %v2253_v55, %v4657_v7 }
0x2eeb   :  { %4092 = vtanh.f32 %v2255_v16 }
0x2ef8   :  { %v4093_v57 = vpop.eup %4092 }
0x2ef9   :  { %2259 = vrot.lane.b32.xlu1 %v4093_v57, %s4137_s9 }
0x2f6b   :  { %v2260_v62 = vpop.permute.xlu1 %2259 }
0x2f6c   :  { %v2262_v0 = vmul.f32 %v2260_v62, %v2257_v59 }
0x2f6e   :  { %v4728_v1 = vadd.f32 %v2265_v63, %v2262_v0  ;;  %v4138_v63 = vmov 1983009808  }
0x2f6f   :  { %v2582_v0 = vunpack.c.l.s4 %v4138_v63  ;;  %v2828_v63 = vld [vmem:[%s5411_s2 + $0x3b0] sm:$0xff] }
0x2f70   :  { %v2268_v34 = vrot.slane %v4728_v1, 6 }
0x2f72   :  { %2269 = vrot.lane.b32.xlu0 %v2268_v34, %s4137_s9 }
0x2fe4   :  { %v2270_v58 = vpop.permute.xlu0 %2269 }
0x2fe5   :  { %3894 = vmatmul.mubr.msk.f32.vlgmr.msra.gmra.mxu0 %vm140_vm4, %v2270_v58  ;;  %v2583_v58 = vunpack.c.0.s8 %v2582_v0  ;;  %v2723_v0 = vld [vmem:[%s5411_s2 + $0x68] sm:$0xff] }
0x2fe6   :  { %3908 = vmatpush3.msra.mxu0 %v4471_v11  ;;  %3915 = vmatprep.mubr.msk.f32.mxu0 %vm4135_vm1, %v4134_v2  ;;  %v4746_v11 = vadd.f32 %v4532_v29, %v4607_v38 }
0x2fe7   :  { %3909 = vmatprep.subr.mxu0 %v4134_v2 }
0x2fe8   :  { %3910 = vmatpush3.msra.mxu0 %v4477_v14 }
0x2fe9   :  { %3911 = vmatprep.subr.mxu0 %v4134_v2 }
0x2fea   :  { %3912 = vmatpush3.msra.mxu0 %v4486_v25 }
0x2feb   :  { %3913 = vmatprep.subr.mxu0 %v4134_v2 }
0x2fec   :  { %3914 = vmatpush3.msra.mxu0 %v4494_v17 }
0x30a5   :  { %v2339_v7 = vpop.f32.mrf.mxu0 }
0x30a6   :  { %v2340_v24 = vadd.f32 %v4525_v23, %v2339_v7 }
0x30a7   :  { %v3895_v5 = vpop.f32.mrf.mxu0 }
0x30a8   :  { %2351 = vrot.lane.b32.xlu1 %v2340_v24, %s4136_s8  ;;  %v2343_v14 = vadd.f32 %v2340_v24, %v4746_v11 }
0x30aa   :  { %v3421_v8 = vmul.f32 -1.442695, %v2343_v14 }
0x30ac   :  { %4094 = vpow2.f32 %v3421_v8 }
0x30b9   :  { %v4095_v10 = vpop.eup %4094 }
0x30ba   :  { %v2347_v25 = vadd.f32 1.0, %v4095_v10  ;;  %v2651_v10 = vcombine.high %v4707_v41, %v4707_v41 }
0x30bc   :  { %4096 = vrcp.f32 %v2347_v25  ;;  %v2663_v25 = vcombine.high %v4728_v1, %v4728_v1 }
0x30c9   :  { %v4097_v12 = vpop.eup %4096 }
0x30ca   :  { %v2361_v29 = vsub.f32 1.0, %v4097_v12  ;;  %v2368_v26 = vmul.f32 %v4097_v12, %v2268_v34  ;;  %v2584_v34 = vlaneseq }
0x30cc   :  { %v4769_v7 = vshrl.u32 %v2584_v34, 7  ;;  %v2827_v34 = vld [vmem:[%s5411_s2 + $0x3a8] sm:$0xff] }
0x30ce   :  { %v4774_v5 = vsub.s32 %v2583_v58, %v4769_v7  ;;  %v2722_v58 = vld [vmem:[%s5411_s2 + $0x60] sm:$0xff] }
0x30d0   :  { %v2587_v8 = vrot.slane %v4544_v22, %v4774_v5  ;;  %v2598_v41 = vrot.slane %v4582_v6, %v4774_v5 }
0x311a   :  { %v2352_v15 = vpop.permute.xlu1 %2351 }
0x311b   :  { %v2354_v17 = vmul.f32 %v4097_v12, %v2352_v15  ;;  %v2670_v15 = vrot.slane %v2663_v25, %v4774_v5  ;;  %v2822_v25 = vld [vmem:[%s5411_s2 + $0x380] sm:$0xff] }
0x311d   :  { %2356 = vrot.lane.b32.xlu0 %v2354_v17, %s4136_s8  ;;  %v2658_v17 = vrot.slane %v2651_v10, %v4774_v5  ;;  %v2671_v22 = vcombine.high %v2670_v15, %v2670_v15  ;;  %v2719_v10 = vld [vmem:[%s5411_s2 + $0x48] sm:$0xff]  ;;  %v2716_v15 = vld [vmem:[%s5411_s2 + $0x30] sm:$0xff] }
0x318f   :  { %v2357_v19 = vpop.permute.xlu0 %2356 }
0x3190   :  { %v2359_v20 = vadd.f32 %v2357_v19, %v4746_v11 }
0x3192   :  { %4098 = vtanh.f32 %v2359_v20 }
0x319f   :  { %v4099_v21 = vpop.eup %4098 }
0x31a0   :  { %2363 = vrot.lane.b32.xlu1 %v4099_v21, %s4137_s9  ;;  %v2599_v21 = vcombine.high %v2598_v41, %v2598_v41  ;;  %v2711_v41 = vld [vmem:[%s5411_s2 + $0x8] sm:$0xff] }
0x3212   :  { %v2364_v38 = vpop.permute.xlu1 %2363 }
0x3213   :  { %v2366_v27 = vmul.f32 %v2364_v38, %v2361_v29 }
0x3215   :  { %v2369_v13 = vadd.f32 %v2368_v26, %v2366_v27  ;;  %v2755_v27 = vld [vmem:[%s5411_s2 + $0x168] sm:$0xff] }
0x3217   :  { %2371 = vrot.lane.b32.xlu0 %v2369_v13, %s4137_s9  ;;  %v2471_v45 = vrot.slane %v2369_v13, 6  ;;  %v2682_v12 = vrot.slane %v2369_v13, %v4774_v5  ;;  %v2753_v13 = vld [vmem:[%s5411_s2 + $0x158] sm:$0xff] }
0x3289   :  { %v2372_v3 = vpop.permute.xlu0 %2371 }
0x328a   :  { %3905 = vmatmul.mubr.msk.f32.vlgmr.msra.gmra.mxu1 %vm140_vm4, %v2372_v3  ;;  %v2752_v3 = vld [vmem:[%s5411_s2 + $0x150] sm:$0xff] }
0x334a   :  { %v2441_v4 = vpop.f32.mrf.mxu1 }
0x334b   :  { %v2442_v31 = vadd.f32 %v4525_v23, %v2441_v4  ;;  %v2750_v4 = vld [vmem:[%s5411_s2 + $0x140] sm:$0xff] }
0x334c   :  { %v3906_v30 = vpop.f32.mrf.mxu1 }
0x334d   :  { %v2446_v32 = vrot.slane %v2442_v31, 6  ;;  %v2616_v31 = vcombine.high %v4638_v28, %v4638_v28  ;;  %v2636_v30 = vrot.slane %v4663_v49, %v4774_v5  ;;  %v2746_v28 = vld [vmem:[%s5411_s2 + $0x120] sm:$0xff] }
0x334f   :  { %2455 = vrot.lane.b32.xlu1 %v2446_v32, %s4136_s8  ;;  %v2448_v33 = vadd.f32 %v2446_v32, %v4746_v11  ;;  %v2603_v32 = vcombine.high %v4616_v60, %v4616_v60  ;;  %v2744_v60 = vld [vmem:[%s5411_s2 + $0x110] sm:$0xff]  ;;  %v2623_v49 = vrot.slane %v2616_v31, %v4774_v5  ;;  %v2786_v31 = vld [vmem:[%s5411_s2 + $0x260] sm:$0xff] }
0x3351   :  { %v3423_v56 = vmul.f32 -1.442695, %v2448_v33  ;;  %v2749_v33 = vld [vmem:[%s5411_s2 + $0x138] sm:$0xff] }
0x3353   :  { %4100 = vpow2.f32 %v3423_v56  ;;  %v2747_v56 = vld [vmem:[%s5411_s2 + $0x128] sm:$0xff] }
0x3360   :  { %v4101_v47 = vpop.eup %4100 }
0x3361   :  { %v2452_v35 = vadd.f32 1.0, %v4101_v47  ;;  %v2610_v47 = vrot.slane %v2603_v32, %v4774_v5  ;;  %v2783_v32 = vld [vmem:[%s5411_s2 + $0x248] sm:$0xff] }
0x3363   :  { %4102 = vrcp.f32 %v2452_v35  ;;  %v2743_v35 = vld [vmem:[%s5411_s2 + $0x108] sm:$0xff] }
0x3370   :  { %v4103_v37 = vpop.eup %4102 }
0x3371   :  { %v2465_v36 = vsub.f32 1.0, %v4103_v37  ;;  %v2473_v18 = vmul.f32 %v4103_v37, %v2471_v45  ;;  %v2840_v45 = vld [vmem:[%s5411_s2 + $0x410] sm:$0xff] }
0x3372   :  { %3007 = vmatprep.subr.mxu0 %v2840_v45  ;;  %v2768_v45 = vld [vmem:[%s5411_s2 + $0x1d0] sm:$0xff] }
0x33c1   :  { %v2456_v39 = vpop.permute.xlu1 %2455 }
0x33c2   :  { %v2458_v40 = vmul.f32 %v4103_v37, %v2456_v39  ;;  %v2741_v37 = vld [vmem:[%s5411_s2 + $0xf8] sm:$0xff]  ;;  %v2740_v39 = vld [vmem:[%s5411_s2 + $0xf0] sm:$0xff] }
0x33c4   :  { %2460 = vrot.lane.b32.xlu0 %v2458_v40, %s4136_s8  ;;  %v2738_v40 = vld [vmem:[%s5411_s2 + $0xe0] sm:$0xff] }
0x3436   :  { %v2461_v42 = vpop.permute.xlu0 %2460 }
0x3437   :  { %v2463_v43 = vadd.f32 %v2461_v42, %v4746_v11  ;;  %v2624_v42 = vcombine.high %v2623_v49, %v2623_v49  ;;  %v2776_v49 = vld [vmem:[%s5411_s2 + $0x210] sm:$0xff] }
0x3439   :  { %4104 = vtanh.f32 %v2463_v43  ;;  %v2737_v43 = vld [vmem:[%s5411_s2 + $0xd8] sm:$0xff] }
0x3446   :  { %v4105_v44 = vpop.eup %4104 }
0x3447   :  { %2467 = vrot.lane.b32.xlu1 %v4105_v44, %s4137_s9  ;;  %v2735_v44 = vld [vmem:[%s5411_s2 + $0xc8] sm:$0xff] }
0x34b9   :  { %v2468_v46 = vpop.permute.xlu1 %2467 }
0x34ba   :  { %v2470_v48 = vmul.f32 %v2468_v46, %v2465_v36  ;;  %v2734_v36 = vld [vmem:[%s5411_s2 + $0xc0] sm:$0xff]  ;;  %v2839_v46 = vld [vmem:[%s5411_s2 + $0x408] sm:$0xff] }
0x34bc   :  { %v4760_v50 = vadd.f32 %v2473_v18, %v2470_v48  ;;  %v2732_v48 = vld [vmem:[%s5411_s2 + $0xb0] sm:$0xff]  ;;  %v2837_v18 = vld [vmem:[%s5411_s2 + $0x3f8] sm:$0xff] }
0x34be   :  { %v2476_v51 = vrot.slane %v4760_v50, 2  ;;  %v2693_v20 = vrot.slane %v4760_v50, %v4774_v5 }
0x34c0   :  { %2477 = vrot.lane.b32.xlu0 %v2476_v51, %s4137_s9  ;;  %v2694_v38 = vcombine.high %v2693_v20, %v2693_v20  ;;  %v2731_v51 = vld [vmem:[%s5411_s2 + $0xa8] sm:$0xff] }
0x34c1   :  { %v2803_v20 = vld [vmem:[%s5411_s2 + $0x2e8] sm:$0xff] }
0x3532   :  { %v2478_v52 = vpop.permute.xlu0 %2477 }
0x3533   :  { %3916 = vmatmul.mubr.msk.f32.vlgmr.msra.gmra.mxu0 %vm140_vm4, %v2478_v52  ;;  %v2836_v52 = vld [vmem:[%s5411_s2 + $0x3f0] sm:$0xff] }
0x3534   :  { %3063 = vmatprep.mubr.f32.mxu0 %v4134_v2  ;;  %3008 = vmatpush1.msra.mxu0 %v2839_v46 }
0x3535   :  { %3009 = vmatprep.subr.mxu0 %v2837_v18  ;;  %v2813_v18 = vld [vmem:[%s5411_s2 + $0x338] sm:$0xff] }
0x3536   :  { %3010 = vmatpush1.msra.mxu0 %v2836_v52  ;;  %v2812_v52 = vld [vmem:[%s5411_s2 + $0x330] sm:$0xff] }
0x35f3   :  { %v2547_v53 = vpop.f32.mrf.mxu0 }
0x35f4   :  { %v2548_v54 = vadd.f32 %v4525_v23, %v2547_v53  ;;  %v2834_v53 = vld [vmem:[%s5411_s2 + $0x3e0] sm:$0xff] }
0x35f5   :  { %v3917_v55 = vpop.f32.mrf.mxu0  ;;  %3011 = vmatprep.subr.mxu0 %v2834_v53  ;;  %v2647_v53 = vrot.slane %v4685_v9, %v4774_v5  ;;  %v2764_v9 = vld [vmem:[%s5411_s2 + $0x1b0] sm:$0xff] }
0x35f6   :  { %v2552_v16 = vrot.slane %v2548_v54, 4  ;;  %v2729_v54 = vld [vmem:[%s5411_s2 + $0x98] sm:$0xff] }
0x35f7   :  { %v2833_v55 = vld [vmem:[%s5411_s2 + $0x3d8] sm:$0xff] }
0x35f8   :  { %2561 = vrot.lane.b32.xlu1 %v2552_v16, %s4136_s8  ;;  %v2554_v57 = vadd.f32 %v2552_v16, %v4746_v11  ;;  %v2728_v16 = vld [vmem:[%s5411_s2 + $0x90] sm:$0xff]  ;;  %3012 = vmatpush1.msra.mxu0 %v2833_v55  ;;  %v2810_v55 = vld [vmem:[%s5411_s2 + $0x320] sm:$0xff] }
0x35fa   :  { %v3425_v59 = vmul.f32 -1.442695, %v2554_v57  ;;  %v2831_v57 = vld [vmem:[%s5411_s2 + $0x3c8] sm:$0xff] }
0x35fb   :  { %3013 = vmatprep.subr.mxu0 %v2831_v57 }
0x35fc   :  { %4106 = vpow2.f32 %v3425_v59  ;;  %v2726_v59 = vld [vmem:[%s5411_s2 + $0x80] sm:$0xff] }
0x3609   :  { %v4107_v61 = vpop.eup %4106 }
0x360a   :  { %v2558_v62 = vadd.f32 1.0, %v4107_v61  ;;  %v2830_v61 = vld [vmem:[%s5411_s2 + $0x3c0] sm:$0xff] }
0x360b   :  { %3014 = vmatpush1.msra.mxu0 %v2830_v61  ;;  %v2809_v61 = vld [vmem:[%s5411_s2 + $0x318] sm:$0xff] }
0x360c   :  { %4108 = vrcp.f32 %v2558_v62  ;;  %v2725_v62 = vld [vmem:[%s5411_s2 + $0x78] sm:$0xff]  ;;  %3015 = vmatprep.subr.mxu0 %v2828_v63 }
0x360d   :  { %3016 = vmatpush1.msra.mxu0 %v2827_v34  ;;  %v2806_v34 = vld [vmem:[%s5411_s2 + $0x300] sm:$0xff] }
0x3619   :  { %v4771_v24 = vpop.eup %4108 }
0x361a   :  { %v2571_v46 = vsub.f32 1.0, %v4771_v24 }
0x366a   :  { %v2562_v23 = vpop.permute.xlu1 %2561 }
0x366b   :  { %v2564_v14 = vmul.f32 %v4771_v24, %v2562_v23  ;;  %v2825_v23 = vld [vmem:[%s5411_s2 + $0x398] sm:$0xff] }
0x366c   :  { %3017 = vmatprep.subr.mxu0 %v2825_v23 }
0x366d   :  { %2566 = vrot.lane.b32.xlu0 %v2564_v14, %s4136_s8  ;;  %v2720_v14 = vld [vmem:[%s5411_s2 + $0x50] sm:$0xff] }
0x3671   :  { %2588 = vrot.lane.b32.xlu0 %v2587_v8, %s4137_s9  ;;  %v2824_v8 = vld [vmem:[%s5411_s2 + $0x390] sm:$0xff] }
0x3672   :  { %3018 = vmatpush1.msra.mxu0 %v2824_v8  ;;  %v2805_v8 = vld [vmem:[%s5411_s2 + $0x2f8] sm:$0xff] }
0x3673   :  { %3019 = vmatprep.subr.mxu0 %v2822_v25  ;;  %v2758_v25 = vld [vmem:[%s5411_s2 + $0x180] sm:$0xff] }
0x3675   :  { %2683 = vrot.lane.b32.xlu0 %v2682_v12, %s4137_s9  ;;  %v2717_v12 = vld [vmem:[%s5411_s2 + $0x38] sm:$0xff] }
0x3679   :  { %2659 = vrot.lane.b32.xlu0 %v2658_v17, %s4139_s1  ;;  %v2714_v17 = vld [vmem:[%s5411_s2 + $0x20] sm:$0xff] }
0x367d   :  { %2672 = vrot.lane.b32.xlu0 %v2671_v22, %s4136_s8  ;;  %v2713_v22 = vld [vmem:[%s5411_s2 + $0x18] sm:$0xff] }
0x36df   :  { %v2567_v19 = vpop.permute.xlu0 %2566 }
0x36e0   :  { %v2569_v1 = vadd.f32 %v2567_v19, %v4746_v11  ;;  %v2756_v11 = vld [vmem:[%s5411_s2 + $0x170] sm:$0xff]  ;;  %v2710_v19 = vld [vmem:[%s5411_s2] sm:$0xff] }
0x36e1   :  { %2928 = vmatprep.subr.mxu1 %v2756_v11  ;;  %v2794_v11 = vld [vmem:[%s5411_s2 + $0x2a0] sm:$0xff] }
0x36e2   :  { %4110 = vtanh.f32 %v2569_v1  ;;  %2929 = vmatpush1.msra.mxu1 %v2755_v27  ;;  %v2804_v1 = vld [vmem:[%s5411_s2 + $0x2f0] sm:$0xff] }
0x36e3   :  { %v2589_v29 = vpop.permute.xlu0 %2588  ;;  %2930 = vmatprep.subr.mxu1 %v2753_v13  ;;  %v2792_v27 = vld [vmem:[%s5411_s2 + $0x290] sm:$0xff]  ;;  %v2791_v13 = vld [vmem:[%s5411_s2 + $0x288] sm:$0xff] }
0x36e4   :  { %2591 = vst.msk [vmem:[#allocation3] sm:$0x3] %vm1292_vm3, %v2589_v29  ;;  %2931 = vmatpush1.msra.mxu1 %v2752_v3  ;;  %v2800_v29 = vld [vmem:[%s5411_s2 + $0x2d0] sm:$0xff]  ;;  %v2789_v3 = vld [vmem:[%s5411_s2 + $0x278] sm:$0xff] }
0x36e5   :  { %2602 = vst.msk [vmem:[#allocation3] sm:$0x3] %vm2601_vm8, %v2599_v21  ;;  %2932 = vmatprep.subr.mxu1 %v2750_v4  ;;  %v2801_v21 = vld [vmem:[%s5411_s2 + $0x2d8] sm:$0xff]  ;;  %v2788_v4 = vld [vmem:[%s5411_s2 + $0x270] sm:$0xff] }
0x36e6   :  { %2933 = vmatpush1.msra.mxu1 %v2749_v33  ;;  %v2782_v33 = vld [vmem:[%s5411_s2 + $0x240] sm:$0xff] }
0x36e7   :  { %v2684_v26 = vpop.permute.xlu0 %2683  ;;  %2934 = vmatprep.subr.mxu1 %v2747_v56  ;;  %v2780_v56 = vld [vmem:[%s5411_s2 + $0x230] sm:$0xff] }
0x36e8   :  { %2686 = vst.msk [vmem:[#allocation3 + $0x4] sm:$0x3] %vm1292_vm3, %v2684_v26  ;;  %2935 = vmatpush1.msra.mxu1 %v2746_v28  ;;  %v2797_v26 = vld [vmem:[%s5411_s2 + $0x2b8] sm:$0xff]  ;;  %v2779_v28 = vld [vmem:[%s5411_s2 + $0x228] sm:$0xff] }
0x36e9   :  { %2696 = vst.msk [vmem:[#allocation3 + $0x4] sm:$0x3] %vm2601_vm8, %v2694_v38  ;;  %2936 = vmatprep.subr.mxu1 %v2744_v60  ;;  %v2798_v38 = vld [vmem:[%s5411_s2 + $0x2c0] sm:$0xff]  ;;  %v2777_v60 = vld [vmem:[%s5411_s2 + $0x218] sm:$0xff] }
0x36ea   :  { %2937 = vmatpush1.msra.mxu1 %v2743_v35  ;;  %v2774_v35 = vld [vmem:[%s5411_s2 + $0x200] sm:$0xff] }
0x36eb   :  { %2938 = vmatprep.subr.mxu1 %v2741_v37  ;;  %v2819_v37 = vld [vmem:[%s5411_s2 + $0x368] sm:$0xff] }
0x36ec   :  { %2939 = vmatpush1.msra.mxu1 %v2740_v39  ;;  %v2773_v39 = vld [vmem:[%s5411_s2 + $0x1f8] sm:$0xff] }
0x36ed   :  { %2940 = vmatprep.subr.mxu1 %v2738_v40  ;;  %v2818_v40 = vld [vmem:[%s5411_s2 + $0x360] sm:$0xff] }
0x36ee   :  { %2941 = vmatpush1.msra.mxu1 %v2737_v43  ;;  %v2816_v43 = vld [vmem:[%s5411_s2 + $0x350] sm:$0xff] }
0x36ef   :  { %v4111_v6 = vpop.eup %4110  ;;  %2942 = vmatprep.subr.mxu1 %v2735_v44  ;;  %v2770_v44 = vld [vmem:[%s5411_s2 + $0x1e0] sm:$0xff] }
0x36f0   :  { %2573 = vrot.lane.b32.xlu1 %v4111_v6, %s4137_s9  ;;  %2943 = vmatpush1.msra.mxu1 %v2734_v36  ;;  %v2795_v6 = vld [vmem:[%s5411_s2 + $0x2a8] sm:$0xff] }
0x36f1   :  { %2944 = vmatprep.subr.mxu1 %v2732_v48  ;;  %v2815_v36 = vld [vmem:[%s5411_s2 + $0x348] sm:$0xff]  ;;  %v2577_v48 = vrot.slane %v4760_v50, 6  ;;  %v2765_v50 = vld [vmem:[%s5411_s2 + $0x1b8] sm:$0xff] }
0x36f2   :  { %2945 = vmatpush1.msra.mxu1 %v2731_v51  ;;  %v2767_v51 = vld [vmem:[%s5411_s2 + $0x1c8] sm:$0xff] }
0x36f3   :  { %2946 = vmatprep.subr.mxu1 %v2729_v54  ;;  %v2579_v57 = vmul.f32 %v4771_v24, %v2577_v48  ;;  %v2807_v24 = vld [vmem:[%s5411_s2 + $0x308] sm:$0xff] }
0x36f4   :  { %2637 = vrot.lane.b32.xlu1 %v2636_v30, %s4137_s9  ;;  %2947 = vmatpush1.msra.mxu1 %v2728_v16  ;;  %v2785_v30 = vld [vmem:[%s5411_s2 + $0x258] sm:$0xff]  ;;  %v2660_v16 = vpop.permute.xlu0 %2659  ;;  %v2853_v48 = vld [vmem:[%s5412_s3 + $0x48] sm:$0xff] }
0x36f5   :  { %2948 = vmatprep.subr.mxu1 %v2726_v59 }
0x36f6   :  { %2949 = vmatpush1.msra.mxu1 %v2725_v62  ;;  %v2762_v62 = vld [vmem:[%s5411_s2 + $0x1a0] sm:$0xff] }
0x36f7   :  { %2950 = vmatprep.subr.mxu1 %v2723_v0  ;;  %v2761_v0 = vld [vmem:[%s5411_s2 + $0x198] sm:$0xff] }
0x36f8   :  { %2611 = vrot.lane.b32.xlu1 %v2610_v47, %s4139_s1  ;;  %2951 = vmatpush1.msra.mxu1 %v2722_v58  ;;  %v2821_v47 = vld [vmem:[%s5411_s2 + $0x378] sm:$0xff]  ;;  %v2648_v58 = vcombine.high %v2647_v53, %v2647_v53  ;;  %v2852_v53 = vld [vmem:[%s5412_s3 + $0x40] sm:$0xff] }
0x36f9   :  { %2952 = vmatprep.subr.mxu1 %v2720_v14  ;;  %3020 = vmatpush1.msra.mxu0 %v2821_v47  ;;  %v2759_v14 = vld [vmem:[%s5411_s2 + $0x188] sm:$0xff]  ;;  %v2790_v47 = vld [vmem:[%s5411_s2 + $0x280] sm:$0xff] }
0x36fa   :  { %2953 = vmatpush1.msra.mxu1 %v2719_v10  ;;  %3021 = vmatprep.subr.mxu0 %v2819_v37  ;;  %v2742_v37 = vld [vmem:[%s5411_s2 + $0x100] sm:$0xff] }
0x36fb   :  { %2954 = vmatprep.subr.mxu1 %v2717_v12  ;;  %3022 = vmatpush1.msra.mxu0 %v2818_v40  ;;  %v2673_v12 = vpop.permute.xlu0 %2672  ;;  %v2787_v40 = vld [vmem:[%s5411_s2 + $0x268] sm:$0xff] }
0x36fc   :  { %2625 = vrot.lane.b32.xlu1 %v2624_v42, %s4136_s8  ;;  %2955 = vmatpush1.msra.mxu1 %v2716_v15  ;;  %v2771_v42 = vld [vmem:[%s5411_s2 + $0x1e8] sm:$0xff] }
0x36fd   :  { %2956 = vmatprep.subr.mxu1 %v2714_v17  ;;  %3023 = vmatprep.subr.mxu0 %v2816_v43  ;;  %v2739_v43 = vld [vmem:[%s5411_s2 + $0xe8] sm:$0xff] }
0x36fe   :  { %2957 = vmatpush1.msra.mxu1 %v2713_v22  ;;  %3024 = vmatpush1.msra.mxu0 %v2815_v36  ;;  %v2784_v36 = vld [vmem:[%s5411_s2 + $0x250] sm:$0xff] }
0x36ff   :  { %2958 = vmatprep.subr.mxu1 %v2711_v41  ;;  %3025 = vmatprep.subr.mxu0 %v2813_v18  ;;  %v2875_v41 = vld [vmem:[%s5412_s3 + $0xf8] sm:$0xff] }
0x3700   :  { %2959 = vmatpush1.msra.mxu1 %v2710_v19  ;;  %3026 = vmatpush1.msra.mxu0 %v2812_v52  ;;  %v2781_v18 = vld [vmem:[%s5411_s2 + $0x238] sm:$0xff] }
0x3701   :  { %2960 = vmatprep.subr.mxu1 %v2804_v1  ;;  %3027 = vmatprep.subr.mxu0 %v2810_v55  ;;  %v2733_v52 = vld [vmem:[%s5411_s2 + $0xb8] sm:$0xff]  ;;  %v2730_v55 = vld [vmem:[%s5411_s2 + $0xa0] sm:$0xff] }
0x3702   :  { %2961 = vmatpush2.msra.mxu1 %v2803_v20  ;;  %3028 = vmatpush1.msra.mxu0 %v2809_v61  ;;  %v2850_v61 = vld [vmem:[%s5412_s3 + $0x30] sm:$0xff] }
0x3703   :  { %2962 = vmatprep.subr.mxu1 %v2801_v21  ;;  %3029 = vmatprep.subr.mxu0 %v2807_v24  ;;  %v2865_v24 = vld [vmem:[%s5412_s3 + $0xa8] sm:$0xff] }
0x3704   :  { %2963 = vmatpush2.msra.mxu1 %v2800_v29  ;;  %3030 = vmatpush1.msra.mxu0 %v2806_v34  ;;  %v2769_v34 = vld [vmem:[%s5411_s2 + $0x1d8] sm:$0xff] }
0x3705   :  { %2964 = vmatprep.subr.mxu1 %v2798_v38  ;;  %3552 = vmatprep.subr.mxu0 %v2805_v8  ;;  %v2718_v8 = vld [vmem:[%s5411_s2 + $0x40] sm:$0xff] }
0x3706   :  { %2965 = vmatpush2.msra.mxu1 %v2797_v26  ;;  %v2757_v26 = vld [vmem:[%s5411_s2 + $0x178] sm:$0xff] }
0x3707   :  { %2966 = vmatprep.subr.mxu1 %v2795_v6  ;;  %v2802_v6 = vld [vmem:[%s5411_s2 + $0x2e0] sm:$0xff] }
0x3708   :  { %2967 = vmatpush2.msra.mxu1 %v2794_v11  ;;  %v2754_v11 = vld [vmem:[%s5411_s2 + $0x160] sm:$0xff] }
0x3709   :  { %2968 = vmatprep.subr.mxu1 %v2792_v27  ;;  %v2799_v27 = vld [vmem:[%s5411_s2 + $0x2c8] sm:$0xff] }
0x370a   :  { %2969 = vmatpush2.msra.mxu1 %v2791_v13  ;;  %v2874_v13 = vld [vmem:[%s5412_s3 + $0xf0] sm:$0xff] }
0x370b   :  { %2970 = vmatprep.subr.mxu1 %v2789_v3  ;;  %v2751_v3 = vld [vmem:[%s5411_s2 + $0x148] sm:$0xff] }
0x370c   :  { %2971 = vmatpush2.msra.mxu1 %v2788_v4  ;;  %v2858_v4 = vld [vmem:[%s5412_s3 + $0x70] sm:$0xff] }
0x370d   :  { %2972 = vmatprep.subr.mxu1 %v2786_v31  ;;  %v2796_v31 = vld [vmem:[%s5411_s2 + $0x2b0] sm:$0xff] }
0x370e   :  { %2973 = vmatpush2.msra.mxu1 %v2785_v30  ;;  %v2873_v30 = vld [vmem:[%s5412_s3 + $0xe8] sm:$0xff] }
0x370f   :  { %2974 = vmatprep.subr.mxu1 %v2783_v32  ;;  %v2748_v32 = vld [vmem:[%s5411_s2 + $0x130] sm:$0xff] }
0x3710   :  { %2975 = vmatpush2.msra.mxu1 %v2782_v33  ;;  %v2857_v33 = vld [vmem:[%s5412_s3 + $0x68] sm:$0xff] }
0x3711   :  { %2976 = vmatprep.subr.mxu1 %v2780_v56  ;;  %v2793_v56 = vld [vmem:[%s5411_s2 + $0x298] sm:$0xff] }
0x3712   :  { %2977 = vmatpush2.msra.mxu1 %v2779_v28  ;;  %v2872_v28 = vld [vmem:[%s5412_s3 + $0xe0] sm:$0xff] }
0x3713   :  { %2978 = vmatprep.subr.mxu1 %v2777_v60  ;;  %v2745_v60 = vld [vmem:[%s5411_s2 + $0x118] sm:$0xff] }
0x3714   :  { %2979 = vmatpush2.msra.mxu1 %v2776_v49  ;;  %v2856_v49 = vld [vmem:[%s5412_s3 + $0x60] sm:$0xff] }
0x3715   :  { %2980 = vmatprep.subr.mxu1 %v2774_v35  ;;  %v2871_v35 = vld [vmem:[%s5412_s3 + $0xd8] sm:$0xff] }
0x3716   :  { %2981 = vmatpush2.msra.mxu1 %v2773_v39  ;;  %v2855_v39 = vld [vmem:[%s5412_s3 + $0x58] sm:$0xff] }
0x3717   :  { %2982 = vmatprep.subr.mxu1 %v2771_v42  ;;  %v2870_v42 = vld [vmem:[%s5412_s3 + $0xd0] sm:$0xff] }
0x3718   :  { %2983 = vmatpush2.msra.mxu1 %v2770_v44  ;;  %v2854_v44 = vld [vmem:[%s5412_s3 + $0x50] sm:$0xff] }
0x3719   :  { %2984 = vmatprep.subr.mxu1 %v2768_v45  ;;  %v2869_v45 = vld [vmem:[%s5412_s3 + $0xc8] sm:$0xff] }
0x371a   :  { %2985 = vmatpush2.msra.mxu1 %v2767_v51  ;;  %v2868_v51 = vld [vmem:[%s5412_s3 + $0xc0] sm:$0xff] }
0x371b   :  { %2986 = vmatprep.subr.mxu1 %v2765_v50  ;;  %v2867_v50 = vld [vmem:[%s5412_s3 + $0xb8] sm:$0xff] }
0x371c   :  { %2987 = vmatpush2.msra.mxu1 %v2764_v9  ;;  %v2727_v9 = vld [vmem:[%s5411_s2 + $0x88] sm:$0xff] }
0x371d   :  { %2988 = vmatprep.subr.mxu1 %v2762_v62  ;;  %v2772_v62 = vld [vmem:[%s5411_s2 + $0x1f0] sm:$0xff] }
0x371e   :  { %2989 = vmatpush2.msra.mxu1 %v2761_v0  ;;  %v2849_v0 = vld [vmem:[%s5412_s3 + $0x28] sm:$0xff] }
0x371f   :  { %2990 = vmatprep.subr.mxu1 %v2759_v14  ;;  %v2766_v14 = vld [vmem:[%s5411_s2 + $0x1c0] sm:$0xff] }
0x3720   :  { %2991 = vmatpush2.msra.mxu1 %v2758_v25  ;;  %v2715_v25 = vld [vmem:[%s5411_s2 + $0x28] sm:$0xff] }
0x3721   :  { %3600 = vmatprep.subr.mxu1 %v2875_v41  ;;  %v2835_v41 = vld [vmem:[%s5411_s2 + $0x3e8] sm:$0xff] }
0x3762   :  { %v2574_v54 = vpop.permute.xlu1 %2573 }
0x3763   :  { %v2576_v59 = vmul.f32 %v2574_v54, %v2571_v46  ;;  %v2736_v46 = vld [vmem:[%s5411_s2 + $0xd0] sm:$0xff]  ;;  %v2778_v54 = vld [vmem:[%s5411_s2 + $0x220] sm:$0xff] }
0x3765   :  { %v2580_v63 = vadd.f32 %v2579_v57, %v2576_v59  ;;  %v2775_v57 = vld [vmem:[%s5411_s2 + $0x208] sm:$0xff]  ;;  %v2866_v59 = vld [vmem:[%s5412_s3 + $0xb0] sm:$0xff] }
0x3766   :  { %v2638_v23 = vpop.permute.xlu1 %2637 }
0x3767   :  { %v2698_v10 = vcombine.high %v2580_v63, %v2580_v63  ;;  %2640 = vst.msk [vmem:[#allocation3 + $0x2] sm:$0x3] %vm1292_vm3, %v2638_v23  ;;  %v2724_v63 = vld [vmem:[%s5411_s2 + $0x70] sm:$0xff]  ;;  %v2721_v23 = vld [vmem:[%s5411_s2 + $0x58] sm:$0xff] }
0x3768   :  { %2650 = vst.msk [vmem:[#allocation3 + $0x2] sm:$0x3] %vm2601_vm8, %v2648_v58  ;;  %v2864_v58 = vld [vmem:[%s5412_s3 + $0xa0] sm:$0xff] }
0x3769   :  { %v2705_v15 = vrot.slane %v2698_v10, %v4774_v5  ;;  %2662 = vst.msk [vmem:[#allocation3 + $0x2] sm:$0x3] %vm2614_vm9, %v2660_v16  ;;  %v2851_v16 = vld [vmem:[%s5412_s3 + $0x38] sm:$0xff]  ;;  %v2763_v10 = vld [vmem:[%s5411_s2 + $0x1a8] sm:$0xff] }
0x376a   :  { %v2612_v17 = vpop.permute.xlu1 %2611  ;;  %2675 = vst.msk [vmem:[#allocation3 + $0x2] sm:$0x3] %vm2628_vm10, %v2673_v12  ;;  %v2760_v12 = vld [vmem:[%s5411_s2 + $0x190] sm:$0xff] }
0x376b   :  { %2615 = vst.msk [vmem:[#allocation3] sm:$0x3] %vm2614_vm9, %v2612_v17  ;;  %2706 = vrot.lane.b32.xlu1 %v2705_v15, %s4139_s1  ;;  %v2712_v15 = vld [vmem:[%s5411_s2 + $0x10] sm:$0xff]  ;;  %v2841_v17 = vld [vmem:[%s5411_s2 + $0x418] sm:$0xff] }
0x376e   :  { %v2626_v22 = vpop.permute.xlu1 %2625 }
0x376f   :  { %2629 = vst.msk [vmem:[#allocation3] sm:$0x3] %vm2628_vm10, %v2626_v22  ;;  %v2838_v22 = vld [vmem:[%s5411_s2 + $0x400] sm:$0xff] }
0x37dd   :  { %v2707_v19 = vpop.permute.xlu1 %2706 }
0x37de   :  { %2709 = vst.msk [vmem:[#allocation3 + $0x4] sm:$0x3] %vm2614_vm9, %v2707_v19  ;;  %v2832_v19 = vld [vmem:[%s5411_s2 + $0x3d0] sm:$0xff] }
0x37e5   :  { %v2889_v1 = vld [vmem:[#allocation3] sm:$0x3f] }
0x37e6   :  { %v2907_v20 = vcombine.high %v2889_v1, %v2889_v1  ;;  %v5097_v21 = vrot.slane %v2889_v1, %v4774_v5  ;;  %v2829_v1 = vld [vmem:[%s5411_s2 + $0x3b8] sm:$0xff] }
0x37e8   :  { %v2922_v29 = vcombine.high %v5097_v21, %v5097_v21  ;;  %v5102_v38 = vrot.slane %v2907_v20, %v4774_v5  ;;  %v2859_v5 = vld [vmem:[%s5412_s3 + $0x78] sm:$0xff]  ;;  %v2826_v20 = vld [vmem:[%s5411_s2 + $0x3a0] sm:$0xff] }
0x37ea   :  { %2992 = vmatprep.mubr.f32.mxu1 %v2922_v29  ;;  %3427 = vmatmul.mubr.msk.f32.vlgmr.msra.gmra.mxu0 %vm2925_vm11, %v5102_v38 }
0x37eb   :  { %3553 = vmatpush3.msra.mxu0 %v2757_v26  ;;  %2993 = vmatmul.mubr.f32.vlgmr.msra.gmra.mxu1 %v5097_v21  ;;  %v2817_v26 = vld [vmem:[%s5411_s2 + $0x358] sm:$0xff] }
0x37ec   :  { %3554 = vmatprep.subr.mxu0 %v2802_v6  ;;  %3134 = vmatprep.mubr.f32.mxu0 %v2922_v29  ;;  %v2820_v29 = vld [vmem:[%s5411_s2 + $0x370] sm:$0xff]  ;;  %v2814_v6 = vld [vmem:[%s5411_s2 + $0x340] sm:$0xff] }
0x37ed   :  { %3555 = vmatpush3.msra.mxu0 %v2754_v11  ;;  %3601 = vmatpush3.msra.mxu1 %v2859_v5  ;;  %v2811_v11 = vld [vmem:[%s5411_s2 + $0x328] sm:$0xff]  ;;  %v2808_v5 = vld [vmem:[%s5411_s2 + $0x310] sm:$0xff] }
0x37ee   :  { %3556 = vmatprep.subr.mxu0 %v2799_v27  ;;  %3602 = vmatprep.subr.mxu1 %v2874_v13  ;;  %v2848_v27 = vld [vmem:[%s5412_s3 + $0x20] sm:$0xff]  ;;  %v2863_v13 = vld [vmem:[%s5412_s3 + $0x98] sm:$0xff] }
0x37ef   :  { %3557 = vmatpush3.msra.mxu0 %v2751_v3  ;;  %3603 = vmatpush3.msra.mxu1 %v2858_v4  ;;  %v2847_v3 = vld [vmem:[%s5412_s3 + $0x18] sm:$0xff]  ;;  %v2846_v4 = vld [vmem:[%s5412_s3 + $0x10] sm:$0xff] }
0x37f0   :  { %3558 = vmatprep.subr.mxu0 %v2796_v31  ;;  %3604 = vmatprep.subr.mxu1 %v2873_v30  ;;  %v2861_v31 = vld [vmem:[%s5412_s3 + $0x88] sm:$0xff] }
0x37f1   :  { %3559 = vmatpush3.msra.mxu0 %v2748_v32  ;;  %3605 = vmatpush3.msra.mxu1 %v2857_v33  ;;  %v2845_v30 = vld [vmem:[%s5412_s3 + $0x8] sm:$0xff]  ;;  %v2860_v32 = vld [vmem:[%s5412_s3 + $0x80] sm:$0xff] }
0x37f2   :  { %3560 = vmatprep.subr.mxu0 %v2793_v56  ;;  %3606 = vmatprep.subr.mxu1 %v2872_v28  ;;  %v2844_v33 = vld [vmem:[%s5412_s3] sm:$0xff]  ;;  %v2887_v56 = vld [vmem:[%s5412_s3 + $0x158] sm:$0xff]  ;;  %v2886_v28 = vld [vmem:[%s5412_s3 + $0x150] sm:$0xff] }
0x37f3   :  { %3561 = vmatpush3.msra.mxu0 %v2745_v60  ;;  %3607 = vmatpush3.msra.mxu1 %v2856_v49  ;;  %v2885_v60 = vld [vmem:[%s5412_s3 + $0x148] sm:$0xff]  ;;  %v2884_v49 = vld [vmem:[%s5412_s3 + $0x140] sm:$0xff] }
0x37f4   :  { %3562 = vmatprep.subr.mxu0 %v2790_v47  ;;  %3608 = vmatprep.subr.mxu1 %v2871_v35  ;;  %v2883_v47 = vld [vmem:[%s5412_s3 + $0x138] sm:$0xff]  ;;  %v2882_v35 = vld [vmem:[%s5412_s3 + $0x130] sm:$0xff] }
0x37f5   :  { %3563 = vmatpush3.msra.mxu0 %v2742_v37  ;;  %3609 = vmatpush3.msra.mxu1 %v2855_v39  ;;  %v2881_v37 = vld [vmem:[%s5412_s3 + $0x128] sm:$0xff]  ;;  %v2880_v39 = vld [vmem:[%s5412_s3 + $0x120] sm:$0xff] }
0x37f6   :  { %3564 = vmatprep.subr.mxu0 %v2787_v40  ;;  %3610 = vmatprep.subr.mxu1 %v2870_v42  ;;  %v2879_v40 = vld [vmem:[%s5412_s3 + $0x118] sm:$0xff]  ;;  %v2878_v42 = vld [vmem:[%s5412_s3 + $0x110] sm:$0xff] }
0x37f7   :  { %3565 = vmatpush3.msra.mxu0 %v2739_v43  ;;  %3611 = vmatpush3.msra.mxu1 %v2854_v44  ;;  %v2877_v43 = vld [vmem:[%s5412_s3 + $0x108] sm:$0xff]  ;;  %v2876_v44 = vld [vmem:[%s5412_s3 + $0x100] sm:$0xff] }
0x37f8   :  { %3566 = vmatprep.subr.mxu0 %v2784_v36  ;;  %3612 = vmatprep.subr.mxu1 %v2869_v45  ;;  %v2893_v36 = vsub.s32 0, %v4769_v7  ;;  %v3426_v45 = vld [vmem:[%s5411_s2 + $0x420] ss:$8 sm:$0x7] }
0x37f9   :  { %3567 = vmatpush3.msra.mxu0 %v2736_v46  ;;  %3613 = vmatpush3.msra.mxu1 %v2853_v48  ;;  %v2897_v46 = vsub.s32 1, %v4769_v7 }
0x37fa   :  { %3568 = vmatprep.subr.mxu0 %v2781_v18  ;;  %3614 = vmatprep.subr.mxu1 %v2868_v51  ;;  %v2894_v48 = vrot.slane %v3426_v45, %v2893_v36 }
0x37fb   :  { %3569 = vmatpush3.msra.mxu0 %v2733_v52  ;;  %3615 = vmatpush3.msra.mxu1 %v2852_v53  ;;  %v2898_v18 = vrot.slane %v3426_v45, %v2897_v46 }
0x37fc   :  { %3570 = vmatprep.subr.mxu0 %v2778_v54  ;;  %3616 = vmatprep.subr.mxu1 %v2867_v50 }
0x37fd   :  { %3571 = vmatpush3.msra.mxu0 %v2730_v55  ;;  %3617 = vmatpush3.msra.mxu1 %v2851_v16 }
0x37fe   :  { %3572 = vmatprep.subr.mxu0 %v2775_v57  ;;  %3618 = vmatprep.subr.mxu1 %v2866_v59  ;;  %v2901_v59 = vsub.s32 2, %v4769_v7 }
0x37ff   :  { %3573 = vmatpush3.msra.mxu0 %v2727_v9  ;;  %3619 = vmatpush3.msra.mxu1 %v2850_v61 }
0x3800   :  { %3574 = vmatprep.subr.mxu0 %v2772_v62  ;;  %3620 = vmatprep.subr.mxu1 %v2865_v24  ;;  %v2902_v62 = vrot.slane %v3426_v45, %v2901_v59 }
0x3801   :  { %3575 = vmatpush3.msra.mxu0 %v2724_v63  ;;  %3621 = vmatpush3.msra.mxu1 %v2849_v0 }
0x3802   :  { %3576 = vmatprep.subr.mxu0 %v2769_v34  ;;  %3622 = vmatprep.subr.mxu1 %v2864_v58 }
0x3803   :  { %3577 = vmatpush3.msra.mxu0 %v2721_v23  ;;  %3623 = vmatpush3.msra.mxu1 %v2848_v27 }
0x3804   :  { %3578 = vmatprep.subr.mxu0 %v2766_v14  ;;  %3624 = vmatprep.subr.mxu1 %v2863_v13 }
0x3805   :  { %3579 = vmatpush3.msra.mxu0 %v2718_v8  ;;  %3625 = vmatpush3.msra.mxu1 %v2847_v3  ;;  %v3429_v8 = vld [vmem:[%s5412_s3 + $0x160] ss:$0 sm:$0xff] }
0x3806   :  { %3580 = vmatprep.subr.mxu0 %v2763_v10 }
0x3807   :  { %3581 = vmatpush3.msra.mxu0 %v2715_v25 }
0x3808   :  { %3582 = vmatprep.subr.mxu0 %v2760_v12 }
0x3809   :  { %3583 = vmatpush3.msra.mxu0 %v2712_v15 }
0x380a   :  { %3135 = vmatmul.mubr.f32.vlgmr.msra.gmra.mxu0 %v5097_v21  ;;  %3918 = vmatprep.subr.mxu0 %v4134_v2  ;;  %v2823_v21 = vld [vmem:[%s5411_s2 + $0x388] sm:$0xff] }
0x380b   :  { %3919 = vmatpush3.msra.mxu0 %v2841_v17  ;;  %3942 = vmatprep.mubr.msk.f32.mxu0 %vm4135_vm1, %v4134_v2 }
0x380c   :  { %3920 = vmatprep.subr.mxu0 %v4134_v2 }
0x380d   :  { %3921 = vmatpush3.msra.mxu0 %v2838_v22 }
0x380e   :  { %3922 = vmatprep.subr.mxu0 %v4134_v2 }
0x380f   :  { %3923 = vmatpush3.msra.mxu0 %v2835_v41 }
0x3810   :  { %3924 = vmatprep.subr.mxu0 %v4134_v2 }
0x3811   :  { %3925 = vmatpush3.msra.mxu0 %v2832_v19 }
0x3812   :  { %3926 = vmatprep.subr.mxu0 %v4134_v2 }
0x3813   :  { %3927 = vmatpush3.msra.mxu0 %v2829_v1 }
0x3814   :  { %3928 = vmatprep.subr.mxu0 %v4134_v2 }
0x3815   :  { %3929 = vmatpush3.msra.mxu0 %v2826_v20 }
0x3816   :  { %3930 = vmatprep.subr.mxu0 %v4134_v2 }
0x3817   :  { %3931 = vmatpush3.msra.mxu0 %v2823_v21 }
0x3818   :  { %3932 = vmatprep.subr.mxu0 %v4134_v2 }
0x3819   :  { %3933 = vmatpush3.msra.mxu0 %v2820_v29 }
0x381a   :  { %3934 = vmatprep.subr.mxu0 %v4134_v2 }
0x381b   :  { %3935 = vmatpush3.msra.mxu0 %v2817_v26 }
0x381c   :  { %3936 = vmatprep.subr.mxu0 %v4134_v2 }
0x381d   :  { %3937 = vmatpush3.msra.mxu0 %v2814_v6 }
0x381e   :  { %3938 = vmatprep.subr.mxu0 %v4134_v2 }
0x381f   :  { %3939 = vmatpush3.msra.mxu0 %v2811_v11 }
0x3820   :  { %3940 = vmatprep.subr.mxu0 %v4134_v2 }
0x3821   :  { %3941 = vmatpush3.msra.mxu0 %v2808_v5 }
0x3822   :  { %3943 = vmatmul.mubr.msk.f32.vlgmr.msra.gmra.mxu0 %vm2925_vm11, %v5102_v38  ;;  %3945 = vmatprep.subr.mxu0 %v4134_v2  ;;  %v2862_v38 = vld [vmem:[%s5412_s3 + $0x90] sm:$0xff] }
0x3823   :  { %3969 = vmatprep.mubr.msk.f32.mxu0 %vm4135_vm1, %v4134_v2  ;;  %3626 = vmatprep.subr.mxu1 %v2862_v38 }
0x3824   :  { %3627 = vmatpush3.msra.mxu1 %v2846_v4  ;;  %3946 = vmatpush3.msra.mxu0 %v2887_v56 }
0x3825   :  { %3628 = vmatprep.subr.mxu1 %v2861_v31  ;;  %3947 = vmatprep.subr.mxu0 %v4134_v2 }
0x3826   :  { %3629 = vmatpush3.msra.mxu1 %v2845_v30  ;;  %3948 = vmatpush3.msra.mxu0 %v2886_v28 }
0x3827   :  { %3630 = vmatprep.subr.mxu1 %v2860_v32  ;;  %3949 = vmatprep.subr.mxu0 %v4134_v2 }
0x3828   :  { %3631 = vmatpush3.msra.mxu1 %v2844_v33  ;;  %3950 = vmatpush3.msra.mxu0 %v2885_v60 }
0x3829   :  { %3951 = vmatprep.subr.mxu0 %v4134_v2 }
0x382a   :  { %3952 = vmatpush3.msra.mxu0 %v2884_v49 }
0x382b   :  { %3953 = vmatprep.subr.mxu0 %v4134_v2 }
0x382c   :  { %3954 = vmatpush3.msra.mxu0 %v2883_v47 }
0x382d   :  { %3955 = vmatprep.subr.mxu0 %v4134_v2 }
0x382e   :  { %3956 = vmatpush3.msra.mxu0 %v2882_v35 }
0x382f   :  { %3957 = vmatprep.subr.mxu0 %v4134_v2 }
0x3830   :  { %3958 = vmatpush3.msra.mxu0 %v2881_v37 }
0x3831   :  { %3959 = vmatprep.subr.mxu0 %v4134_v2 }
0x3832   :  { %3960 = vmatpush3.msra.mxu0 %v2880_v39 }
0x3833   :  { %3961 = vmatprep.subr.mxu0 %v4134_v2 }
0x3834   :  { %3962 = vmatpush3.msra.mxu0 %v2879_v40 }
0x3835   :  { %3963 = vmatprep.subr.mxu0 %v4134_v2 }
0x3836   :  { %3964 = vmatpush3.msra.mxu0 %v2878_v42 }
0x3837   :  { %3965 = vmatprep.subr.mxu0 %v4134_v2 }
0x3838   :  { %3966 = vmatpush3.msra.mxu0 %v2877_v43 }
0x3839   :  { %3967 = vmatprep.subr.mxu0 %v4134_v2 }
0x383a   :  { %3968 = vmatpush3.msra.mxu0 %v2876_v44 }
0x38aa   :  { %v3065_v51 = vpop.f32.mrf.mxu0 }
0x38ab   :  { %v2994_v52 = vpop.f32.mrf.mxu1 }
0x38ac   :  { %v2995_v53 = vadd.f32 %v2994_v52, %v2894_v48  ;;  %v3067_v50 = vpop.f32.mrf.mxu0 }
0x38ad   :  { %v2996_v54 = vpop.f32.mrf.mxu1 }
0x38ae   :  { %v2997_v2 = vadd.f32 %v2996_v54, %v2898_v18  ;;  %v3066_v16 = vadd.f32 %v3065_v51, %v2995_v53 }
0x38b0   :  { %v3068_v55 = vadd.f32 %v3067_v50, %v2997_v2 }
0x38b2   :  { %3281 = vmatprep.mubr.f32.mxu1 %v3068_v55 }
0x38b3   :  { %3282 = vmatmul.mubr.f32.vlgmr.msra.gmra.mxu1 %v3066_v16 }
0x38ca   :  { %v3584_v57 = vpop.f32.mrf.mxu0 }
0x38cc   :  { %v3585_v9 = vpop.f32.mrf.mxu0 }
0x38cd   :  { %v3586_v61 = vadd.f32 %v3585_v9, %v3584_v57 }
0x38cf   :  { %v3137_v24 = vadd.f32 %v3586_v61, %v2902_v62 }
0x38e2   :  { %v3206_v63 = vpop.f32.mrf.mxu0 }
0x38e3   :  { %v3207_v0 = vadd.f32 %v3206_v63, %v3137_v24 }
0x38e4   :  { %v3944_v34 = vpop.f32.mrf.mxu0 }
0x38e5   :  { %3970 = vmatmul.mubr.msk.f32.vlgmr.msra.gmra.mxu0 %vm2925_vm11, %v3207_v0 }
0x3973   :  { %v3632_v58 = vpop.f32.mrf.mxu1 }
0x3975   :  { %v3633_v23 = vpop.f32.mrf.mxu1 }
0x3976   :  { %v3634_v14 = vadd.f32 %v3633_v23, %v3632_v58 }
0x3978   :  { %v3284_v10 = vadd.f32 %v3634_v14, %v3429_v8 }
0x39a5   :  { %v3353_v7 = vpop.f32.mrf.mxu0 }
0x39a6   :  { %v3354_v25 = vadd.f32 %v3353_v7, %v3284_v10 }
0x39a7   :  { %v3971_v12 = vpop.f32.mrf.mxu0 }
0x39a8   :  { %3358 = vst.msk [vmem:[#allocation4] sm:$0x3] %vm3357_vm12, %v3354_v25 }
0x39a9   :  { %4123 = shalt.err (!%p4120_p4)
}
0x39aa   :  { %3368 = dma.vmem_to_hbm [thread:$0]  %s3366_s29, 32, %s5413_s4, [#allocation5]  }
0x39ab   :  { %4132 = dma.done.wait [#allocation5], 32  }
0x39ac   :  { %4133 = vsyncadd [#allocation5], 4294967264 }
0x39ad   :  { %3372 = vsyncpa [#allocation5], 1 }

</bundles_post_ra>
